<compile_context>
chip_gen: v7x
topology: tpu7x:2x2x1
jax: 0.10.0
libtpu: 0.0.40
codegen_flags: <defaults>
</compile_context>

<pallas_src>
import functools

import jax
import jax.numpy as jnp
import numpy as np
from jax.experimental import pallas as pl
from jax.experimental.pallas import tpu as pltpu

EPS = 1e-5
ROW_TILE_TARGET = 1024        # rows of the flattened (N*H*W, C) matmuls per grid step
H_TILE_TARGET_ROWS = 2048     # target th*W spatial rows per stage-2 grid step
VMEM_LIMIT = 48 * 1024 * 1024  # leaves headroom on v7x (64 MiB physical per TC)


def _compiler_params(n_axes):
    return pltpu.CompilerParams(
        dimension_semantics=("parallel",) * n_axes,
        vmem_limit_bytes=VMEM_LIMIT,
    )


def _pick_row_tile(n_rows, target=ROW_TILE_TARGET):
    """Largest multiple-of-8 divisor of n_rows that is <= target (else n_rows)."""
    if n_rows <= target:
        return n_rows
    t = (target // 8) * 8
    while t >= 8:
        if n_rows % t == 0:
            return t
        t -= 8
    # TODO(synk): support non-dividing row counts with a masked tail block.
    return n_rows


def _pick_h_tile(H, W, target_rows=H_TILE_TARGET_ROWS):
    """Multiple-of-8 divisor of H giving ~target_rows spatial rows per step."""
    cands = [d for d in range(8, H + 1, 8) if H % d == 0]
    if not cands:
        # TODO(synk): masked tails for H not divisible by 8 (e.g. H = 65, 129).
        return H
    ok = [d for d in cands if d * W <= target_rows] or [min(cands)]
    proper = [d for d in ok if d < H]     # prefer >1 block per image (pipelining)
    return max(proper) if proper else max(ok)


def _write_stats(stat_ref, y_f32):
    """Per-block BN partial sums as a dense (8, C) block.

    Row 0 = sum, row 1 = sum of squares, rows 2..7 = 0.  A full (8, C) store is
    sublane-dense (no vst.msk partial stores, unlike a (1, C) block).
    """
    c = y_f32.shape[-1]
    s = jnp.sum(y_f32, axis=0, keepdims=True)
    ss = jnp.sum(y_f32 * y_f32, axis=0, keepdims=True)
    row = jax.lax.broadcasted_iota(jnp.int32, (8, c), 0)
    stat_ref[...] = jnp.where(
        row == 0, jnp.broadcast_to(s, (8, c)),
        jnp.where(row == 1, jnp.broadcast_to(ss, (8, c)), 0.0))


# ------------------------------ stage kernels ------------------------------

def _conv1x1_stats_kernel(x_ref, w_ref, y_ref, stat_ref):
    """y = x @ w (bf16 MXU operands, f32 accumulation) -> bf16 y + BN partials."""
    y = jnp.dot(x_ref[...], w_ref[...], preferred_element_type=jnp.float32)
    y_ref[...] = y.astype(y_ref.dtype)
    _write_stats(stat_ref, y)


def _bn_relu_conv1x1_stats_kernel(y_in_ref, scale_ref, shift_ref, w_ref,
                                  y_ref, stat_ref):
    """a = relu(y_in*scale+shift); y = a @ w; bf16 y + BN partial sums."""
    act = jnp.maximum(
        y_in_ref[...].astype(jnp.float32) * scale_ref[...] + shift_ref[...], 0.0)
    y = jnp.dot(act.astype(jnp.bfloat16), w_ref[...],
                preferred_element_type=jnp.float32)
    y_ref[...] = y.astype(y_ref.dtype)
    _write_stats(stat_ref, y)


def _bn_relu_conv3x3_stats_kernel(y1c_ref, y1u_ref, y1d_ref, scale_ref,
                                  shift_ref, w_ref, y2_ref, stat_ref, act_ref,
                                  *, atrous, hb, pad_l):
    """Fused BN1+ReLU -> 3x3 dilated conv for one (image, H-row-block) tile."""
    f32 = jnp.float32
    a = atrous
    r = pl.program_id(1)
    nb = pl.num_programs(1)
    _, th, W, Cp = y1c_ref.shape
    adt = act_ref.dtype

    sc = scale_ref[...]
    sh = shift_ref[...]

    def bn_relu(v):
        return jnp.maximum(v.astype(f32) * sc + sh, 0.0)

    # BN1+ReLU staged once (single bf16 cast) into the W-padded scratch.  Halo
    # rows come from the neighbouring H-blocks; zeros at the image border.
    act_ref[a:a + th, pad_l:pad_l + W, :] = bn_relu(y1c_ref[0]).astype(adt)
    top_keep = jnp.where(r == 0, 0.0, 1.0)
    act_ref[0:a, pad_l:pad_l + W, :] = (
        bn_relu(y1u_ref[0, hb - a:hb]) * top_keep).astype(adt)
    bot_keep = jnp.where(r == nb - 1, 0.0, 1.0)
    act_ref[th + a:th + 2 * a, pad_l:pad_l + W, :] = (
        bn_relu(y1d_ref[0, 0:a]) * bot_keep).astype(adt)
    # Left/right zero-padding columns.  Written every step (only `a` columns,
    # cheap) rather than once under pl.when(program_id == 0): a per-core scratch
    # is not guaranteed to have executed step 0 when the grid is megacore-sharded.
    zcol = jnp.zeros((th + 2 * a, a, Cp), adt)
    act_ref[:, pad_l - a:pad_l, :] = zcol
    act_ref[:, pad_l + W:pad_l + W + a, :] = zcol

    # Nine shifted windows -> bf16 MXU matmuls accumulated as f32 values (no
    # per-tap accumulator read-modify-write in VMEM).  Each kx strip is read
    # once and shared across the three ky taps (row shifts sit on the untiled
    # major axis and are free).
    # TODO(synk): the kx strips at pad_l +/- atrous are sublane-unaligned when
    # atrous % 16 != 0; a pltpu.roll-based shift would move that cost to the XLU.
    acc = None
    for kx in range(3):
        c0 = pad_l + (kx - 1) * a
        strip = act_ref[:, c0:c0 + W, :]              # (th + 2a, W, Cp) bf16
        for ky in range(3):
            win = strip[ky * a:ky * a + th].reshape(th * W, Cp)
            contrib = jnp.dot(win, w_ref[ky, kx], preferred_element_type=f32)
            acc = contrib if acc is None else acc + contrib

    y2_ref[...] = acc.reshape(1, th, W, Cp).astype(y2_ref.dtype)
    _write_stats(stat_ref, acc)


def _bn_residual_relu_kernel(y_ref, scale_ref, shift_ref, res_ref, out_ref):
    out_ref[...] = jnp.maximum(
        y_ref[...].astype(jnp.float32) * scale_ref[...] + shift_ref[...]
        + res_ref[...].astype(jnp.float32), 0.0)


# ------------------------------ host wrapper ------------------------------

def _fuse_bn(stats, gamma, beta, count):
    """Reduce per-tile (sum, sum-of-squares) blocks into fused BN scale/shift."""
    st = stats.reshape(-1, 8, stats.shape[-1])
    s = jnp.sum(st[:, 0, :], axis=0)
    ss = jnp.sum(st[:, 1, :], axis=0)
    mean = s / count
    # Biased batch variance (training-mode BN, SyncBN master-path formula);
    # clamped >= 0 against E[x^2]-mean^2 cancellation.
    # TODO(synk): centered second pass if tolerances tighten at production sizes.
    var = jnp.maximum(ss / count - mean * mean, 0.0)
    scale = jax.lax.rsqrt(var + EPS) * gamma.astype(jnp.float32)
    shift = beta.astype(jnp.float32) - mean * scale
    return scale.reshape(1, -1), shift.reshape(1, -1)


@functools.partial(jax.jit, static_argnames=("atrous",))
def bottleneck_forward(x_nchw, params, *, atrous=1):
    """x_nchw: (N, Cin, H, W) -> (N, Cout, H, W); Cout == Cin (downsample=None)."""
    N, Cin, H, W = x_nchw.shape
    Cp = params["w1"].shape[0]          # planes
    Cout = params["w3"].shape[0]        # planes * expansion
    assert Cout == Cin, "downsample=None requires inplanes == planes * expansion"
    NHW = N * H * W
    a = atrous
    f32, bf16 = jnp.float32, jnp.bfloat16

    # Channels-last, bf16: the single HBM copy of the input, used both as the
    # conv1 operand and as the residual (so the skip path is bf16-rounded like
    # every other stage boundary).
    x_bf16 = jnp.transpose(x_nchw, (0, 2, 3, 1)).astype(bf16).reshape(NHW, Cin)

    # Weights in matmul form, bf16 for the MXU fast path.
    w1 = jnp.transpose(params["w1"][:, :, 0, 0], (1, 0)).astype(bf16)   # (Cin, Cp)
    w2 = jnp.transpose(params["w2"], (2, 3, 1, 0)).astype(bf16)         # (3,3,Cp,Cp)
    w3 = jnp.transpose(params["w3"][:, :, 0, 0], (1, 0)).astype(bf16)   # (Cp, Cout)
    # TODO(synk): mark w1/w2/w3 BlockSpecs with pipeline_mode=pl.Buffered(1)
    # (grid-invariant operands) to save VMEM at production channel counts.

    g1, b1 = params["g1"], params["b1"]
    g2, b2 = params["g2"], params["b2"]
    g3, b3 = params["g3"], params["b3"]

    tr = _pick_row_tile(NHW)
    n_tiles = NHW // tr

    # ---- stage 1: conv1 (1x1) + BN1 partial stats, row-tiled & pipelined ----
    y1, stat1 = pl.pallas_call(
        _conv1x1_stats_kernel,
        grid=(n_tiles,),
        in_specs=[
            pl.BlockSpec((tr, Cin), lambda i: (i, 0)),
            pl.BlockSpec((Cin, Cp), lambda i: (0, 0)),
        ],
        out_specs=[
            pl.BlockSpec((tr, Cp), lambda i: (i, 0)),
            pl.BlockSpec((8, Cp), lambda i: (i, 0)),
        ],
        out_shape=[
            jax.ShapeDtypeStruct((NHW, Cp), bf16),
            jax.ShapeDtypeStruct((n_tiles * 8, Cp), f32),
        ],
        compiler_params=_compiler_params(1),
        cost_estimate=pl.CostEstimate(
            flops=2 * NHW * Cin * Cp, transcendentals=0,
            bytes_accessed=NHW * (Cin + Cp) * 2 + Cin * Cp * 2
            + n_tiles * 8 * Cp * 4),
    )(x_bf16, w1)
    scale1, shift1 = _fuse_bn(stat1, g1, b1, NHW)

    # ---- stage 2: BN1+ReLU -> conv2 (3x3, dilation=atrous) + BN2 stats ----
    th = _pick_h_tile(H, W)              # output rows per grid step
    nb = H // th
    hb = 8 * ((a + 7) // 8)              # halo block rows (8-aligned)
    if H % hb != 0 or th % hb != 0 or a > hb:
        hb = th                          # fall back to full-block halos
    assert a <= hb <= th, "atrous rate larger than the H tile is unsupported"  # TODO(synk)
    rpb = th // hb
    nhb = H // hb
    pad_l = 16 * max(1, (a + 15) // 16)  # 16-aligned interior start (bf16 packing)
    wtot = pad_l + W + a

    y1_img = y1.reshape(N, H, W, Cp)
    k2 = functools.partial(_bn_relu_conv3x3_stats_kernel,
                           atrous=a, hb=hb, pad_l=pad_l)
    y2, stat2 = pl.pallas_call(
        k2,
        grid=(N, nb),
        in_specs=[
            pl.BlockSpec((1, th, W, Cp), lambda n, r: (n, r, 0, 0)),
            pl.BlockSpec((1, hb, W, Cp),
                         lambda n, r: (n, jnp.maximum(r * rpb - 1, 0), 0, 0)),
            pl.BlockSpec((1, hb, W, Cp),
                         lambda n, r: (n, jnp.minimum(r * rpb + rpb, nhb - 1), 0, 0)),
            pl.BlockSpec((1, Cp), lambda n, r: (0, 0)),
            pl.BlockSpec((1, Cp), lambda n, r: (0, 0)),
            pl.BlockSpec((3, 3, Cp, Cp), lambda n, r: (0, 0, 0, 0)),
        ],
        out_specs=[
            pl.BlockSpec((1, th, W, Cp), lambda n, r: (n, r, 0, 0)),
            pl.BlockSpec((8, Cp), lambda n, r: (n * nb + r, 0)),
        ],
        out_shape=[
            jax.ShapeDtypeStruct((N, H, W, Cp), bf16),
            jax.ShapeDtypeStruct((N * nb * 8, Cp), f32),
        ],
        scratch_shapes=[pltpu.VMEM((th + 2 * a, wtot, Cp), bf16)],
        compiler_params=_compiler_params(2),
        cost_estimate=pl.CostEstimate(
            flops=2 * 9 * NHW * Cp * Cp, transcendentals=0,
            bytes_accessed=NHW * Cp * 2 * (2 + 2 * hb // max(th, 1))
            + 9 * Cp * Cp * 2 + N * nb * 8 * Cp * 4),
    )(y1_img, y1_img, y1_img, scale1, shift1, w2)
    scale2, shift2 = _fuse_bn(stat2, g2, b2, NHW)

    # ---- stage 3: BN2+ReLU -> conv3 (1x1) + BN3 stats, row-tiled ----
    y3, stat3 = pl.pallas_call(
        _bn_relu_conv1x1_stats_kernel,
        grid=(n_tiles,),
        in_specs=[
            pl.BlockSpec((tr, Cp), lambda i: (i, 0)),
            pl.BlockSpec((1, Cp), lambda i: (0, 0)),
            pl.BlockSpec((1, Cp), lambda i: (0, 0)),
            pl.BlockSpec((Cp, Cout), lambda i: (0, 0)),
        ],
        out_specs=[
            pl.BlockSpec((tr, Cout), lambda i: (i, 0)),
            pl.BlockSpec((8, Cout), lambda i: (i, 0)),
        ],
        out_shape=[
            jax.ShapeDtypeStruct((NHW, Cout), bf16),
            jax.ShapeDtypeStruct((n_tiles * 8, Cout), f32),
        ],
        compiler_params=_compiler_params(1),
        cost_estimate=pl.CostEstimate(
            flops=2 * NHW * Cp * Cout, transcendentals=0,
            bytes_accessed=NHW * (Cp + Cout) * 2 + Cp * Cout * 2
            + n_tiles * 8 * Cout * 4),
    )(y2.reshape(NHW, Cp), scale2, shift2, w3)
    scale3, shift3 = _fuse_bn(stat3, g3, b3, NHW)

    # ---- stage 4: BN3 -> residual add -> ReLU, row-tiled ----
    out_flat = pl.pallas_call(
        _bn_residual_relu_kernel,
        grid=(n_tiles,),
        in_specs=[
            pl.BlockSpec((tr, Cout), lambda i: (i, 0)),
            pl.BlockSpec((1, Cout), lambda i: (0, 0)),
            pl.BlockSpec((1, Cout), lambda i: (0, 0)),
            pl.BlockSpec((tr, Cout), lambda i: (i, 0)),
        ],
        out_specs=pl.BlockSpec((tr, Cout), lambda i: (i, 0)),
        out_shape=jax.ShapeDtypeStruct((NHW, Cout), f32),
        compiler_params=_compiler_params(1),
        cost_estimate=pl.CostEstimate(
            flops=4 * NHW * Cout, transcendentals=0,
            bytes_accessed=NHW * Cout * (2 + 2 + 4)),
    )(y3, scale3, shift3, x_bf16)

    return jnp.transpose(out_flat.reshape(N, H, W, Cout), (0, 3, 1, 2))


# --------------------------- plain-JAX reference ---------------------------

def _reference(x_nchw, params, *, atrous=1):
    """Module-faithful forward (training-mode batch statistics) expressed with
    the same precision/staging choices as the kernel pipeline: bf16 conv
    operands, bf16 stage boundaries and residual, f32 accumulation, and BN
    statistics from the f32 sum / sum-of-squares (SyncBN master-path formula)."""
    f32, bf16 = jnp.float32, jnp.bfloat16
    dn = ("NHWC", "HWIO", "NHWC")
    xb = jnp.transpose(x_nchw, (0, 2, 3, 1)).astype(bf16)

    def conv(t_bf16, w, pad, dil):
        return jax.lax.conv_general_dilated(
            t_bf16, w.astype(bf16), (1, 1), pad, rhs_dilation=dil,
            dimension_numbers=dn, preferred_element_type=f32)

    def bn(t_f32, g, b, relu=True):
        n = t_f32.shape[0] * t_f32.shape[1] * t_f32.shape[2]
        s = jnp.sum(t_f32, axis=(0, 1, 2))
        ss = jnp.sum(t_f32 * t_f32, axis=(0, 1, 2))
        mean = s / n
        var = jnp.maximum(ss / n - mean * mean, 0.0)
        scale = jax.lax.rsqrt(var + EPS) * g
        shift = b - mean * scale
        # The kernels stage the conv output in HBM as bf16 before applying BN.
        y = t_f32.astype(bf16).astype(f32) * scale + shift
        return jnp.maximum(y, 0.0) if relu else y

    w1 = jnp.transpose(params["w1"], (2, 3, 1, 0))
    w2 = jnp.transpose(params["w2"], (2, 3, 1, 0))
    w3 = jnp.transpose(params["w3"], (2, 3, 1, 0))

    t = conv(xb, w1, "VALID", (1, 1))
    t = bn(t, params["g1"], params["b1"])
    t = conv(t.astype(bf16), w2, [(atrous, atrous)] * 2, (atrous, atrous))
    t = bn(t, params["g2"], params["b2"])
    t = conv(t.astype(bf16), w3, "VALID", (1, 1))
    t = bn(t, params["g3"], params["b3"], relu=False)
    out = jnp.maximum(t + xb.astype(f32), 0.0)
    return jnp.transpose(out, (0, 3, 1, 2))


if __name__ == "__main__":
    # Bottleneck(inplanes=16, planes=4): expansion 4 -> out channels 16
    N, inplanes, H, W = 2, 16, 16, 16
    planes, expansion, atrous = 4, 4, 1

    key = jax.random.PRNGKey(0)
    ks = jax.random.split(key, 10)
    params = {
        "w1": 0.2 * jax.random.normal(ks[0], (planes, inplanes, 1, 1), jnp.float32),
        "g1": 1.0 + 0.1 * jax.random.normal(ks[1], (planes,), jnp.float32),
        "b1": 0.1 * jax.random.normal(ks[2], (planes,), jnp.float32),
        "w2": 0.2 * jax.random.normal(ks[3], (planes, planes, 3, 3), jnp.float32),
        "g2": 1.0 + 0.1 * jax.random.normal(ks[4], (planes,), jnp.float32),
        "b2": 0.1 * jax.random.normal(ks[5], (planes,), jnp.float32),
        "w3": 0.2 * jax.random.normal(ks[6], (planes * expansion, planes, 1, 1), jnp.float32),
        "g3": 1.0 + 0.1 * jax.random.normal(ks[7], (planes * expansion,), jnp.float32),
        "b3": 0.1 * jax.random.normal(ks[8], (planes * expansion,), jnp.float32),
    }
    x = jax.random.normal(ks[9], (N, inplanes, H, W), jnp.float32)

    out = jax.block_until_ready(bottleneck_forward(x, params, atrous=atrous))
    ref = jax.block_until_ready(_reference(x, params, atrous=atrous))

    # bf16 MXU operands + bf16 stage boundaries: rare 1-ulp bf16 rounding flips
    # in intermediate activations amplify to ~5e-3 absolute on O(1) outputs, so
    # compare at bf16-level tolerance.
    np.testing.assert_allclose(np.asarray(out), np.asarray(ref),
                               atol=2.5e-2, rtol=2.5e-2)
    print("KERNEL_OK")
</pallas_src>

<mosaic_0001>
module attributes {stable_mosaic.version = 11 : i64} {
  func.func @_conv1x1_stats_kernel(%arg0: i32, %arg1: memref<512x16xbf16, #tpu.memory_space<vmem>>, %arg2: memref<16x4xbf16, #tpu.memory_space<vmem>>, %arg3: memref<512x4xbf16, #tpu.memory_space<vmem>>, %arg4: memref<8x4xf32, #tpu.memory_space<vmem>>) attributes {dimension_semantics = [#tpu.dimension_semantics<parallel>], iteration_bounds = array<i64: 1>, scalar_prefetch = 0 : i64, scratch_operands = 0 : i64, tpu.core_type = #tpu.core_type<tc>, window_params = [{transform_indices = @transform_0, window_bounds = array<i64: 512, 16>}, {pipeline_mode = #tpu.pipeline_mode<synchronous>, transform_indices = @transform_1, window_bounds = array<i64: 16, 4>}, {transform_indices = @transform_2, window_bounds = array<i64: 512, 4>}, {transform_indices = @transform_3, window_bounds = array<i64: 8, 4>}]} {
    %c0 = arith.constant 0 : index
    %c0_0 = arith.constant 0 : index
    %0 = vector.load %arg1[%c0, %c0_0] : memref<512x16xbf16, #tpu.memory_space<vmem>>, vector<512x16xbf16>
    %c0_1 = arith.constant 0 : index
    %c0_2 = arith.constant 0 : index
    %1 = vector.load %arg2[%c0_1, %c0_2] : memref<16x4xbf16, #tpu.memory_space<vmem>>, vector<16x4xbf16>
    %cst = arith.constant dense<0.000000e+00> : vector<512x4xf32>
    %2 = tpu.matmul %0, %1, %cst {dimension_numbers = #tpu.dot_dimension_numbers<[1], [0], [0], [1], [0, 0, 1, 1], [], []>} : vector<512x16xbf16>, vector<16x4xbf16>, vector<512x4xf32> -> vector<512x4xf32>
    %3 = arith.truncf %2 : vector<512x4xf32> to vector<512x4xbf16>
    %c0_3 = arith.constant 0 : index
    %c0_4 = arith.constant 0 : index
    %4 = vector.load %arg3[%c0_3, %c0_4] : memref<512x4xbf16, #tpu.memory_space<vmem>>, vector<512x4xbf16>
    tpu.vector_store %arg3[%c0_3, %c0_4], %3 {strides = array<i32>} : memref<512x4xbf16, #tpu.memory_space<vmem>>, vector<512x4xbf16>,
    %cst_5 = arith.constant dense<0.000000e+00> : vector<4xf32>
    %5 = vector.multi_reduction <add>, %2, %cst_5 [0] : vector<512x4xf32> to vector<4xf32>
    %6 = vector.shape_cast %5 : vector<4xf32> to vector<1x4xf32>
    %7 = arith.mulf %2, %2 : vector<512x4xf32>
    %cst_6 = arith.constant dense<0.000000e+00> : vector<4xf32>
    %8 = vector.multi_reduction <add>, %7, %cst_6 [0] : vector<512x4xf32> to vector<4xf32>
    %9 = vector.shape_cast %8 : vector<4xf32> to vector<1x4xf32>
    %10 = tpu.iota {dimensions = array<i32: 0>} : vector<8x4xi32>
    %c0_i32 = arith.constant 0 : i32
    %11 = vector.broadcast %c0_i32 : i32 to vector<8x4xi32>
    %12 = arith.cmpi eq, %10, %11 : vector<8x4xi32>
    %13 = vector.shape_cast %6 : vector<1x4xf32> to vector<1x4xf32>
    %14 = vector.broadcast %13 : vector<1x4xf32> to vector<8x4xf32>
    %c1_i32 = arith.constant 1 : i32
    %15 = vector.broadcast %c1_i32 : i32 to vector<8x4xi32>
    %16 = arith.cmpi eq, %10, %15 : vector<8x4xi32>
    %17 = vector.shape_cast %9 : vector<1x4xf32> to vector<1x4xf32>
    %18 = vector.broadcast %17 : vector<1x4xf32> to vector<8x4xf32>
    %cst_7 = arith.constant 0.000000e+00 : f32
    %19 = vector.broadcast %cst_7 : f32 to vector<8x4xf32>
    %20 = arith.select %16, %18, %19 : vector<8x4xi1>, vector<8x4xf32>
    %21 = arith.select %12, %14, %20 : vector<8x4xi1>, vector<8x4xf32>
    %c0_8 = arith.constant 0 : index
    %c0_9 = arith.constant 0 : index
    %22 = vector.load %arg4[%c0_8, %c0_9] : memref<8x4xf32, #tpu.memory_space<vmem>>, vector<8x4xf32>
    tpu.vector_store %arg4[%c0_8, %c0_9], %21 {strides = array<i32>} : memref<8x4xf32, #tpu.memory_space<vmem>>, vector<8x4xf32>,
    return
  }
  func.func @transform_0(%arg0: i32) -> (i32, i32) {
    %c0_i32 = arith.constant 0 : i32
    %c0_i32_0 = arith.constant 0 : i32
    return %arg0, %c0_i32 : i32, i32
  }
  func.func @transform_1(%arg0: i32) -> (i32, i32) {
    %c0_i32 = arith.constant 0 : i32
    %c0_i32_0 = arith.constant 0 : i32
    %c0_i32_1 = arith.constant 0 : i32
    return %c0_i32, %c0_i32_0 : i32, i32
  }
  func.func @transform_2(%arg0: i32) -> (i32, i32) {
    %c0_i32 = arith.constant 0 : i32
    %c0_i32_0 = arith.constant 0 : i32
    return %arg0, %c0_i32 : i32, i32
  }
  func.func @transform_3(%arg0: i32) -> (i32, i32) {
    %c0_i32 = arith.constant 0 : i32
    %c0_i32_0 = arith.constant 0 : i32
    return %arg0, %c0_i32 : i32, i32
  }
}

module attributes {stable_mosaic.version = 11 : i64} {
  func.func @_bn_relu_conv3x3_stats_kernel(%arg0: i32, %arg1: i32, %arg2: memref<1x8x16x4xbf16, #tpu.memory_space<vmem>>, %arg3: memref<1x8x16x4xbf16, #tpu.memory_space<vmem>>, %arg4: memref<1x8x16x4xbf16, #tpu.memory_space<vmem>>, %arg5: memref<1x4xf32, #tpu.memory_space<vmem>>, %arg6: memref<1x4xf32, #tpu.memory_space<vmem>>, %arg7: memref<3x3x4x4xbf16, #tpu.memory_space<vmem>>, %arg8: memref<1x8x16x4xbf16, #tpu.memory_space<vmem>>, %arg9: memref<8x4xf32, #tpu.memory_space<vmem>>, %arg10: memref<10x33x4xbf16, #tpu.memory_space<vmem>>) attributes {dimension_semantics = [#tpu.dimension_semantics<parallel>, #tpu.dimension_semantics<parallel>], iteration_bounds = array<i64: 2, 2>, scalar_prefetch = 0 : i64, scratch_operands = 1 : i64, tpu.core_type = #tpu.core_type<tc>, window_params = [{transform_indices = @transform_0, window_bounds = array<i64: 1, 8, 16, 4>}, {transform_indices = @transform_1, window_bounds = array<i64: 1, 8, 16, 4>}, {transform_indices = @transform_2, window_bounds = array<i64: 1, 8, 16, 4>}, {pipeline_mode = #tpu.pipeline_mode<synchronous>, transform_indices = @transform_3, window_bounds = array<i64: 1, 4>}, {pipeline_mode = #tpu.pipeline_mode<synchronous>, transform_indices = @transform_4, window_bounds = array<i64: 1, 4>}, {pipeline_mode = #tpu.pipeline_mode<synchronous>, transform_indices = @transform_5, window_bounds = array<i64: 3, 3, 4, 4>}, {transform_indices = @transform_6, window_bounds = array<i64: 1, 8, 16, 4>}, {transform_indices = @transform_7, window_bounds = array<i64: 8, 4>}]} {
    %c0 = arith.constant 0 : index
    %c0_0 = arith.constant 0 : index
    %0 = vector.load %arg5[%c0, %c0_0] : memref<1x4xf32, #tpu.memory_space<vmem>>, vector<1x4xf32>
    %c0_1 = arith.constant 0 : index
    %c0_2 = arith.constant 0 : index
    %1 = vector.load %arg6[%c0_1, %c0_2] : memref<1x4xf32, #tpu.memory_space<vmem>>, vector<1x4xf32>
    %c0_3 = arith.constant 0 : index
    %c0_4 = arith.constant 0 : index
    %c0_5 = arith.constant 0 : index
    %c0_6 = arith.constant 0 : index
    %2 = vector.load %arg2[%c0_3, %c0_4, %c0_5, %c0_6] : memref<1x8x16x4xbf16, #tpu.memory_space<vmem>>, vector<1x8x16x4xbf16>
    %3 = vector.shape_cast %2 : vector<1x8x16x4xbf16> to vector<8x16x4xbf16>
    %4 = arith.extf %3 : vector<8x16x4xbf16> to vector<8x16x4xf32>
    %5 = vector.shape_cast %0 : vector<1x4xf32> to vector<1x1x4xf32>
    %6 = vector.broadcast %5 : vector<1x1x4xf32> to vector<8x16x4xf32>
    %7 = arith.mulf %4, %6 : vector<8x16x4xf32>
    %8 = vector.shape_cast %1 : vector<1x4xf32> to vector<1x1x4xf32>
    %9 = vector.broadcast %8 : vector<1x1x4xf32> to vector<8x16x4xf32>
    %10 = arith.addf %7, %9 : vector<8x16x4xf32>
    %cst = arith.constant 0.000000e+00 : f32
    %11 = vector.broadcast %cst : f32 to vector<8x16x4xf32>
    %12 = arith.maximumf %10, %11 : vector<8x16x4xf32>
    %13 = arith.truncf %12 : vector<8x16x4xf32> to vector<8x16x4xbf16>
    %c1 = arith.constant 1 : index
    %c16 = arith.constant 16 : index
    %c0_7 = arith.constant 0 : index
    %14 = vector.load %arg10[%c1, %c16, %c0_7] : memref<10x33x4xbf16, #tpu.memory_space<vmem>>, vector<8x16x4xbf16>
    tpu.vector_store %arg10[%c1, %c16, %c0_7], %13 {strides = array<i32>} : memref<10x33x4xbf16, #tpu.memory_space<vmem>>, vector<8x16x4xbf16>,
    %c0_i32 = arith.constant 0 : i32
    %15 = arith.cmpi eq, %arg1, %c0_i32 : i32
    %cst_8 = arith.constant 0.000000e+00 : f32
    %cst_9 = arith.constant 1.000000e+00 : f32
    %16 = arith.select %15, %cst_8, %cst_9 : f32
    %c0_10 = arith.constant 0 : index
    %c7 = arith.constant 7 : index
    %c0_11 = arith.constant 0 : index
    %c0_12 = arith.constant 0 : index
    %17 = vector.load %arg3[%c0_10, %c7, %c0_11, %c0_12] : memref<1x8x16x4xbf16, #tpu.memory_space<vmem>>, vector<1x1x16x4xbf16>
    %18 = vector.shape_cast %17 : vector<1x1x16x4xbf16> to vector<1x16x4xbf16>
    %19 = arith.extf %18 : vector<1x16x4xbf16> to vector<1x16x4xf32>
    %20 = vector.shape_cast %0 : vector<1x4xf32> to vector<1x1x4xf32>
    %21 = vector.broadcast %20 : vector<1x1x4xf32> to vector<1x16x4xf32>
    %22 = arith.mulf %19, %21 : vector<1x16x4xf32>
    %23 = vector.shape_cast %1 : vector<1x4xf32> to vector<1x1x4xf32>
    %24 = vector.broadcast %23 : vector<1x1x4xf32> to vector<1x16x4xf32>
    %25 = arith.addf %22, %24 : vector<1x16x4xf32>
    %cst_13 = arith.constant 0.000000e+00 : f32
    %26 = vector.broadcast %cst_13 : f32 to vector<1x16x4xf32>
    %27 = arith.maximumf %25, %26 : vector<1x16x4xf32>
    %28 = vector.broadcast %16 : f32 to vector<1x16x4xf32>
    %29 = arith.mulf %27, %28 : vector<1x16x4xf32>
    %30 = arith.truncf %29 : vector<1x16x4xf32> to vector<1x16x4xbf16>
    %c0_14 = arith.constant 0 : index
    %c16_15 = arith.constant 16 : index
    %c0_16 = arith.constant 0 : index
    %31 = vector.load %arg10[%c0_14, %c16_15, %c0_16] : memref<10x33x4xbf16, #tpu.memory_space<vmem>>, vector<1x16x4xbf16>
    tpu.vector_store %arg10[%c0_14, %c16_15, %c0_16], %30 {strides = array<i32>} : memref<10x33x4xbf16, #tpu.memory_space<vmem>>, vector<1x16x4xbf16>,
    %c1_i32 = arith.constant 1 : i32
    %32 = arith.cmpi eq, %arg1, %c1_i32 : i32
    %cst_17 = arith.constant 0.000000e+00 : f32
    %cst_18 = arith.constant 1.000000e+00 : f32
    %33 = arith.select %32, %cst_17, %cst_18 : f32
    %c0_19 = arith.constant 0 : index
    %c0_20 = arith.constant 0 : index
    %c0_21 = arith.constant 0 : index
    %c0_22 = arith.constant 0 : index
    %34 = vector.load %arg4[%c0_19, %c0_20, %c0_21, %c0_22] : memref<1x8x16x4xbf16, #tpu.memory_space<vmem>>, vector<1x1x16x4xbf16>
    %35 = vector.shape_cast %34 : vector<1x1x16x4xbf16> to vector<1x16x4xbf16>
    %36 = arith.extf %35 : vector<1x16x4xbf16> to vector<1x16x4xf32>
    %37 = vector.shape_cast %0 : vector<1x4xf32> to vector<1x1x4xf32>
    %38 = vector.broadcast %37 : vector<1x1x4xf32> to vector<1x16x4xf32>
    %39 = arith.mulf %36, %38 : vector<1x16x4xf32>
    %40 = vector.shape_cast %1 : vector<1x4xf32> to vector<1x1x4xf32>
    %41 = vector.broadcast %40 : vector<1x1x4xf32> to vector<1x16x4xf32>
    %42 = arith.addf %39, %41 : vector<1x16x4xf32>
    %cst_23 = arith.constant 0.000000e+00 : f32
    %43 = vector.broadcast %cst_23 : f32 to vector<1x16x4xf32>
    %44 = arith.maximumf %42, %43 : vector<1x16x4xf32>
    %45 = vector.broadcast %33 : f32 to vector<1x16x4xf32>
    %46 = arith.mulf %44, %45 : vector<1x16x4xf32>
    %47 = arith.truncf %46 : vector<1x16x4xf32> to vector<1x16x4xbf16>
    %c9 = arith.constant 9 : index
    %c16_24 = arith.constant 16 : index
    %c0_25 = arith.constant 0 : index
    %48 = vector.load %arg10[%c9, %c16_24, %c0_25] : memref<10x33x4xbf16, #tpu.memory_space<vmem>>, vector<1x16x4xbf16>
    tpu.vector_store %arg10[%c9, %c16_24, %c0_25], %47 {strides = array<i32>} : memref<10x33x4xbf16, #tpu.memory_space<vmem>>, vector<1x16x4xbf16>,
    %cst_26 = arith.constant 0.000000e+00 : bf16
    %49 = vector.broadcast %cst_26 : bf16 to vector<10x1x4xbf16>
    %c0_27 = arith.constant 0 : index
    %c15 = arith.constant 15 : index
    %c0_28 = arith.constant 0 : index
    %50 = vector.load %arg10[%c0_27, %c15, %c0_28] : memref<10x33x4xbf16, #tpu.memory_space<vmem>>, vector<10x1x4xbf16>
    tpu.vector_store %arg10[%c0_27, %c15, %c0_28], %49 {strides = array<i32>} : memref<10x33x4xbf16, #tpu.memory_space<vmem>>, vector<10x1x4xbf16>,
    %c0_29 = arith.constant 0 : index
    %c32 = arith.constant 32 : index
    %c0_30 = arith.constant 0 : index
    %51 = vector.load %arg10[%c0_29, %c32, %c0_30] : memref<10x33x4xbf16, #tpu.memory_space<vmem>>, vector<10x1x4xbf16>
    tpu.vector_store %arg10[%c0_29, %c32, %c0_30], %49 {strides = array<i32>} : memref<10x33x4xbf16, #tpu.memory_space<vmem>>, vector<10x1x4xbf16>,
    %c0_31 = arith.constant 0 : index
    %c15_32 = arith.constant 15 : index
    %c0_33 = arith.constant 0 : index
    %52 = vector.load %arg10[%c0_31, %c15_32, %c0_33] : memref<10x33x4xbf16, #tpu.memory_space<vmem>>, vector<10x16x4xbf16>
    %53 = vector.extract_strided_slice %52 {offsets = [0, 0, 0], sizes = [8, 16, 4], strides = [1, 1, 1]} : vector<10x16x4xbf16> to vector<8x16x4xbf16>
    %54 = vector.shape_cast %53 : vector<8x16x4xbf16> to vector<128x4xbf16>
    %c0_34 = arith.constant 0 : index
    %c0_35 = arith.constant 0 : index
    %c0_36 = arith.constant 0 : index
    %c0_37 = arith.constant 0 : index
    %55 = vector.load %arg7[%c0_34, %c0_35, %c0_36, %c0_37] : memref<3x3x4x4xbf16, #tpu.memory_space<vmem>>, vector<1x1x4x4xbf16>
    %56 = vector.shape_cast %55 : vector<1x1x4x4xbf16> to vector<4x4xbf16>
    %cst_38 = arith.constant dense<0.000000e+00> : vector<128x4xf32>
    %57 = tpu.matmul %54, %56, %cst_38 {dimension_numbers = #tpu.dot_dimension_numbers<[1], [0], [0], [1], [0, 0, 1, 1], [], []>} : vector<128x4xbf16>, vector<4x4xbf16>, vector<128x4xf32> -> vector<128x4xf32>
    %58 = vector.extract_strided_slice %52 {offsets = [1, 0, 0], sizes = [8, 16, 4], strides = [1, 1, 1]} : vector<10x16x4xbf16> to vector<8x16x4xbf16>
    %59 = vector.shape_cast %58 : vector<8x16x4xbf16> to vector<128x4xbf16>
    %c1_39 = arith.constant 1 : index
    %c0_40 = arith.constant 0 : index
    %c0_41 = arith.constant 0 : index
    %c0_42 = arith.constant 0 : index
    %60 = vector.load %arg7[%c1_39, %c0_40, %c0_41, %c0_42] : memref<3x3x4x4xbf16, #tpu.memory_space<vmem>>, vector<1x1x4x4xbf16>
    %61 = vector.shape_cast %60 : vector<1x1x4x4xbf16> to vector<4x4xbf16>
    %cst_43 = arith.constant dense<0.000000e+00> : vector<128x4xf32>
    %62 = tpu.matmul %59, %61, %cst_43 {dimension_numbers = #tpu.dot_dimension_numbers<[1], [0], [0], [1], [0, 0, 1, 1], [], []>} : vector<128x4xbf16>, vector<4x4xbf16>, vector<128x4xf32> -> vector<128x4xf32>
    %63 = arith.addf %57, %62 : vector<128x4xf32>
    %64 = vector.extract_strided_slice %52 {offsets = [2, 0, 0], sizes = [8, 16, 4], strides = [1, 1, 1]} : vector<10x16x4xbf16> to vector<8x16x4xbf16>
    %65 = vector.shape_cast %64 : vector<8x16x4xbf16> to vector<128x4xbf16>
    %c2 = arith.constant 2 : index
    %c0_44 = arith.constant 0 : index
    %c0_45 = arith.constant 0 : index
    %c0_46 = arith.constant 0 : index
    %66 = vector.load %arg7[%c2, %c0_44, %c0_45, %c0_46] : memref<3x3x4x4xbf16, #tpu.memory_space<vmem>>, vector<1x1x4x4xbf16>
    %67 = vector.shape_cast %66 : vector<1x1x4x4xbf16> to vector<4x4xbf16>
    %cst_47 = arith.constant dense<0.000000e+00> : vector<128x4xf32>
    %68 = tpu.matmul %65, %67, %cst_47 {dimension_numbers = #tpu.dot_dimension_numbers<[1], [0], [0], [1], [0, 0, 1, 1], [], []>} : vector<128x4xbf16>, vector<4x4xbf16>, vector<128x4xf32> -> vector<128x4xf32>
    %69 = arith.addf %63, %68 : vector<128x4xf32>
    %c0_48 = arith.constant 0 : index
    %c16_49 = arith.constant 16 : index
    %c0_50 = arith.constant 0 : index
    %70 = vector.load %arg10[%c0_48, %c16_49, %c0_50] : memref<10x33x4xbf16, #tpu.memory_space<vmem>>, vector<10x16x4xbf16>
    %71 = vector.extract_strided_slice %70 {offsets = [0, 0, 0], sizes = [8, 16, 4], strides = [1, 1, 1]} : vector<10x16x4xbf16> to vector<8x16x4xbf16>
    %72 = vector.shape_cast %71 : vector<8x16x4xbf16> to vector<128x4xbf16>
    %c0_51 = arith.constant 0 : index
    %c1_52 = arith.constant 1 : index
    %c0_53 = arith.constant 0 : index
    %c0_54 = arith.constant 0 : index
    %73 = vector.load %arg7[%c0_51, %c1_52, %c0_53, %c0_54] : memref<3x3x4x4xbf16, #tpu.memory_space<vmem>>, vector<1x1x4x4xbf16>
    %74 = vector.shape_cast %73 : vector<1x1x4x4xbf16> to vector<4x4xbf16>
    %cst_55 = arith.constant dense<0.000000e+00> : vector<128x4xf32>
    %75 = tpu.matmul %72, %74, %cst_55 {dimension_numbers = #tpu.dot_dimension_numbers<[1], [0], [0], [1], [0, 0, 1, 1], [], []>} : vector<128x4xbf16>, vector<4x4xbf16>, vector<128x4xf32> -> vector<128x4xf32>
    %76 = arith.addf %69, %75 : vector<128x4xf32>
    %77 = vector.extract_strided_slice %70 {offsets = [1, 0, 0], sizes = [8, 16, 4], strides = [1, 1, 1]} : vector<10x16x4xbf16> to vector<8x16x4xbf16>
    %78 = vector.shape_cast %77 : vector<8x16x4xbf16> to vector<128x4xbf16>
    %c1_56 = arith.constant 1 : index
    %c1_57 = arith.constant 1 : index
    %c0_58 = arith.constant 0 : index
    %c0_59 = arith.constant 0 : index
    %79 = vector.load %arg7[%c1_56, %c1_57, %c0_58, %c0_59] : memref<3x3x4x4xbf16, #tpu.memory_space<vmem>>, vector<1x1x4x4xbf16>
    %80 = vector.shape_cast %79 : vector<1x1x4x4xbf16> to vector<4x4xbf16>
    %cst_60 = arith.constant dense<0.000000e+00> : vector<128x4xf32>
    %81 = tpu.matmul %78, %80, %cst_60 {dimension_numbers = #tpu.dot_dimension_numbers<[1], [0], [0], [1], [0, 0, 1, 1], [], []>} : vector<128x4xbf16>, vector<4x4xbf16>, vector<128x4xf32> -> vector<128x4xf32>
    %82 = arith.addf %76, %81 : vector<128x4xf32>
    %83 = vector.extract_strided_slice %70 {offsets = [2, 0, 0], sizes = [8, 16, 4], strides = [1, 1, 1]} : vector<10x16x4xbf16> to vector<8x16x4xbf16>
    %84 = vector.shape_cast %83 : vector<8x16x4xbf16> to vector<128x4xbf16>
    %c2_61 = arith.constant 2 : index
    %c1_62 = arith.constant 1 : index
    %c0_63 = arith.constant 0 : index
    %c0_64 = arith.constant 0 : index
    %85 = vector.load %arg7[%c2_61, %c1_62, %c0_63, %c0_64] : memref<3x3x4x4xbf16, #tpu.memory_space<vmem>>, vector<1x1x4x4xbf16>
    %86 = vector.shape_cast %85 : vector<1x1x4x4xbf16> to vector<4x4xbf16>
    %cst_65 = arith.constant dense<0.000000e+00> : vector<128x4xf32>
    %87 = tpu.matmul %84, %86, %cst_65 {dimension_numbers = #tpu.dot_dimension_numbers<[1], [0], [0], [1], [0, 0, 1, 1], [], []>} : vector<128x4xbf16>, vector<4x4xbf16>, vector<128x4xf32> -> vector<128x4xf32>
    %88 = arith.addf %82, %87 : vector<128x4xf32>
    %c0_66 = arith.constant 0 : index
    %c17 = arith.constant 17 : index
    %c0_67 = arith.constant 0 : index
    %89 = vector.load %arg10[%c0_66, %c17, %c0_67] : memref<10x33x4xbf16, #tpu.memory_space<vmem>>, vector<10x16x4xbf16>
    %90 = vector.extract_strided_slice %89 {offsets = [0, 0, 0], sizes = [8, 16, 4], strides = [1, 1, 1]} : vector<10x16x4xbf16> to vector<8x16x4xbf16>
    %91 = vector.shape_cast %90 : vector<8x16x4xbf16> to vector<128x4xbf16>
    %c0_68 = arith.constant 0 : index
    %c2_69 = arith.constant 2 : index
    %c0_70 = arith.constant 0 : index
    %c0_71 = arith.constant 0 : index
    %92 = vector.load %arg7[%c0_68, %c2_69, %c0_70, %c0_71] : memref<3x3x4x4xbf16, #tpu.memory_space<vmem>>, vector<1x1x4x4xbf16>
    %93 = vector.shape_cast %92 : vector<1x1x4x4xbf16> to vector<4x4xbf16>
    %cst_72 = arith.constant dense<0.000000e+00> : vector<128x4xf32>
    %94 = tpu.matmul %91, %93, %cst_72 {dimension_numbers = #tpu.dot_dimension_numbers<[1], [0], [0], [1], [0, 0, 1, 1], [], []>} : vector<128x4xbf16>, vector<4x4xbf16>, vector<128x4xf32> -> vector<128x4xf32>
    %95 = arith.addf %88, %94 : vector<128x4xf32>
    %96 = vector.extract_strided_slice %89 {offsets = [1, 0, 0], sizes = [8, 16, 4], strides = [1, 1, 1]} : vector<10x16x4xbf16> to vector<8x16x4xbf16>
    %97 = vector.shape_cast %96 : vector<8x16x4xbf16> to vector<128x4xbf16>
    %c1_73 = arith.constant 1 : index
    %c2_74 = arith.constant 2 : index
    %c0_75 = arith.constant 0 : index
    %c0_76 = arith.constant 0 : index
    %98 = vector.load %arg7[%c1_73, %c2_74, %c0_75, %c0_76] : memref<3x3x4x4xbf16, #tpu.memory_space<vmem>>, vector<1x1x4x4xbf16>
    %99 = vector.shape_cast %98 : vector<1x1x4x4xbf16> to vector<4x4xbf16>
    %cst_77 = arith.constant dense<0.000000e+00> : vector<128x4xf32>
    %100 = tpu.matmul %97, %99, %cst_77 {dimension_numbers = #tpu.dot_dimension_numbers<[1], [0], [0], [1], [0, 0, 1, 1], [], []>} : vector<128x4xbf16>, vector<4x4xbf16>, vector<128x4xf32> -> vector<128x4xf32>
    %101 = arith.addf %95, %100 : vector<128x4xf32>
    %102 = vector.extract_strided_slice %89 {offsets = [2, 0, 0], sizes = [8, 16, 4], strides = [1, 1, 1]} : vector<10x16x4xbf16> to vector<8x16x4xbf16>
    %103 = vector.shape_cast %102 : vector<8x16x4xbf16> to vector<128x4xbf16>
    %c2_78 = arith.constant 2 : index
    %c2_79 = arith.constant 2 : index
    %c0_80 = arith.constant 0 : index
    %c0_81 = arith.constant 0 : index
    %104 = vector.load %arg7[%c2_78, %c2_79, %c0_80, %c0_81] : memref<3x3x4x4xbf16, #tpu.memory_space<vmem>>, vector<1x1x4x4xbf16>
    %105 = vector.shape_cast %104 : vector<1x1x4x4xbf16> to vector<4x4xbf16>
    %cst_82 = arith.constant dense<0.000000e+00> : vector<128x4xf32>
    %106 = tpu.matmul %103, %105, %cst_82 {dimension_numbers = #tpu.dot_dimension_numbers<[1], [0], [0], [1], [0, 0, 1, 1], [], []>} : vector<128x4xbf16>, vector<4x4xbf16>, vector<128x4xf32> -> vector<128x4xf32>
    %107 = arith.addf %101, %106 : vector<128x4xf32>
    %108 = vector.shape_cast %107 : vector<128x4xf32> to vector<1x8x16x4xf32>
    %109 = arith.truncf %108 : vector<1x8x16x4xf32> to vector<1x8x16x4xbf16>
    %c0_83 = arith.constant 0 : index
    %c0_84 = arith.constant 0 : index
    %c0_85 = arith.constant 0 : index
    %c0_86 = arith.constant 0 : index
    %110 = vector.load %arg8[%c0_83, %c0_84, %c0_85, %c0_86] : memref<1x8x16x4xbf16, #tpu.memory_space<vmem>>, vector<1x8x16x4xbf16>
    tpu.vector_store %arg8[%c0_83, %c0_84, %c0_85, %c0_86], %109 {strides = array<i32>} : memref<1x8x16x4xbf16, #tpu.memory_space<vmem>>, vector<1x8x16x4xbf16>,
    %cst_87 = arith.constant dense<0.000000e+00> : vector<4xf32>
    %111 = vector.multi_reduction <add>, %107, %cst_87 [0] : vector<128x4xf32> to vector<4xf32>
    %112 = vector.shape_cast %111 : vector<4xf32> to vector<1x4xf32>
    %113 = arith.mulf %107, %107 : vector<128x4xf32>
    %cst_88 = arith.constant dense<0.000000e+00> : vector<4xf32>
    %114 = vector.multi_reduction <add>, %113, %cst_88 [0] : vector<128x4xf32> to vector<4xf32>
    %115 = vector.shape_cast %114 : vector<4xf32> to vector<1x4xf32>
    %116 = tpu.iota {dimensions = array<i32: 0>} : vector<8x4xi32>
    %c0_i32_89 = arith.constant 0 : i32
    %117 = vector.broadcast %c0_i32_89 : i32 to vector<8x4xi32>
    %118 = arith.cmpi eq, %116, %117 : vector<8x4xi32>
    %119 = vector.shape_cast %112 : vector<1x4xf32> to vector<1x4xf32>
    %120 = vector.broadcast %119 : vector<1x4xf32> to vector<8x4xf32>
    %c1_i32_90 = arith.constant 1 : i32
    %121 = vector.broadcast %c1_i32_90 : i32 to vector<8x4xi32>
    %122 = arith.cmpi eq, %116, %121 : vector<8x4xi32>
    %123 = vector.shape_cast %115 : vector<1x4xf32> to vector<1x4xf32>
    %124 = vector.broadcast %123 : vector<1x4xf32> to vector<8x4xf32>
    %cst_91 = arith.constant 0.000000e+00 : f32
    %125 = vector.broadcast %cst_91 : f32 to vector<8x4xf32>
    %126 = arith.select %122, %124, %125 : vector<8x4xi1>, vector<8x4xf32>
    %127 = arith.select %118, %120, %126 : vector<8x4xi1>, vector<8x4xf32>
    %c0_92 = arith.constant 0 : index
    %c0_93 = arith.constant 0 : index
    %128 = vector.load %arg9[%c0_92, %c0_93] : memref<8x4xf32, #tpu.memory_space<vmem>>, vector<8x4xf32>
    tpu.vector_store %arg9[%c0_92, %c0_93], %127 {strides = array<i32>} : memref<8x4xf32, #tpu.memory_space<vmem>>, vector<8x4xf32>,
    return
  }
  func.func @transform_0(%arg0: i32, %arg1: i32) -> (i32, i32, i32, i32) {
    %c0_i32 = arith.constant 0 : i32
    %c0_i32_0 = arith.constant 0 : i32
    %c0_i32_1 = arith.constant 0 : i32
    return %arg0, %arg1, %c0_i32, %c0_i32_0 : i32, i32, i32, i32
  }
  func.func @transform_1(%arg0: i32, %arg1: i32) -> (i32, i32, i32, i32) {
    %c1_i32 = arith.constant 1 : i32
    %0 = arith.muli %arg1, %c1_i32 : i32
    %c1_i32_0 = arith.constant 1 : i32
    %1 = arith.subi %0, %c1_i32_0 : i32
    %c0_i32 = arith.constant 0 : i32
    %2 = arith.maxsi %1, %c0_i32 : i32
    %c0_i32_1 = arith.constant 0 : i32
    %c0_i32_2 = arith.constant 0 : i32
    %c0_i32_3 = arith.constant 0 : i32
    return %arg0, %2, %c0_i32_1, %c0_i32_2 : i32, i32, i32, i32
  }
  func.func @transform_2(%arg0: i32, %arg1: i32) -> (i32, i32, i32, i32) {
    %c1_i32 = arith.constant 1 : i32
    %0 = arith.muli %arg1, %c1_i32 : i32
    %c1_i32_0 = arith.constant 1 : i32
    %1 = arith.addi %0, %c1_i32_0 : i32
    %c1_i32_1 = arith.constant 1 : i32
    %2 = arith.minsi %1, %c1_i32_1 : i32
    %c0_i32 = arith.constant 0 : i32
    %c0_i32_2 = arith.constant 0 : i32
    %c0_i32_3 = arith.constant 0 : i32
    return %arg0, %2, %c0_i32, %c0_i32_2 : i32, i32, i32, i32
  }
  func.func @transform_3(%arg0: i32, %arg1: i32) -> (i32, i32) {
    %c0_i32 = arith.constant 0 : i32
    %c0_i32_0 = arith.constant 0 : i32
    %c0_i32_1 = arith.constant 0 : i32
    return %c0_i32, %c0_i32_0 : i32, i32
  }
  func.func @transform_4(%arg0: i32, %arg1: i32) -> (i32, i32) {
    %c0_i32 = arith.constant 0 : i32
    %c0_i32_0 = arith.constant 0 : i32
    %c0_i32_1 = arith.constant 0 : i32
    return %c0_i32, %c0_i32_0 : i32, i32
  }
  func.func @transform_5(%arg0: i32, %arg1: i32) -> (i32, i32, i32, i32) {
    %c0_i32 = arith.constant 0 : i32
    %c0_i32_0 = arith.constant 0 : i32
    %c0_i32_1 = arith.constant 0 : i32
    %c0_i32_2 = arith.constant 0 : i32
    %c0_i32_3 = arith.constant 0 : i32
    return %c0_i32, %c0_i32_0, %c0_i32_1, %c0_i32_2 : i32, i32, i32, i32
  }
  func.func @transform_6(%arg0: i32, %arg1: i32) -> (i32, i32, i32, i32) {
    %c0_i32 = arith.constant 0 : i32
    %c0_i32_0 = arith.constant 0 : i32
    %c0_i32_1 = arith.constant 0 : i32
    return %arg0, %arg1, %c0_i32, %c0_i32_0 : i32, i32, i32, i32
  }
  func.func @transform_7(%arg0: i32, %arg1: i32) -> (i32, i32) {
    %c2_i32 = arith.constant 2 : i32
    %0 = arith.muli %arg0, %c2_i32 : i32
    %1 = arith.addi %0, %arg1 : i32
    %c0_i32 = arith.constant 0 : i32
    %c0_i32_0 = arith.constant 0 : i32
    return %1, %c0_i32 : i32, i32
  }
}

module attributes {stable_mosaic.version = 11 : i64} {
  func.func @_bn_relu_conv1x1_stats_kernel(%arg0: i32, %arg1: memref<512x4xbf16, #tpu.memory_space<vmem>>, %arg2: memref<1x4xf32, #tpu.memory_space<vmem>>, %arg3: memref<1x4xf32, #tpu.memory_space<vmem>>, %arg4: memref<4x16xbf16, #tpu.memory_space<vmem>>, %arg5: memref<512x16xbf16, #tpu.memory_space<vmem>>, %arg6: memref<8x16xf32, #tpu.memory_space<vmem>>) attributes {dimension_semantics = [#tpu.dimension_semantics<parallel>], iteration_bounds = array<i64: 1>, scalar_prefetch = 0 : i64, scratch_operands = 0 : i64, tpu.core_type = #tpu.core_type<tc>, window_params = [{transform_indices = @transform_0, window_bounds = array<i64: 512, 4>}, {pipeline_mode = #tpu.pipeline_mode<synchronous>, transform_indices = @transform_1, window_bounds = array<i64: 1, 4>}, {pipeline_mode = #tpu.pipeline_mode<synchronous>, transform_indices = @transform_2, window_bounds = array<i64: 1, 4>}, {pipeline_mode = #tpu.pipeline_mode<synchronous>, transform_indices = @transform_3, window_bounds = array<i64: 4, 16>}, {transform_indices = @transform_4, window_bounds = array<i64: 512, 16>}, {transform_indices = @transform_5, window_bounds = array<i64: 8, 16>}]} {
    %c0 = arith.constant 0 : index
    %c0_0 = arith.constant 0 : index
    %0 = vector.load %arg1[%c0, %c0_0] : memref<512x4xbf16, #tpu.memory_space<vmem>>, vector<512x4xbf16>
    %1 = arith.extf %0 : vector<512x4xbf16> to vector<512x4xf32>
    %c0_1 = arith.constant 0 : index
    %c0_2 = arith.constant 0 : index
    %2 = vector.load %arg2[%c0_1, %c0_2] : memref<1x4xf32, #tpu.memory_space<vmem>>, vector<1x4xf32>
    %3 = vector.broadcast %2 : vector<1x4xf32> to vector<512x4xf32>
    %4 = arith.mulf %1, %3 : vector<512x4xf32>
    %c0_3 = arith.constant 0 : index
    %c0_4 = arith.constant 0 : index
    %5 = vector.load %arg3[%c0_3, %c0_4] : memref<1x4xf32, #tpu.memory_space<vmem>>, vector<1x4xf32>
    %6 = vector.broadcast %5 : vector<1x4xf32> to vector<512x4xf32>
    %7 = arith.addf %4, %6 : vector<512x4xf32>
    %cst = arith.constant 0.000000e+00 : f32
    %8 = vector.broadcast %cst : f32 to vector<512x4xf32>
    %9 = arith.maximumf %7, %8 : vector<512x4xf32>
    %10 = arith.truncf %9 : vector<512x4xf32> to vector<512x4xbf16>
    %c0_5 = arith.constant 0 : index
    %c0_6 = arith.constant 0 : index
    %11 = vector.load %arg4[%c0_5, %c0_6] : memref<4x16xbf16, #tpu.memory_space<vmem>>, vector<4x16xbf16>
    %cst_7 = arith.constant dense<0.000000e+00> : vector<512x16xf32>
    %12 = tpu.matmul %10, %11, %cst_7 {dimension_numbers = #tpu.dot_dimension_numbers<[1], [0], [0], [1], [0, 0, 1, 1], [], []>} : vector<512x4xbf16>, vector<4x16xbf16>, vector<512x16xf32> -> vector<512x16xf32>
    %13 = arith.truncf %12 : vector<512x16xf32> to vector<512x16xbf16>
    %c0_8 = arith.constant 0 : index
    %c0_9 = arith.constant 0 : index
    %14 = vector.load %arg5[%c0_8, %c0_9] : memref<512x16xbf16, #tpu.memory_space<vmem>>, vector<512x16xbf16>
    tpu.vector_store %arg5[%c0_8, %c0_9], %13 {strides = array<i32>} : memref<512x16xbf16, #tpu.memory_space<vmem>>, vector<512x16xbf16>,
    %cst_10 = arith.constant dense<0.000000e+00> : vector<16xf32>
    %15 = vector.multi_reduction <add>, %12, %cst_10 [0] : vector<512x16xf32> to vector<16xf32>
    %16 = vector.shape_cast %15 : vector<16xf32> to vector<1x16xf32>
    %17 = arith.mulf %12, %12 : vector<512x16xf32>
    %cst_11 = arith.constant dense<0.000000e+00> : vector<16xf32>
    %18 = vector.multi_reduction <add>, %17, %cst_11 [0] : vector<512x16xf32> to vector<16xf32>
    %19 = vector.shape_cast %18 : vector<16xf32> to vector<1x16xf32>
    %20 = tpu.iota {dimensions = array<i32: 0>} : vector<8x16xi32>
    %c0_i32 = arith.constant 0 : i32
    %21 = vector.broadcast %c0_i32 : i32 to vector<8x16xi32>
    %22 = arith.cmpi eq, %20, %21 : vector<8x16xi32>
    %23 = vector.shape_cast %16 : vector<1x16xf32> to vector<1x16xf32>
    %24 = vector.broadcast %23 : vector<1x16xf32> to vector<8x16xf32>
    %c1_i32 = arith.constant 1 : i32
    %25 = vector.broadcast %c1_i32 : i32 to vector<8x16xi32>
    %26 = arith.cmpi eq, %20, %25 : vector<8x16xi32>
    %27 = vector.shape_cast %19 : vector<1x16xf32> to vector<1x16xf32>
    %28 = vector.broadcast %27 : vector<1x16xf32> to vector<8x16xf32>
    %cst_12 = arith.constant 0.000000e+00 : f32
    %29 = vector.broadcast %cst_12 : f32 to vector<8x16xf32>
    %30 = arith.select %26, %28, %29 : vector<8x16xi1>, vector<8x16xf32>
    %31 = arith.select %22, %24, %30 : vector<8x16xi1>, vector<8x16xf32>
    %c0_13 = arith.constant 0 : index
    %c0_14 = arith.constant 0 : index
    %32 = vector.load %arg6[%c0_13, %c0_14] : memref<8x16xf32, #tpu.memory_space<vmem>>, vector<8x16xf32>
    tpu.vector_store %arg6[%c0_13, %c0_14], %31 {strides = array<i32>} : memref<8x16xf32, #tpu.memory_space<vmem>>, vector<8x16xf32>,
    return
  }
  func.func @transform_0(%arg0: i32) -> (i32, i32) {
    %c0_i32 = arith.constant 0 : i32
    %c0_i32_0 = arith.constant 0 : i32
    return %arg0, %c0_i32 : i32, i32
  }
  func.func @transform_1(%arg0: i32) -> (i32, i32) {
    %c0_i32 = arith.constant 0 : i32
    %c0_i32_0 = arith.constant 0 : i32
    %c0_i32_1 = arith.constant 0 : i32
    return %c0_i32, %c0_i32_0 : i32, i32
  }
  func.func @transform_2(%arg0: i32) -> (i32, i32) {
    %c0_i32 = arith.constant 0 : i32
    %c0_i32_0 = arith.constant 0 : i32
    %c0_i32_1 = arith.constant 0 : i32
    return %c0_i32, %c0_i32_0 : i32, i32
  }
  func.func @transform_3(%arg0: i32) -> (i32, i32) {
    %c0_i32 = arith.constant 0 : i32
    %c0_i32_0 = arith.constant 0 : i32
    %c0_i32_1 = arith.constant 0 : i32
    return %c0_i32, %c0_i32_0 : i32, i32
  }
  func.func @transform_4(%arg0: i32) -> (i32, i32) {
    %c0_i32 = arith.constant 0 : i32
    %c0_i32_0 = arith.constant 0 : i32
    return %arg0, %c0_i32 : i32, i32
  }
  func.func @transform_5(%arg0: i32) -> (i32, i32) {
    %c0_i32 = arith.constant 0 : i32
    %c0_i32_0 = arith.constant 0 : i32
    return %arg0, %c0_i32 : i32, i32
  }
}

module attributes {stable_mosaic.version = 11 : i64} {
  func.func @_bn_residual_relu_kernel(%arg0: i32, %arg1: memref<512x16xbf16, #tpu.memory_space<vmem>>, %arg2: memref<1x16xf32, #tpu.memory_space<vmem>>, %arg3: memref<1x16xf32, #tpu.memory_space<vmem>>, %arg4: memref<512x16xbf16, #tpu.memory_space<vmem>>, %arg5: memref<512x16xf32, #tpu.memory_space<vmem>>) attributes {dimension_semantics = [#tpu.dimension_semantics<parallel>], iteration_bounds = array<i64: 1>, scalar_prefetch = 0 : i64, scratch_operands = 0 : i64, tpu.core_type = #tpu.core_type<tc>, window_params = [{transform_indices = @transform_0, window_bounds = array<i64: 512, 16>}, {pipeline_mode = #tpu.pipeline_mode<synchronous>, transform_indices = @transform_1, window_bounds = array<i64: 1, 16>}, {pipeline_mode = #tpu.pipeline_mode<synchronous>, transform_indices = @transform_2, window_bounds = array<i64: 1, 16>}, {transform_indices = @transform_3, window_bounds = array<i64: 512, 16>}, {transform_indices = @transform_4, window_bounds = array<i64: 512, 16>}]} {
    %c0 = arith.constant 0 : index
    %c0_0 = arith.constant 0 : index
    %0 = vector.load %arg1[%c0, %c0_0] : memref<512x16xbf16, #tpu.memory_space<vmem>>, vector<512x16xbf16>
    %1 = arith.extf %0 : vector<512x16xbf16> to vector<512x16xf32>
    %c0_1 = arith.constant 0 : index
    %c0_2 = arith.constant 0 : index
    %2 = vector.load %arg2[%c0_1, %c0_2] : memref<1x16xf32, #tpu.memory_space<vmem>>, vector<1x16xf32>
    %3 = vector.broadcast %2 : vector<1x16xf32> to vector<512x16xf32>
    %4 = arith.mulf %1, %3 : vector<512x16xf32>
    %c0_3 = arith.constant 0 : index
    %c0_4 = arith.constant 0 : index
    %5 = vector.load %arg3[%c0_3, %c0_4] : memref<1x16xf32, #tpu.memory_space<vmem>>, vector<1x16xf32>
    %6 = vector.broadcast %5 : vector<1x16xf32> to vector<512x16xf32>
    %7 = arith.addf %4, %6 : vector<512x16xf32>
    %c0_5 = arith.constant 0 : index
    %c0_6 = arith.constant 0 : index
    %8 = vector.load %arg4[%c0_5, %c0_6] : memref<512x16xbf16, #tpu.memory_space<vmem>>, vector<512x16xbf16>
    %9 = arith.extf %8 : vector<512x16xbf16> to vector<512x16xf32>
    %10 = arith.addf %7, %9 : vector<512x16xf32>
    %cst = arith.constant 0.000000e+00 : f32
    %11 = vector.broadcast %cst : f32 to vector<512x16xf32>
    %12 = arith.maximumf %10, %11 : vector<512x16xf32>
    %c0_7 = arith.constant 0 : index
    %c0_8 = arith.constant 0 : index
    %13 = vector.load %arg5[%c0_7, %c0_8] : memref<512x16xf32, #tpu.memory_space<vmem>>, vector<512x16xf32>
    tpu.vector_store %arg5[%c0_7, %c0_8], %12 {strides = array<i32>} : memref<512x16xf32, #tpu.memory_space<vmem>>, vector<512x16xf32>,
    return
  }
  func.func @transform_0(%arg0: i32) -> (i32, i32) {
    %c0_i32 = arith.constant 0 : i32
    %c0_i32_0 = arith.constant 0 : i32
    return %arg0, %c0_i32 : i32, i32
  }
  func.func @transform_1(%arg0: i32) -> (i32, i32) {
    %c0_i32 = arith.constant 0 : i32
    %c0_i32_0 = arith.constant 0 : i32
    %c0_i32_1 = arith.constant 0 : i32
    return %c0_i32, %c0_i32_0 : i32, i32
  }
  func.func @transform_2(%arg0: i32) -> (i32, i32) {
    %c0_i32 = arith.constant 0 : i32
    %c0_i32_0 = arith.constant 0 : i32
    %c0_i32_1 = arith.constant 0 : i32
    return %c0_i32, %c0_i32_0 : i32, i32
  }
  func.func @transform_3(%arg0: i32) -> (i32, i32) {
    %c0_i32 = arith.constant 0 : i32
    %c0_i32_0 = arith.constant 0 : i32
    return %arg0, %c0_i32 : i32, i32
  }
  func.func @transform_4(%arg0: i32) -> (i32, i32) {
    %c0_i32 = arith.constant 0 : i32
    %c0_i32_0 = arith.constant 0 : i32
    return %arg0, %c0_i32 : i32, i32
  }
}

</mosaic_0001>

<bundles_post_ra>
// kernel: bottleneck_forward.4
= control target key start
LH: loop header
LB: loop body
LE: loop exit
PB: predicated region body
PF: predicated region fallthrough
CT: control target
= control target key end

     0   :  { %vm246_vm0 = vcmask 130048   ;;  %vm888_vm1 = vcmask 27648   ;;  %vm953_vm2 = vcmask 31744   ;;  %s2389_s1 = inlined_call_operand.vmem [shape: bf16[16,4], index: 1, kind: input, shape index: {}]   ;;  %s2390_s0 = inlined_call_operand.vmem [shape: bf16[512,16], index: 0, kind: input, shape index: {}]   ;;  %s2391_s2 = inlined_call_operand.vmem [shape: bf16[512,4], index: 2, kind: output, shape index: {0}]   ;;  %s2392_s3 = inlined_call_operand.vmem [shape: f32[8,4], index: 3, kind: output, shape index: {1}]  }
   0x1   :  { %v1593_v0 = vld [vmem:[%s2389_s1] sm:$0xff]   ;;  %v1595_v2 = vld [vmem:[%s2390_s0 + $0x8] sm:$0xff]   ;;  %v1596_v3 = vld [vmem:[%s2390_s0 + $0x10] sm:$0xff]  }
   0x2   :  { %v1594_v1 = vld [vmem:[%s2390_s0] sm:$0xff]   ;;  %1525 = vmatprep.subr.bf16.mxu0 %v1593_v0  ;;  %1591 = vmatprep.subr.bf16.mxu1 %v1593_v0  ;;  %v1597_v4 = vld [vmem:[%s2390_s0 + $0x18] sm:$0xff]   ;;  %v1599_v6 = vld [vmem:[%s2390_s0 + $0x28] sm:$0xff]  }
   0x3   :  { %1526 = vmatpush3.bf16.msra.mxu0 %v1593_v0  ;;  %1527 = vmatprep.mubr.msk.bf16.mxu0 %vm246_vm0, %v1594_v1  ;;  %v1598_v5 = vld [vmem:[%s2390_s0 + $0x20] sm:$0xff]   ;;  %v1600_v7 = vld [vmem:[%s2390_s0 + $0x30] sm:$0xff]   ;;  %v1611_v9 = vld [vmem:[%s2390_s0 + $0x88] sm:$0xff]  }
   0x4   :  { %1592 = vmatpush3.bf16.msra.mxu1 %v1593_v0  ;;  %v1610_v8 = vld [vmem:[%s2390_s0 + $0x80] sm:$0xff]   ;;  %v1612_v10 = vld [vmem:[%s2390_s0 + $0x90] sm:$0xff]   ;;  %v1613_v11 = vld [vmem:[%s2390_s0 + $0x98] sm:$0xff]  }
   0x5   :  { %1559 = vmatprep.mubr.msk.bf16.mxu1 %vm246_vm0, %v1610_v8  ;;  %v1614_v12 = vld [vmem:[%s2390_s0 + $0xa0] sm:$0xff]   ;;  %v1601_v13 = vld [vmem:[%s2390_s0 + $0x38] sm:$0xff]   ;;  %v1615_v15 = vld [vmem:[%s2390_s0 + $0xa8] sm:$0xff]  }
   0x6   :  { %1528 = vmatmul.mubr.msk.bf16.vlgmr.msra.gmra.mrb[0].mxu0 %vm246_vm0, %v1595_v2  ;;  %v1602_v14 = vld [vmem:[%s2390_s0 + $0x40] sm:$0xff]   ;;  %v1616_v16 = vld [vmem:[%s2390_s0 + $0xb0] sm:$0xff]   ;;  %v1603_v17 = vld [vmem:[%s2390_s0 + $0x48] sm:$0xff]  }
   0x7   :  { %1531 = vmatprep.mubr.msk.bf16.mxu0 %vm246_vm0, %v1596_v3  ;;  %1560 = vmatmul.mubr.msk.bf16.vlgmr.msra.gmra.mrb[0].mxu1 %vm246_vm0, %v1611_v9  ;;  %v1604_v18 = vld [vmem:[%s2390_s0 + $0x50] sm:$0xff]   ;;  %v1617_v19 = vld [vmem:[%s2390_s0 + $0xb8] sm:$0xff]   ;;  %v1618_v20 = vld [vmem:[%s2390_s0 + $0xc0] sm:$0xff]  }
   0x8   :  { %1563 = vmatprep.mubr.msk.bf16.mxu1 %vm246_vm0, %v1612_v10  ;;  %v1605_v21 = vld [vmem:[%s2390_s0 + $0x58] sm:$0xff]   ;;  %v1606_v22 = vld [vmem:[%s2390_s0 + $0x60] sm:$0xff]   ;;  %v1619_v23 = vld [vmem:[%s2390_s0 + $0xc8] sm:$0xff]  }
   0x9   :  { %v1620_v24 = vld [vmem:[%s2390_s0 + $0xd0] sm:$0xff]   ;;  %v1607_v25 = vld [vmem:[%s2390_s0 + $0x68] sm:$0xff]   ;;  %v1621_v27 = vld [vmem:[%s2390_s0 + $0xd8] sm:$0xff]  }
   0xa   :  { %v1608_v26 = vld [vmem:[%s2390_s0 + $0x70] sm:$0xff]   ;;  %v1622_v28 = vld [vmem:[%s2390_s0 + $0xe0] sm:$0xff]   ;;  %v1609_v29 = vld [vmem:[%s2390_s0 + $0x78] sm:$0xff]  }
   0xb   :  { %v1623_v30 = vld [vmem:[%s2390_s0 + $0xe8] sm:$0xff]   ;;  %v1624_v31 = vld [vmem:[%s2390_s0 + $0xf0] sm:$0xff]   ;;  %v1625_v32 = vld [vmem:[%s2390_s0 + $0xf8] sm:$0xff]  }
   0xe   :  { %1532 = vmatmul.mubr.msk.bf16.gmra.mrb[4].mxu0 %vm246_vm0, %v1597_v4 }
   0xf   :  { %1535 = vmatprep.mubr.msk.bf16.mxu0 %vm246_vm0, %v1598_v5  ;;  %1564 = vmatmul.mubr.msk.bf16.gmra.mrb[4].mxu1 %vm246_vm0, %v1613_v11 }
  0x10   :  { %1567 = vmatprep.mubr.msk.bf16.mxu1 %vm246_vm0, %v1614_v12 }
  0x16   :  { %1536 = vmatmul.mubr.msk.bf16.gmra.mrb[8].mxu0 %vm246_vm0, %v1599_v6 }
  0x17   :  { %1539 = vmatprep.mubr.msk.bf16.mxu0 %vm246_vm0, %v1600_v7  ;;  %1568 = vmatmul.mubr.msk.bf16.gmra.mrb[8].mxu1 %vm246_vm0, %v1615_v15 }
  0x18   :  { %1571 = vmatprep.mubr.msk.bf16.mxu1 %vm246_vm0, %v1616_v16 }
  0x1e   :  { %1540 = vmatmul.mubr.msk.bf16.gmra.mrb[12].mxu0 %vm246_vm0, %v1601_v13 }
  0x1f   :  { %1543 = vmatprep.mubr.msk.bf16.mxu0 %vm246_vm0, %v1602_v14  ;;  %1572 = vmatmul.mubr.msk.bf16.gmra.mrb[12].mxu1 %vm246_vm0, %v1617_v19 }
  0x20   :  { %1575 = vmatprep.mubr.msk.bf16.mxu1 %vm246_vm0, %v1618_v20 }
  0x26   :  { %1544 = vmatmul.mubr.msk.bf16.gmra.mrb[16].mxu0 %vm246_vm0, %v1603_v17 }
  0x27   :  { %1547 = vmatprep.mubr.msk.bf16.mxu0 %vm246_vm0, %v1604_v18  ;;  %1576 = vmatmul.mubr.msk.bf16.gmra.mrb[16].mxu1 %vm246_vm0, %v1619_v23 }
  0x28   :  { %1579 = vmatprep.mubr.msk.bf16.mxu1 %vm246_vm0, %v1620_v24 }
  0x2e   :  { %1548 = vmatmul.mubr.msk.bf16.gmra.mrb[20].mxu0 %vm246_vm0, %v1605_v21 }
  0x2f   :  { %1551 = vmatprep.mubr.msk.bf16.mxu0 %vm246_vm0, %v1606_v22  ;;  %1580 = vmatmul.mubr.msk.bf16.gmra.mrb[20].mxu1 %vm246_vm0, %v1621_v27 }
  0x30   :  { %1583 = vmatprep.mubr.msk.bf16.mxu1 %vm246_vm0, %v1622_v28 }
  0x36   :  { %1552 = vmatmul.mubr.msk.bf16.gmra.mrb[24].mxu0 %vm246_vm0, %v1607_v25 }
  0x37   :  { %1555 = vmatprep.mubr.msk.bf16.mxu0 %vm246_vm0, %v1608_v26  ;;  %1584 = vmatmul.mubr.msk.bf16.gmra.mrb[24].mxu1 %vm246_vm0, %v1623_v30 }
  0x38   :  { %1587 = vmatprep.mubr.msk.bf16.mxu1 %vm246_vm0, %v1624_v31 }
  0x3e   :  { %1556 = vmatmul.mubr.msk.bf16.gmra.mrb[28].mxu0 %vm246_vm0, %v1609_v29 }
  0x3f   :  { %1588 = vmatmul.mubr.msk.bf16.gmra.mrb[28].mxu1 %vm246_vm0, %v1625_v32 }
  0xd9   :  { %v1529_v33 = vpop.f32.mrb[0].mxu0 }
  0xda   :  { %v1430_v34 = vpack.c.bf16 %v1529_v33, %v1529_v33  ;;  %v377_v35 = vpop.f32.mrb[1].mxu0  ;;  %v1089_v39 = vmul.f32 %v1529_v33, %v1529_v33  ;;  %v957_v48 = vsel %vm953_vm2, %v1529_v33, 0.0  ;;  %v1820_v12 = vpop.f32.mrb[0].mxu1 }
  0xdb   :  { %v1428_v36 = vpack.c.bf16 %v377_v35, %v377_v35  ;;  %v1087_v37 = vmul.f32 %v377_v35, %v377_v35  ;;  %v1530_v38 = vpop.f32.mrb[2].mxu0  ;;  %v954_v42 = vsel %vm953_vm2, %v377_v35, 0.0  ;;  %v1462_v16 = vpack.c.bf16 %v1820_v12, %v1820_v12  ;;  %v1826_v17 = vpop.f32.mrb[1].mxu1 }
  0xdc   :  { %891 = vst.msk [vmem:[%s2391_s2 + $0x8] sm:$0xf] %vm888_vm1, %v1430_v34  ;;  %v1431_v40 = vpack.c.bf16 %v1530_v38, %v1530_v38  ;;  %v380_v41 = vpop.f32.mrb[3].mxu0  ;;  %v1090_v46 = vmul.f32 %v1530_v38, %v1530_v38  ;;  %v1154_v53 = vsel %vm953_vm2, %v1089_v39, 0.0  ;;  %v959_v55 = vsel %vm953_vm2, %v1530_v38, 0.0  ;;  %v1830_v22 = vpop.f32.mrb[2].mxu1 }
  0xdd   :  { %889 = vst.msk [vmem:[%s2391_s2] sm:$0xf] %vm888_vm1, %v1428_v36  ;;  %v1429_v43 = vpack.c.bf16 %v380_v41, %v380_v41  ;;  %v955_v44 = vsel %vm953_vm2, %v380_v41, 0.0  ;;  %v1088_v45 = vmul.f32 %v380_v41, %v380_v41  ;;  %v1151_v49 = vsel %vm953_vm2, %v1087_v37, 0.0  ;;  %923 = vst.msk [vmem:[%s2391_s2 + $0x88] sm:$0xf] %vm888_vm1, %v1462_v16 }
  0xde   :  { %892 = vst.msk [vmem:[%s2391_s2 + $0xc] sm:$0xf] %vm888_vm1, %v1431_v40  ;;  %v956_v47 = vadd.f32 %v955_v44, %v954_v42  ;;  %v1156_v56 = vsel %vm953_vm2, %v1090_v46, 0.0  ;;  %v1460_v21 = vpack.c.bf16 %v1826_v17, %v1826_v17  ;;  %v1838_v27 = vpop.f32.mrb[3].mxu1  ;;  %v1463_v46 = vpack.c.bf16 %v1830_v22, %v1830_v22 }
  0xdf   :  { %890 = vst.msk [vmem:[%s2391_s2 + $0x4] sm:$0xf] %vm888_vm1, %v1429_v43  ;;  %v1152_v50 = vsel %vm953_vm2, %v1088_v45, 0.0 }
  0xe0   :  { %v958_v51 = vadd.f32 %v957_v48, %v956_v47  ;;  %v1153_v52 = vadd.f32 %v1152_v50, %v1151_v49  ;;  %921 = vst.msk [vmem:[%s2391_s2 + $0x80] sm:$0xf] %vm888_vm1, %v1460_v21  ;;  %924 = vst.msk [vmem:[%s2391_s2 + $0x8c] sm:$0xf] %vm888_vm1, %v1463_v46 }
  0xe1   :  { %v1533_v54 = vpop.f32.mrb[4].mxu0 }
  0xe2   :  { %v1155_v57 = vadd.f32 %v1154_v53, %v1153_v52  ;;  %v1434_v58 = vpack.c.bf16 %v1533_v54, %v1533_v54  ;;  %v393_v59 = vpop.f32.mrb[5].mxu0  ;;  %v960_v61 = vadd.f32 %v959_v55, %v958_v51  ;;  %v1093_v7 = vmul.f32 %v1533_v54, %v1533_v54  ;;  %v1866_v47 = vpop.f32.mrb[4].mxu1 }
  0xe3   :  { %v1432_v60 = vpack.c.bf16 %v393_v59, %v393_v59  ;;  %v961_v62 = vsel %vm953_vm2, %v393_v59, 0.0  ;;  %v1091_v63 = vmul.f32 %v393_v59, %v393_v59  ;;  %v1534_v0 = vpop.f32.mrb[6].mxu0  ;;  %v965_v13 = vsel %vm953_vm2, %v1533_v54, 0.0  ;;  %v1870_v51 = vpop.f32.mrb[5].mxu1 }
  0xe4   :  { %895 = vst.msk [vmem:[%s2391_s2 + $0x18] sm:$0xf] %vm888_vm1, %v1434_v58  ;;  %v1157_v1 = vadd.f32 %v1156_v56, %v1155_v57  ;;  %v1435_v2 = vpack.c.bf16 %v1534_v0, %v1534_v0  ;;  %v396_v3 = vpop.f32.mrb[7].mxu0  ;;  %v962_v4 = vadd.f32 %v961_v62, %v960_v61  ;;  %v1094_v14 = vmul.f32 %v1534_v0, %v1534_v0  ;;  %v1878_v56 = vpop.f32.mrb[6].mxu1 }
  0xe5   :  { %893 = vst.msk [vmem:[%s2391_s2 + $0x10] sm:$0xf] %vm888_vm1, %v1432_v60  ;;  %v1158_v5 = vsel %vm953_vm2, %v1091_v63, 0.0  ;;  %v1433_v6 = vpack.c.bf16 %v396_v3, %v396_v3  ;;  %v963_v9 = vsel %vm953_vm2, %v396_v3, 0.0  ;;  %v1092_v10 = vmul.f32 %v396_v3, %v396_v3  ;;  %v1882_v61 = vpop.f32.mrb[7].mxu1 }
  0xe6   :  { %v1159_v8 = vadd.f32 %v1158_v5, %v1157_v1  ;;  %896 = vst.msk [vmem:[%s2391_s2 + $0x1c] sm:$0xf] %vm888_vm1, %v1435_v2  ;;  %v964_v11 = vadd.f32 %v963_v9, %v962_v4  ;;  %v1162_v23 = vsel %vm953_vm2, %v1093_v7, 0.0  ;;  %v967_v24 = vsel %vm953_vm2, %v1534_v0, 0.0 }
  0xe7   :  { %894 = vst.msk [vmem:[%s2391_s2 + $0x14] sm:$0xf] %vm888_vm1, %v1433_v6  ;;  %v1160_v15 = vsel %vm953_vm2, %v1092_v10, 0.0  ;;  %v1164_v33 = vsel %vm953_vm2, %v1094_v14, 0.0  ;;  %v1461_v55 = vpack.c.bf16 %v1838_v27, %v1838_v27 }
  0xe8   :  { %v966_v18 = vadd.f32 %v965_v13, %v964_v11  ;;  %v1161_v19 = vadd.f32 %v1160_v15, %v1159_v8 }
  0xe9   :  { %v1537_v20 = vpop.f32.mrb[8].mxu0  ;;  %922 = vst.msk [vmem:[%s2391_s2 + $0x84] sm:$0xf] %vm888_vm1, %v1461_v55 }
  0xea   :  { %v1438_v25 = vpack.c.bf16 %v1537_v20, %v1537_v20  ;;  %v409_v26 = vpop.f32.mrb[9].mxu0  ;;  %v1163_v28 = vadd.f32 %v1162_v23, %v1161_v19  ;;  %v968_v30 = vadd.f32 %v967_v24, %v966_v18  ;;  %v1097_v40 = vmul.f32 %v1537_v20, %v1537_v20  ;;  %v1910_v19 = vpop.f32.mrb[8].mxu1 }
  0xeb   :  { %v1436_v29 = vpack.c.bf16 %v409_v26, %v409_v26  ;;  %v969_v31 = vsel %vm953_vm2, %v409_v26, 0.0  ;;  %v1538_v32 = vpop.f32.mrb[10].mxu0  ;;  %v1095_v34 = vmul.f32 %v409_v26, %v409_v26  ;;  %v973_v48 = vsel %vm953_vm2, %v1537_v20, 0.0  ;;  %v1914_v24 = vpop.f32.mrb[9].mxu1 }
  0xec   :  { %899 = vst.msk [vmem:[%s2391_s2 + $0x28] sm:$0xf] %vm888_vm1, %v1438_v25  ;;  %v1439_v35 = vpack.c.bf16 %v1538_v32, %v1538_v32  ;;  %v412_v36 = vpop.f32.mrb[11].mxu0  ;;  %v970_v37 = vadd.f32 %v969_v31, %v968_v30  ;;  %v1165_v38 = vadd.f32 %v1164_v33, %v1163_v28  ;;  %v1098_v49 = vmul.f32 %v1538_v32, %v1538_v32  ;;  %v1922_v30 = vpop.f32.mrb[10].mxu1 }
  0xed   :  { %897 = vst.msk [vmem:[%s2391_s2 + $0x20] sm:$0xf] %vm888_vm1, %v1436_v29  ;;  %v1437_v39 = vpack.c.bf16 %v412_v36, %v412_v36  ;;  %v1166_v41 = vsel %vm953_vm2, %v1095_v34, 0.0  ;;  %v971_v42 = vsel %vm953_vm2, %v412_v36, 0.0  ;;  %v1096_v43 = vmul.f32 %v412_v36, %v412_v36 }
  0xee   :  { %900 = vst.msk [vmem:[%s2391_s2 + $0x2c] sm:$0xf] %vm888_vm1, %v1439_v35  ;;  %v1167_v44 = vadd.f32 %v1166_v41, %v1165_v38  ;;  %v972_v45 = vadd.f32 %v971_v42, %v970_v37  ;;  %v1170_v57 = vsel %vm953_vm2, %v1097_v40, 0.0  ;;  %v975_v58 = vsel %vm953_vm2, %v1538_v32, 0.0  ;;  %v1926_v35 = vpop.f32.mrb[11].mxu1 }
  0xef   :  { %898 = vst.msk [vmem:[%s2391_s2 + $0x24] sm:$0xf] %vm888_vm1, %v1437_v39  ;;  %v1168_v50 = vsel %vm953_vm2, %v1096_v43, 0.0  ;;  %v1172_v3 = vsel %vm953_vm2, %v1098_v49, 0.0  ;;  %v1466_v18 = vpack.c.bf16 %v1866_v47, %v1866_v47  ;;  %v1464_v29 = vpack.c.bf16 %v1870_v51, %v1870_v51 }
  0xf0   :  { %v974_v52 = vadd.f32 %v973_v48, %v972_v45  ;;  %v1169_v53 = vadd.f32 %v1168_v50, %v1167_v44 }
  0xf1   :  { %v1541_v54 = vpop.f32.mrb[12].mxu0  ;;  %927 = vst.msk [vmem:[%s2391_s2 + $0x98] sm:$0xf] %vm888_vm1, %v1466_v18  ;;  %925 = vst.msk [vmem:[%s2391_s2 + $0x90] sm:$0xf] %vm888_vm1, %v1464_v29 }
  0xf2   :  { %v1442_v59 = vpack.c.bf16 %v1541_v54, %v1541_v54  ;;  %v425_v60 = vpop.f32.mrb[13].mxu0  ;;  %v1171_v62 = vadd.f32 %v1170_v57, %v1169_v53  ;;  %v976_v0 = vadd.f32 %v975_v58, %v974_v52  ;;  %v1101_v10 = vmul.f32 %v1541_v54, %v1541_v54  ;;  %v1954_v58 = vpop.f32.mrb[12].mxu1 }
  0xf3   :  { %v1440_v63 = vpack.c.bf16 %v425_v60, %v425_v60  ;;  %v977_v1 = vsel %vm953_vm2, %v425_v60, 0.0  ;;  %v1542_v2 = vpop.f32.mrb[14].mxu0  ;;  %v1099_v4 = vmul.f32 %v425_v60, %v425_v60  ;;  %v981_v20 = vsel %vm953_vm2, %v1541_v54, 0.0 }
  0xf4   :  { %903 = vst.msk [vmem:[%s2391_s2 + $0x38] sm:$0xf] %vm888_vm1, %v1442_v59  ;;  %v1443_v5 = vpack.c.bf16 %v1542_v2, %v1542_v2  ;;  %v428_v6 = vpop.f32.mrb[15].mxu0  ;;  %v978_v7 = vadd.f32 %v977_v1, %v976_v0  ;;  %v1173_v8 = vadd.f32 %v1172_v3, %v1171_v62  ;;  %v1102_v21 = vmul.f32 %v1542_v2, %v1542_v2 }
  0xf5   :  { %901 = vst.msk [vmem:[%s2391_s2 + $0x30] sm:$0xf] %vm888_vm1, %v1440_v63  ;;  %v1441_v9 = vpack.c.bf16 %v428_v6, %v428_v6  ;;  %v1174_v11 = vsel %vm953_vm2, %v1099_v4, 0.0  ;;  %v979_v13 = vsel %vm953_vm2, %v428_v6, 0.0  ;;  %v1100_v14 = vmul.f32 %v428_v6, %v428_v6  ;;  %v1958_v63 = vpop.f32.mrb[13].mxu1 }
  0xf6   :  { %904 = vst.msk [vmem:[%s2391_s2 + $0x3c] sm:$0xf] %vm888_vm1, %v1443_v5  ;;  %v1175_v15 = vadd.f32 %v1174_v11, %v1173_v8  ;;  %v980_v16 = vadd.f32 %v979_v13, %v978_v7  ;;  %v1178_v31 = vsel %vm953_vm2, %v1101_v10, 0.0  ;;  %v983_v32 = vsel %vm953_vm2, %v1542_v2, 0.0  ;;  %v1966_v4 = vpop.f32.mrb[14].mxu1 }
  0xf7   :  { %902 = vst.msk [vmem:[%s2391_s2 + $0x34] sm:$0xf] %vm888_vm1, %v1441_v9  ;;  %v1176_v23 = vsel %vm953_vm2, %v1100_v14, 0.0  ;;  %v1180_v41 = vsel %vm953_vm2, %v1102_v21, 0.0  ;;  %v1467_v57 = vpack.c.bf16 %v1878_v56, %v1878_v56  ;;  %v1465_v3 = vpack.c.bf16 %v1882_v61, %v1882_v61  ;;  %v1970_v9 = vpop.f32.mrb[15].mxu1 }
  0xf8   :  { %v982_v25 = vadd.f32 %v981_v20, %v980_v16  ;;  %v1177_v26 = vadd.f32 %v1176_v23, %v1175_v15 }
  0xf9   :  { %v1545_v28 = vpop.f32.mrb[16].mxu0  ;;  %928 = vst.msk [vmem:[%s2391_s2 + $0x9c] sm:$0xf] %vm888_vm1, %v1467_v57  ;;  %926 = vst.msk [vmem:[%s2391_s2 + $0x94] sm:$0xf] %vm888_vm1, %v1465_v3 }
  0xfa   :  { %v1446_v33 = vpack.c.bf16 %v1545_v28, %v1545_v28  ;;  %v441_v34 = vpop.f32.mrb[17].mxu0  ;;  %v1179_v36 = vadd.f32 %v1178_v31, %v1177_v26  ;;  %v984_v38 = vadd.f32 %v983_v32, %v982_v25  ;;  %v1105_v49 = vmul.f32 %v1545_v28, %v1545_v28 }
  0xfb   :  { %v1444_v37 = vpack.c.bf16 %v441_v34, %v441_v34  ;;  %v985_v39 = vsel %vm953_vm2, %v441_v34, 0.0  ;;  %v1546_v40 = vpop.f32.mrb[18].mxu0  ;;  %v1103_v42 = vmul.f32 %v441_v34, %v441_v34  ;;  %v989_v59 = vsel %vm953_vm2, %v1545_v28, 0.0 }
  0xfc   :  { %907 = vst.msk [vmem:[%s2391_s2 + $0x48] sm:$0xf] %vm888_vm1, %v1446_v33  ;;  %v1447_v43 = vpack.c.bf16 %v1546_v40, %v1546_v40  ;;  %v444_v44 = vpop.f32.mrb[19].mxu0  ;;  %v986_v45 = vadd.f32 %v985_v39, %v984_v38  ;;  %v1181_v46 = vadd.f32 %v1180_v41, %v1179_v36  ;;  %v1106_v60 = vmul.f32 %v1546_v40, %v1546_v40 }
  0xfd   :  { %905 = vst.msk [vmem:[%s2391_s2 + $0x40] sm:$0xf] %vm888_vm1, %v1444_v37  ;;  %v1445_v48 = vpack.c.bf16 %v444_v44, %v444_v44  ;;  %v1182_v50 = vsel %vm953_vm2, %v1103_v42, 0.0  ;;  %v987_v52 = vsel %vm953_vm2, %v444_v44, 0.0  ;;  %v1104_v53 = vmul.f32 %v444_v44, %v444_v44  ;;  %v1998_v37 = vpop.f32.mrb[16].mxu1 }
  0xfe   :  { %908 = vst.msk [vmem:[%s2391_s2 + $0x4c] sm:$0xf] %vm888_vm1, %v1447_v43  ;;  %v1183_v54 = vadd.f32 %v1182_v50, %v1181_v46  ;;  %v988_v55 = vadd.f32 %v987_v52, %v986_v45  ;;  %v1186_v5 = vsel %vm953_vm2, %v1105_v49, 0.0  ;;  %v991_v6 = vsel %vm953_vm2, %v1546_v40, 0.0  ;;  %v2002_v41 = vpop.f32.mrb[17].mxu1 }
  0xff   :  { %906 = vst.msk [vmem:[%s2391_s2 + $0x44] sm:$0xf] %vm888_vm1, %v1445_v48  ;;  %v1184_v62 = vsel %vm953_vm2, %v1104_v53, 0.0  ;;  %v1188_v16 = vsel %vm953_vm2, %v1106_v60, 0.0  ;;  %v1470_v36 = vpack.c.bf16 %v1910_v19, %v1910_v19  ;;  %v1468_v45 = vpack.c.bf16 %v1914_v24, %v1914_v24  ;;  %v2010_v46 = vpop.f32.mrb[18].mxu1 }
 0x100   :  { %v990_v0 = vadd.f32 %v989_v59, %v988_v55  ;;  %v1185_v1 = vadd.f32 %v1184_v62, %v1183_v54  ;;  %v2014_v53 = vpop.f32.mrb[19].mxu1 }
 0x101   :  { %v1549_v2 = vpop.f32.mrb[20].mxu0  ;;  %931 = vst.msk [vmem:[%s2391_s2 + $0xa8] sm:$0xf] %vm888_vm1, %v1470_v36  ;;  %929 = vst.msk [vmem:[%s2391_s2 + $0xa0] sm:$0xf] %vm888_vm1, %v1468_v45 }
 0x102   :  { %v1450_v7 = vpack.c.bf16 %v1549_v2, %v1549_v2  ;;  %v457_v8 = vpop.f32.mrb[21].mxu0  ;;  %v1187_v10 = vadd.f32 %v1186_v5, %v1185_v1  ;;  %v992_v13 = vadd.f32 %v991_v6, %v990_v0  ;;  %v1109_v28 = vmul.f32 %v1549_v2, %v1549_v2 }
 0x103   :  { %v1448_v11 = vpack.c.bf16 %v457_v8, %v457_v8  ;;  %v993_v14 = vsel %vm953_vm2, %v457_v8, 0.0  ;;  %v1550_v15 = vpop.f32.mrb[22].mxu0  ;;  %v1107_v18 = vmul.f32 %v457_v8, %v457_v8  ;;  %v997_v38 = vsel %vm953_vm2, %v1549_v2, 0.0 }
 0x104   :  { %911 = vst.msk [vmem:[%s2391_s2 + $0x58] sm:$0xf] %vm888_vm1, %v1450_v7  ;;  %v1451_v20 = vpack.c.bf16 %v1550_v15, %v1550_v15  ;;  %v460_v21 = vpop.f32.mrb[23].mxu0  ;;  %v994_v23 = vadd.f32 %v993_v14, %v992_v13  ;;  %v1189_v25 = vadd.f32 %v1188_v16, %v1187_v10  ;;  %v1110_v39 = vmul.f32 %v1550_v15, %v1550_v15  ;;  %v2042_v16 = vpop.f32.mrb[20].mxu1 }
 0x105   :  { %909 = vst.msk [vmem:[%s2391_s2 + $0x50] sm:$0xf] %vm888_vm1, %v1448_v11  ;;  %v1449_v26 = vpack.c.bf16 %v460_v21, %v460_v21  ;;  %v1190_v29 = vsel %vm953_vm2, %v1107_v18, 0.0  ;;  %v995_v31 = vsel %vm953_vm2, %v460_v21, 0.0  ;;  %v1108_v32 = vmul.f32 %v460_v21, %v460_v21 }
 0x106   :  { %912 = vst.msk [vmem:[%s2391_s2 + $0x5c] sm:$0xf] %vm888_vm1, %v1451_v20  ;;  %v1191_v33 = vadd.f32 %v1190_v29, %v1189_v25  ;;  %v996_v34 = vadd.f32 %v995_v31, %v994_v23  ;;  %v1194_v48 = vsel %vm953_vm2, %v1109_v28, 0.0  ;;  %v999_v49 = vsel %vm953_vm2, %v1550_v15, 0.0  ;;  %v2046_v23 = vpop.f32.mrb[21].mxu1 }
 0x107   :  { %910 = vst.msk [vmem:[%s2391_s2 + $0x54] sm:$0xf] %vm888_vm1, %v1449_v26  ;;  %v1192_v40 = vsel %vm953_vm2, %v1108_v32, 0.0  ;;  %v1196_v62 = vsel %vm953_vm2, %v1110_v39, 0.0  ;;  %v1471_v15 = vpack.c.bf16 %v1922_v30, %v1922_v30  ;;  %v1469_v29 = vpack.c.bf16 %v1926_v35, %v1926_v35  ;;  %v2054_v31 = vpop.f32.mrb[22].mxu1 }
 0x108   :  { %v998_v42 = vadd.f32 %v997_v38, %v996_v34  ;;  %v1193_v43 = vadd.f32 %v1192_v40, %v1191_v33  ;;  %v2058_v38 = vpop.f32.mrb[23].mxu1 }
 0x109   :  { %v1553_v44 = vpop.f32.mrb[24].mxu0  ;;  %932 = vst.msk [vmem:[%s2391_s2 + $0xac] sm:$0xf] %vm888_vm1, %v1471_v15  ;;  %930 = vst.msk [vmem:[%s2391_s2 + $0xa4] sm:$0xf] %vm888_vm1, %v1469_v29 }
 0x10a   :  { %v1454_v50 = vpack.c.bf16 %v1553_v44, %v1553_v44  ;;  %v473_v52 = vpop.f32.mrb[25].mxu0  ;;  %v1195_v54 = vadd.f32 %v1194_v48, %v1193_v43  ;;  %v1000_v57 = vadd.f32 %v999_v49, %v998_v42  ;;  %v1113_v7 = vmul.f32 %v1553_v44, %v1553_v44 }
 0x10b   :  { %v1452_v55 = vpack.c.bf16 %v473_v52, %v473_v52  ;;  %v1001_v59 = vsel %vm953_vm2, %v473_v52, 0.0  ;;  %v1554_v60 = vpop.f32.mrb[26].mxu0  ;;  %v1111_v0 = vmul.f32 %v473_v52, %v473_v52  ;;  %v1005_v18 = vsel %vm953_vm2, %v1553_v44, 0.0 }
 0x10c   :  { %915 = vst.msk [vmem:[%s2391_s2 + $0x68] sm:$0xf] %vm888_vm1, %v1454_v50  ;;  %v1455_v1 = vpack.c.bf16 %v1554_v60, %v1554_v60  ;;  %v476_v2 = vpop.f32.mrb[27].mxu0  ;;  %v1002_v3 = vadd.f32 %v1001_v59, %v1000_v57  ;;  %v1197_v5 = vadd.f32 %v1196_v62, %v1195_v54  ;;  %v1114_v20 = vmul.f32 %v1554_v60, %v1554_v60 }
 0x10d   :  { %913 = vst.msk [vmem:[%s2391_s2 + $0x60] sm:$0xf] %vm888_vm1, %v1452_v55  ;;  %v1453_v6 = vpack.c.bf16 %v476_v2, %v476_v2  ;;  %v1198_v8 = vsel %vm953_vm2, %v1111_v0, 0.0  ;;  %v1003_v10 = vsel %vm953_vm2, %v476_v2, 0.0  ;;  %v1112_v11 = vmul.f32 %v476_v2, %v476_v2 }
 0x10e   :  { %916 = vst.msk [vmem:[%s2391_s2 + $0x6c] sm:$0xf] %vm888_vm1, %v1455_v1  ;;  %v1199_v13 = vadd.f32 %v1198_v8, %v1197_v5  ;;  %v1004_v14 = vadd.f32 %v1003_v10, %v1002_v3  ;;  %v1202_v32 = vsel %vm953_vm2, %v1113_v7, 0.0  ;;  %v1007_v33 = vsel %vm953_vm2, %v1554_v60, 0.0  ;;  %v2086_v3 = vpop.f32.mrb[24].mxu1 }
 0x10f   :  { %914 = vst.msk [vmem:[%s2391_s2 + $0x64] sm:$0xf] %vm888_vm1, %v1453_v6  ;;  %v1200_v21 = vsel %vm953_vm2, %v1112_v11, 0.0  ;;  %v1204_v45 = vsel %vm953_vm2, %v1114_v20, 0.0  ;;  %v1474_v2 = vpack.c.bf16 %v1954_v58, %v1954_v58  ;;  %v1119_v8 = vmul.f32 %v1826_v17, %v1826_v17  ;;  %v2092_v10 = vpop.f32.mrb[25].mxu1 }
 0x110   :  { %v1006_v25 = vadd.f32 %v1005_v18, %v1004_v14  ;;  %v1201_v26 = vadd.f32 %v1200_v21, %v1199_v13  ;;  %v1472_v14 = vpack.c.bf16 %v1958_v63, %v1958_v63  ;;  %v2100_v15 = vpop.f32.mrb[26].mxu1  ;;  %v1017_v21 = vsel %vm953_vm2, %v1826_v17, 0.0 }
 0x111   :  { %v1557_v28 = vpop.f32.mrb[28].mxu0  ;;  %935 = vst.msk [vmem:[%s2391_s2 + $0xb8] sm:$0xf] %vm888_vm1, %v1474_v2  ;;  %v1120_v17 = vmul.f32 %v1838_v27, %v1838_v27  ;;  %v1025_v2 = vsel %vm953_vm2, %v1870_v51, 0.0 }
 0x112   :  { %v1458_v34 = vpack.c.bf16 %v1557_v28, %v1557_v28  ;;  %v489_v36 = vpop.f32.mrb[29].mxu0  ;;  %v1203_v39 = vadd.f32 %v1202_v32, %v1201_v26  ;;  %v1008_v42 = vadd.f32 %v1007_v33, %v1006_v25  ;;  %v1117_v57 = vmul.f32 %v1557_v28, %v1557_v28  ;;  %v2108_v26 = vpop.f32.mrb[27].mxu1  ;;  %933 = vst.msk [vmem:[%s2391_s2 + $0xb0] sm:$0xf] %vm888_vm1, %v1472_v14 }
 0x113   :  { %v1456_v40 = vpack.c.bf16 %v489_v36, %v489_v36  ;;  %v1009_v43 = vsel %vm953_vm2, %v489_v36, 0.0  ;;  %v1558_v44 = vpop.f32.mrb[30].mxu0  ;;  %v1115_v48 = vmul.f32 %v489_v36, %v489_v36  ;;  %v1013_v5 = vsel %vm953_vm2, %v1557_v28, 0.0 }
 0x114   :  { %919 = vst.msk [vmem:[%s2391_s2 + $0x78] sm:$0xf] %vm888_vm1, %v1458_v34  ;;  %v1459_v49 = vpack.c.bf16 %v1558_v44, %v1558_v44  ;;  %v492_v50 = vpop.f32.mrb[31].mxu0  ;;  %v1010_v52 = vadd.f32 %v1009_v43, %v1008_v42  ;;  %v1205_v54 = vadd.f32 %v1204_v45, %v1203_v39  ;;  %v1118_v6 = vmul.f32 %v1558_v44, %v1558_v44 }
 0x115   :  { %917 = vst.msk [vmem:[%s2391_s2 + $0x70] sm:$0xf] %vm888_vm1, %v1456_v40  ;;  %v1457_v55 = vpack.c.bf16 %v492_v50, %v492_v50  ;;  %v1206_v59 = vsel %vm953_vm2, %v1115_v48, 0.0  ;;  %v1011_v60 = vsel %vm953_vm2, %v492_v50, 0.0  ;;  %v1116_v62 = vmul.f32 %v492_v50, %v492_v50 }
 0x116   :  { %920 = vst.msk [vmem:[%s2391_s2 + $0x7c] sm:$0xf] %vm888_vm1, %v1459_v49  ;;  %v1207_v0 = vadd.f32 %v1206_v59, %v1205_v54  ;;  %v1012_v1 = vadd.f32 %v1011_v60, %v1010_v52  ;;  %v1210_v18 = vsel %vm953_vm2, %v1117_v57, 0.0  ;;  %v1015_v20 = vsel %vm953_vm2, %v1558_v44, 0.0  ;;  %v2144_v52 = vpop.f32.mrb[28].mxu1 }
 0x117   :  { %918 = vst.msk [vmem:[%s2391_s2 + $0x74] sm:$0xf] %vm888_vm1, %v1457_v55  ;;  %v1208_v7 = vsel %vm953_vm2, %v1116_v62, 0.0  ;;  %v1475_v25 = vpack.c.bf16 %v1966_v4, %v1966_v4  ;;  %v1473_v32 = vpack.c.bf16 %v1970_v9, %v1970_v9  ;;  %v1212_v33 = vsel %vm953_vm2, %v1118_v6, 0.0  ;;  %v2157_v57 = vpop.f32.mrb[29].mxu1 }
 0x118   :  { %v1014_v11 = vadd.f32 %v1013_v5, %v1012_v1  ;;  %v1209_v13 = vadd.f32 %v1208_v7, %v1207_v0  ;;  %v1214_v34 = vsel %vm953_vm2, %v1119_v8, 0.0  ;;  %v1478_v36 = vpack.c.bf16 %v1998_v37, %v1998_v37  ;;  %v2163_v62 = vpop.f32.mrb[30].mxu1 }
 0x119   :  { %936 = vst.msk [vmem:[%s2391_s2 + $0xbc] sm:$0xf] %vm888_vm1, %v1475_v25  ;;  %934 = vst.msk [vmem:[%s2391_s2 + $0xb4] sm:$0xf] %vm888_vm1, %v1473_v32  ;;  %v1121_v42 = vmul.f32 %v1820_v12, %v1820_v12  ;;  %v1019_v43 = vsel %vm953_vm2, %v1838_v27, 0.0  ;;  %v1476_v44 = vpack.c.bf16 %v2002_v41, %v2002_v41  ;;  %v1021_v45 = vsel %vm953_vm2, %v1820_v12, 0.0 }
 0x11a   :  { %v1211_v28 = vadd.f32 %v1210_v18, %v1209_v13  ;;  %v1016_v29 = vadd.f32 %v1015_v20, %v1014_v11  ;;  %939 = vst.msk [vmem:[%s2391_s2 + $0xc8] sm:$0xf] %vm888_vm1, %v1478_v36  ;;  %v1479_v50 = vpack.c.bf16 %v2010_v46, %v2010_v46  ;;  %v1122_v27 = vmul.f32 %v1830_v22, %v1830_v22  ;;  %v2176_v6 = vpop.f32.mrb[31].mxu1 }
 0x11b   :  { %v1216_v54 = vsel %vm953_vm2, %v1120_v17, 0.0  ;;  %v1123_v55 = vmul.f32 %v1870_v51, %v1870_v51  ;;  %937 = vst.msk [vmem:[%s2391_s2 + $0xc0] sm:$0xf] %vm888_vm1, %v1476_v44  ;;  %v1477_v12 = vpack.c.bf16 %v2014_v53, %v2014_v53  ;;  %v1218_v0 = vsel %vm953_vm2, %v1121_v42, 0.0 }
 0x11c   :  { %v1018_v39 = vadd.f32 %v1017_v21, %v1016_v29  ;;  %v1213_v40 = vadd.f32 %v1212_v33, %v1211_v28  ;;  %940 = vst.msk [vmem:[%s2391_s2 + $0xcc] sm:$0xf] %vm888_vm1, %v1479_v50  ;;  %v1023_v1 = vsel %vm953_vm2, %v1830_v22, 0.0  ;;  %v1482_v5 = vpack.c.bf16 %v2042_v16, %v2042_v16 }
 0x11d   :  { %938 = vst.msk [vmem:[%s2391_s2 + $0xc4] sm:$0xf] %vm888_vm1, %v1477_v12  ;;  %v1480_v11 = vpack.c.bf16 %v2046_v23, %v2046_v23  ;;  %v1220_v22 = vsel %vm953_vm2, %v1122_v27, 0.0  ;;  %v1222_v13 = vsel %vm953_vm2, %v1123_v55, 0.0  ;;  %v1124_v51 = vmul.f32 %v1882_v61, %v1882_v61 }
 0x11e   :  { %v1215_v48 = vadd.f32 %v1214_v34, %v1213_v40  ;;  %v1020_v49 = vadd.f32 %v1019_v43, %v1018_v39  ;;  %943 = vst.msk [vmem:[%s2391_s2 + $0xd8] sm:$0xf] %vm888_vm1, %v1482_v5  ;;  %v1483_v14 = vpack.c.bf16 %v2054_v31, %v2054_v31  ;;  %v1125_v21 = vmul.f32 %v1866_v47, %v1866_v47 }
 0x11f   :  { %941 = vst.msk [vmem:[%s2391_s2 + $0xd0] sm:$0xf] %vm888_vm1, %v1480_v11  ;;  %v1027_v25 = vsel %vm953_vm2, %v1882_v61, 0.0  ;;  %v1481_v28 = vpack.c.bf16 %v2058_v38, %v2058_v38  ;;  %v1029_v29 = vsel %vm953_vm2, %v1866_v47, 0.0  ;;  %v1486_v34 = vpack.c.bf16 %v2086_v3, %v2086_v3 }
 0x120   :  { %v1022_v59 = vadd.f32 %v1021_v45, %v1020_v49  ;;  %v1217_v60 = vadd.f32 %v1216_v54, %v1215_v48  ;;  %944 = vst.msk [vmem:[%s2391_s2 + $0xdc] sm:$0xf] %vm888_vm1, %v1483_v14  ;;  %v1126_v17 = vmul.f32 %v1878_v56, %v1878_v56  ;;  %v1224_v61 = vsel %vm953_vm2, %v1124_v51, 0.0 }
 0x121   :  { %v1127_v36 = vmul.f32 %v1914_v24, %v1914_v24  ;;  %942 = vst.msk [vmem:[%s2391_s2 + $0xd4] sm:$0xf] %vm888_vm1, %v1481_v28  ;;  %v1484_v47 = vpack.c.bf16 %v2092_v10, %v2092_v10  ;;  %947 = vst.msk [vmem:[%s2391_s2 + $0xe8] sm:$0xf] %vm888_vm1, %v1486_v34  ;;  %v1226_v42 = vsel %vm953_vm2, %v1125_v21, 0.0  ;;  %v1031_v43 = vsel %vm953_vm2, %v1878_v56, 0.0 }
 0x122   :  { %v1219_v7 = vadd.f32 %v1218_v0, %v1217_v60  ;;  %v1024_v8 = vadd.f32 %v1023_v1, %v1022_v59  ;;  %v1033_v44 = vsel %vm953_vm2, %v1914_v24, 0.0  ;;  %v1487_v45 = vpack.c.bf16 %v2100_v15, %v2100_v15 }
 0x123   :  { %945 = vst.msk [vmem:[%s2391_s2 + $0xe0] sm:$0xf] %vm888_vm1, %v1484_v47  ;;  %v1485_v50 = vpack.c.bf16 %v2108_v26, %v2108_v26  ;;  %v1228_v27 = vsel %vm953_vm2, %v1126_v17, 0.0  ;;  %v1230_v56 = vsel %vm953_vm2, %v1127_v36, 0.0  ;;  %v1128_v24 = vmul.f32 %v1926_v35, %v1926_v35 }
 0x124   :  { %v1026_v18 = vadd.f32 %v1025_v2, %v1024_v8  ;;  %v1221_v20 = vadd.f32 %v1220_v22, %v1219_v7  ;;  %948 = vst.msk [vmem:[%s2391_s2 + $0xec] sm:$0xf] %vm888_vm1, %v1487_v45  ;;  %v1490_v54 = vpack.c.bf16 %v2144_v52, %v2144_v52  ;;  %v1129_v59 = vmul.f32 %v1910_v19, %v1910_v19 }
 0x125   :  { %946 = vst.msk [vmem:[%s2391_s2 + $0xe4] sm:$0xf] %vm888_vm1, %v1485_v50  ;;  %v1035_v60 = vsel %vm953_vm2, %v1926_v35, 0.0  ;;  %v1488_v0 = vpack.c.bf16 %v2157_v57, %v2157_v57  ;;  %v1037_v1 = vsel %vm953_vm2, %v1910_v19, 0.0  ;;  %v1491_v7 = vpack.c.bf16 %v2163_v62, %v2163_v62 }
 0x126   :  { %v1223_v32 = vadd.f32 %v1222_v13, %v1221_v20  ;;  %v1028_v33 = vadd.f32 %v1027_v25, %v1026_v18  ;;  %951 = vst.msk [vmem:[%s2391_s2 + $0xf8] sm:$0xf] %vm888_vm1, %v1490_v54  ;;  %v1130_v8 = vmul.f32 %v1922_v30, %v1922_v30  ;;  %v1232_v35 = vsel %vm953_vm2, %v1128_v24, 0.0 }
 0x127   :  { %v1131_v11 = vmul.f32 %v1958_v63, %v1958_v63  ;;  %949 = vst.msk [vmem:[%s2391_s2 + $0xf0] sm:$0xf] %vm888_vm1, %v1488_v0  ;;  %v1489_v19 = vpack.c.bf16 %v2176_v6, %v2176_v6  ;;  %952 = vst.msk [vmem:[%s2391_s2 + $0xfc] sm:$0xf] %vm888_vm1, %v1491_v7  ;;  %v1234_v51 = vsel %vm953_vm2, %v1129_v59, 0.0  ;;  %v1039_v14 = vsel %vm953_vm2, %v1922_v30, 0.0 }
 0x128   :  { %v1030_v39 = vadd.f32 %v1029_v29, %v1028_v33  ;;  %v1225_v40 = vadd.f32 %v1224_v61, %v1223_v32  ;;  %v1041_v18 = vsel %vm953_vm2, %v1958_v63, 0.0  ;;  %v1236_v25 = vsel %vm953_vm2, %v1130_v8, 0.0 }
 0x129   :  { %950 = vst.msk [vmem:[%s2391_s2 + $0xf4] sm:$0xf] %vm888_vm1, %v1489_v19  ;;  %v1238_v28 = vsel %vm953_vm2, %v1131_v11, 0.0  ;;  %v1132_v29 = vmul.f32 %v1970_v9, %v1970_v9  ;;  %v1133_v30 = vmul.f32 %v1954_v58, %v1954_v58  ;;  %v1043_v63 = vsel %vm953_vm2, %v1970_v9, 0.0 }
 0x12a   :  { %v1227_v48 = vadd.f32 %v1226_v42, %v1225_v40  ;;  %v1032_v49 = vadd.f32 %v1031_v43, %v1030_v39  ;;  %v1045_v61 = vsel %vm953_vm2, %v1954_v58, 0.0  ;;  %v1134_v36 = vmul.f32 %v1966_v4, %v1966_v4 }
 0x12b   :  { %v1240_v47 = vsel %vm953_vm2, %v1132_v29, 0.0  ;;  %v1135_v39 = vmul.f32 %v2002_v41, %v2002_v41  ;;  %v1242_v43 = vsel %vm953_vm2, %v1133_v30, 0.0  ;;  %v1047_v9 = vsel %vm953_vm2, %v1966_v4, 0.0 }
 0x12c   :  { %v1034_v55 = vadd.f32 %v1033_v44, %v1032_v49  ;;  %v1229_v12 = vadd.f32 %v1228_v27, %v1227_v48  ;;  %v1049_v44 = vsel %vm953_vm2, %v2002_v41, 0.0  ;;  %v1244_v48 = vsel %vm953_vm2, %v1134_v36, 0.0 }
 0x12d   :  { %v1246_v49 = vsel %vm953_vm2, %v1135_v39, 0.0  ;;  %v1136_v50 = vmul.f32 %v2014_v53, %v2014_v53  ;;  %v1137_v24 = vmul.f32 %v1998_v37, %v1998_v37  ;;  %v1051_v4 = vsel %vm953_vm2, %v2014_v53, 0.0 }
 0x12e   :  { %v1231_v2 = vadd.f32 %v1230_v56, %v1229_v12  ;;  %v1036_v5 = vadd.f32 %v1035_v60, %v1034_v55  ;;  %v1053_v41 = vsel %vm953_vm2, %v1998_v37, 0.0  ;;  %v1138_v12 = vmul.f32 %v2010_v46, %v2010_v46 }
 0x12f   :  { %v1248_v59 = vsel %vm953_vm2, %v1136_v50, 0.0  ;;  %v1139_v60 = vmul.f32 %v2046_v23, %v2046_v23  ;;  %v1055_v53 = vsel %vm953_vm2, %v2010_v46, 0.0  ;;  %v1140_v11 = vmul.f32 %v2058_v38, %v2058_v38 }
 0x130   :  { %v1038_v22 = vadd.f32 %v1037_v1, %v1036_v5  ;;  %v1233_v13 = vadd.f32 %v1232_v35, %v1231_v2  ;;  %v1250_v2 = vsel %vm953_vm2, %v1137_v24, 0.0  ;;  %v1057_v5 = vsel %vm953_vm2, %v2046_v23, 0.0 }
 0x131   :  { %v1252_v8 = vsel %vm953_vm2, %v1138_v12, 0.0  ;;  %v1254_v35 = vsel %vm953_vm2, %v1139_v60, 0.0  ;;  %v1059_v46 = vsel %vm953_vm2, %v2058_v38, 0.0  ;;  %v1061_v23 = vsel %vm953_vm2, %v2042_v16, 0.0 }
 0x132   :  { %v1235_v20 = vadd.f32 %v1234_v51, %v1233_v13  ;;  %v1040_v21 = vadd.f32 %v1039_v14, %v1038_v22  ;;  %v1141_v13 = vmul.f32 %v2042_v16, %v2042_v16  ;;  %v1063_v38 = vsel %vm953_vm2, %v2054_v31, 0.0 }
 0x133   :  { %v1145_v36 = vmul.f32 %v2086_v3, %v2086_v3 }
 0x134   :  { %v1042_v32 = vadd.f32 %v1041_v18, %v1040_v21  ;;  %v1237_v33 = vadd.f32 %v1236_v25, %v1235_v20  ;;  %v1142_v18 = vmul.f32 %v2054_v31, %v2054_v31  ;;  %v1256_v20 = vsel %vm953_vm2, %v1140_v11, 0.0 }
 0x135   :  { %v1143_v21 = vmul.f32 %v2092_v10, %v2092_v10  ;;  %v1258_v29 = vsel %vm953_vm2, %v1141_v13, 0.0  ;;  %v1067_v31 = vsel %vm953_vm2, %v2108_v26, 0.0 }
 0x136   :  { %v1239_v34 = vadd.f32 %v1238_v28, %v1237_v33  ;;  %v1044_v17 = vadd.f32 %v1043_v63, %v1042_v32  ;;  %v1065_v32 = vsel %vm953_vm2, %v2092_v10, 0.0  ;;  %v1260_v30 = vsel %vm953_vm2, %v1142_v18, 0.0 }
 0x137   :  { %v1262_v63 = vsel %vm953_vm2, %v1143_v21, 0.0  ;;  %v1069_v10 = vsel %vm953_vm2, %v2086_v3, 0.0 }
 0x138   :  { %v1046_v40 = vadd.f32 %v1045_v61, %v1044_v17  ;;  %v1241_v42 = vadd.f32 %v1240_v47, %v1239_v34  ;;  %v1144_v34 = vmul.f32 %v2108_v26, %v2108_v26  ;;  %v1071_v26 = vsel %vm953_vm2, %v2100_v15, 0.0 }
 0x13a   :  { %v1243_v45 = vadd.f32 %v1242_v43, %v1241_v42  ;;  %v1048_v58 = vadd.f32 %v1047_v9, %v1046_v40  ;;  %v1146_v40 = vmul.f32 %v2100_v15, %v2100_v15  ;;  %v1264_v42 = vsel %vm953_vm2, %v1144_v34, 0.0 }
 0x13b   :  { %v1147_v43 = vmul.f32 %v2157_v57, %v2157_v57  ;;  %v1075_v15 = vsel %vm953_vm2, %v2176_v6, 0.0 }
 0x13c   :  { %v1050_v27 = vadd.f32 %v1049_v44, %v1048_v58  ;;  %v1245_v56 = vadd.f32 %v1244_v48, %v1243_v45  ;;  %v1266_v45 = vsel %vm953_vm2, %v1145_v36, 0.0  ;;  %v1073_v58 = vsel %vm953_vm2, %v2157_v57, 0.0 }
 0x13d   :  { %v1270_v50 = vsel %vm953_vm2, %v1147_v43, 0.0  ;;  %v1077_v57 = vsel %vm953_vm2, %v2144_v52, 0.0 }
 0x13e   :  { %v1247_v54 = vadd.f32 %v1246_v49, %v1245_v56  ;;  %v1052_v55 = vadd.f32 %v1051_v4, %v1050_v27  ;;  %v1268_v49 = vsel %vm953_vm2, %v1146_v40, 0.0  ;;  %v1148_v27 = vmul.f32 %v2176_v6, %v2176_v6 }
 0x13f   :  { %v1149_v4 = vmul.f32 %v2144_v52, %v2144_v52 }
 0x140   :  { %v1054_v0 = vadd.f32 %v1053_v41, %v1052_v55  ;;  %v1249_v1 = vadd.f32 %v1248_v59, %v1247_v54  ;;  %v1150_v41 = vmul.f32 %v2163_v62, %v2163_v62  ;;  %v1272_v12 = vsel %vm953_vm2, %v1148_v27, 0.0 }
 0x142   :  { %v1251_v7 = vadd.f32 %v1250_v2, %v1249_v1  ;;  %v1056_v37 = vadd.f32 %v1055_v53, %v1054_v0  ;;  %v1274_v0 = vsel %vm953_vm2, %v1149_v4, 0.0  ;;  %v1079_v1 = vsel %vm953_vm2, %v2163_v62, 0.0 }
 0x143   :  { %v1276_v6 = vsel %vm953_vm2, %v1150_v41, 0.0 }
 0x144   :  { %v1058_v19 = vadd.f32 %v1057_v5, %v1056_v37  ;;  %v1253_v22 = vadd.f32 %v1252_v8, %v1251_v7  ;;  %v1284_v8 = vlaneseq }
 0x146   :  { %v1255_v51 = vadd.f32 %v1254_v35, %v1253_v22  ;;  %v1060_v14 = vadd.f32 %v1059_v46, %v1058_v19  ;;  %v1285_v13 = vshrl.u32 %v1284_v8, 7 }
 0x148   :  { %v1062_v25 = vadd.f32 %v1061_v23, %v1060_v14  ;;  %v1257_v28 = vadd.f32 %v1256_v20, %v1255_v51  ;;  %vm1287_vm3 = vcmp.eq.s32.totalorder %v1285_v13, 1  ;;  %vm1286_vm4 = vcmp.eq.s32.totalorder %v1285_v13, 0 }
 0x14a   :  { %v1259_v33 = vadd.f32 %v1258_v29, %v1257_v28  ;;  %v1064_v16 = vadd.f32 %v1063_v38, %v1062_v25 }
 0x14c   :  { %v1066_v17 = vadd.f32 %v1065_v32, %v1064_v16  ;;  %v1261_v61 = vadd.f32 %v1260_v30, %v1259_v33 }
 0x14e   :  { %v1263_v47 = vadd.f32 %v1262_v63, %v1261_v61  ;;  %v1068_v39 = vadd.f32 %v1067_v31, %v1066_v17 }
 0x150   :  { %v1070_v9 = vadd.f32 %v1069_v10, %v1068_v39  ;;  %v1265_v44 = vadd.f32 %v1264_v42, %v1263_v47 }
 0x152   :  { %v1267_v48 = vadd.f32 %v1266_v45, %v1265_v44  ;;  %v1072_v3 = vadd.f32 %v1071_v26, %v1070_v9 }
 0x154   :  { %v1074_v56 = vadd.f32 %v1073_v58, %v1072_v3  ;;  %v1269_v24 = vadd.f32 %v1268_v49, %v1267_v48 }
 0x156   :  { %v1271_v54 = vadd.f32 %v1270_v50, %v1269_v24  ;;  %v1076_v55 = vadd.f32 %v1075_v15, %v1074_v56 }
 0x158   :  { %v1078_v59 = vadd.f32 %v1077_v57, %v1076_v55  ;;  %v1273_v60 = vadd.f32 %v1272_v12, %v1271_v54 }
 0x15a   :  { %v1080_v2 = vadd.f32 %v1079_v1, %v1078_v59  ;;  %v1275_v53 = vadd.f32 %v1274_v0, %v1273_v60 }
 0x15c   :  { %v1081_v5 = vrot.slane %v1080_v2, 4  ;;  %v1277_v7 = vadd.f32 %v1276_v6, %v1275_v53 }
 0x15e   :  { %v1082_v37 = vadd.f32 %v1081_v5, %v1080_v2  ;;  %v1278_v52 = vrot.slane %v1277_v7, 4 }
 0x160   :  { %v1083_v35 = vrot.slane %v1082_v37, 2  ;;  %v1279_v11 = vadd.f32 %v1278_v52, %v1277_v7 }
 0x162   :  { %v1084_v19 = vadd.f32 %v1083_v35, %v1082_v37  ;;  %v1280_v22 = vrot.slane %v1279_v11, 2 }
 0x164   :  { %v1281_v46 = vadd.f32 %v1280_v22, %v1279_v11  ;;  %v1085_v51 = vrot.slane %v1084_v19, 1 }
 0x166   :  { %v1282_v14 = vrot.slane %v1281_v46, 1  ;;  %v1086_v62 = vadd.f32 %v1085_v51, %v1084_v19 }
 0x168   :  { %v1283_v23 = vadd.f32 %v1282_v14, %v1281_v46 }
 0x16a   :  { %v1288_v18 = vsel %vm1287_vm3, %v1283_v23, 0.0 }
 0x16b   :  { %v1289_v20 = vsel %vm1286_vm4, %v1086_v62, %v1288_v18 }
 0x16c   :  { %1290 = vst.msk [vmem:[%s2392_s3] sm:$0xff] %vm953_vm2, %v1289_v20 }

// kernel: bottleneck_forward.6
= control target key start
LH: loop header
LB: loop body
LE: loop exit
PB: predicated region body
PF: predicated region fallthrough
CT: control target
= control target key end

     0   :  { %vm484_vm0 = vcmask 1041408   ;;  %vm387_vm1 = vcmask 31744   ;;  %vm1033_vm2 = vcmask 125952   ;;  %vm1098_vm3 = vcmask 130048   ;;  %s2813_s3 = inlined_call_operand.vmem [shape: bf16[4,16], index: 3, kind: input, shape index: {}]   ;;  %s2814_s0 = inlined_call_operand.vmem [shape: bf16[512,4], index: 0, kind: input, shape index: {}]   ;;  %s2815_s1 = inlined_call_operand.vmem [shape: f32[1,4], index: 1, kind: input, shape index: {}]   ;;  %s2816_s2 = inlined_call_operand.vmem [shape: f32[1,4], index: 2, kind: input, shape index: {}]   ;;  %s2817_s4 = inlined_call_operand.vmem [shape: bf16[512,16], index: 4, kind: output, shape index: {0}]   ;;  %s2818_s5 = inlined_call_operand.vmem [shape: f32[8,16], index: 5, kind: output, shape index: {1}]  }
   0x1   :  { %v386_v0 = vld [vmem:[%s2813_s3] sm:$0x3]  ;;  %v1734_v6 = vld [vmem:[%s2814_s0 + $0x8] sm:$0xff]   ;;  %v1735_v7 = vld [vmem:[%s2814_s0 + $0x10] sm:$0xff]  }
   0x2   :  { %v1607_v1 = vld [vmem:[%s2814_s0] sm:$0xff]   ;;  %1866 = vmatprep.subr.msk.bf16.mxu0 %vm484_vm0, %v386_v0  ;;  %v486_v3 = vsel %vm484_vm0, %v386_v0, 0  ;;  %1867 = vmatprep.subr.msk.bf16.mxu1 %vm484_vm0, %v386_v0  ;;  %v1612_v9 = vunpack.c.l.bf16 %v1734_v6  ;;  %v1613_v10 = vunpack.c.h.bf16 %v1734_v6  ;;  %v1616_v11 = vunpack.c.l.bf16 %v1735_v7  ;;  %v1736_v13 = vld [vmem:[%s2814_s0 + $0x18] sm:$0xff]   ;;  %v1738_v35 = vld [vmem:[%s2814_s0 + $0x28] sm:$0xff]  }
   0x3   :  { %v1907_v2 = vld [vmem:[%s2815_s1] ss:$0 sm:$0xff]  ;;  %v1608_v4 = vunpack.c.l.bf16 %v1607_v1  ;;  %v1609_v5 = vunpack.c.h.bf16 %v1607_v1  ;;  %1799 = vmatpush3.bf16.msra.mxu0 %v486_v3  ;;  %v1617_v12 = vunpack.c.h.bf16 %v1735_v7  ;;  %1865 = vmatpush3.bf16.msra.mxu1 %v486_v3  ;;  %v1620_v16 = vunpack.c.l.bf16 %v1736_v13  ;;  %v1739_v40 = vld [vmem:[%s2814_s0 + $0x30] sm:$0xff]   ;;  %v1740_v51 = vld [vmem:[%s2814_s0 + $0x38] sm:$0xff]  }
   0x4   :  { %v1918_v8 = vld [vmem:[%s2816_s2] ss:$0 sm:$0xff]  ;;  %v1621_v17 = vunpack.c.h.bf16 %v1736_v13  ;;  %v157_v18 = vmul.f32 %v1612_v9, %v1907_v2  ;;  %v158_v19 = vmul.f32 %v1613_v10, %v1907_v2  ;;  %v159_v20 = vmul.f32 %v1616_v11, %v1907_v2  ;;  %v1742_v9 = vld [vmem:[%s2814_s0 + $0x48] sm:$0xff]   ;;  %v1743_v11 = vld [vmem:[%s2814_s0 + $0x50] sm:$0xff]  }
   0x5   :  { %v155_v14 = vmul.f32 %v1608_v4, %v1907_v2  ;;  %v156_v15 = vmul.f32 %v1609_v5, %v1907_v2  ;;  %v160_v21 = vmul.f32 %v1617_v12, %v1907_v2  ;;  %v161_v24 = vmul.f32 %v1620_v16, %v1907_v2  ;;  %v1737_v30 = vld [vmem:[%s2814_s0 + $0x20] sm:$0xff]  }
   0x6   :  { %v162_v25 = vmul.f32 %v1621_v17, %v1907_v2  ;;  %v228_v26 = vadd.f32 %v1918_v8, %v157_v18  ;;  %v229_v27 = vadd.f32 %v1918_v8, %v158_v19  ;;  %v230_v28 = vadd.f32 %v1918_v8, %v159_v20  ;;  %v1741_v63 = vld [vmem:[%s2814_s0 + $0x40] sm:$0xff]   ;;  %v1744_v20 = vld [vmem:[%s2814_s0 + $0x58] sm:$0xff]  }
   0x7   :  { %v226_v22 = vadd.f32 %v1918_v8, %v155_v14  ;;  %v227_v23 = vadd.f32 %v1918_v8, %v156_v15  ;;  %v231_v29 = vadd.f32 %v1918_v8, %v160_v21  ;;  %v232_v33 = vadd.f32 %v1918_v8, %v161_v24 }
   0x8   :  { %v233_v34 = vadd.f32 %v1918_v8, %v162_v25  ;;  %v292_v36 = vmax.f32 %v228_v26, 0.0  ;;  %v293_v37 = vmax.f32 %v229_v27, 0.0  ;;  %v294_v38 = vmax.f32 %v230_v28, 0.0 }
   0x9   :  { %v290_v31 = vmax.f32 %v226_v22, 0.0  ;;  %v291_v32 = vmax.f32 %v227_v23, 0.0  ;;  %v295_v39 = vmax.f32 %v231_v29, 0.0  ;;  %v1624_v42 = vunpack.c.l.bf16 %v1737_v30 }
   0xa   :  { %v355_v43 = vpack.c.bf16 %v293_v37, %v292_v36  ;;  %v1625_v45 = vunpack.c.h.bf16 %v1737_v30  ;;  %v1628_v46 = vunpack.c.l.bf16 %v1738_v35  ;;  %v296_v47 = vmax.f32 %v232_v33, 0.0 }
   0xb   :  { %v354_v41 = vpack.c.bf16 %v291_v32, %v290_v31  ;;  %v356_v44 = vpack.c.bf16 %v295_v39, %v294_v38  ;;  %v163_v48 = vmul.f32 %v1624_v42, %v1907_v2  ;;  %v1629_v49 = vunpack.c.h.bf16 %v1738_v35  ;;  %v1745_v31 = vld [vmem:[%s2814_s0 + $0x60] sm:$0xff]  }
   0xc   :  { %v1632_v50 = vunpack.c.l.bf16 %v1739_v40  ;;  %v297_v52 = vmax.f32 %v233_v34, 0.0  ;;  %v164_v53 = vmul.f32 %v1625_v45, %v1907_v2  ;;  %v165_v54 = vmul.f32 %v1628_v46, %v1907_v2 }
   0xd   :  { %1800 = vmatprep.mubr.msk.bf16.mxu0 %vm387_vm1, %v354_v41  ;;  %v1633_v55 = vunpack.c.h.bf16 %v1739_v40  ;;  %v234_v56 = vadd.f32 %v1918_v8, %v163_v48  ;;  %v166_v57 = vmul.f32 %v1629_v49, %v1907_v2  ;;  %v1636_v61 = vunpack.c.l.bf16 %v1740_v51 }
   0xe   :  { %1801 = vmatmul.mubr.msk.bf16.vlgmr.msra.gmra.mrb[0].mxu0 %vm387_vm1, %v355_v43  ;;  %v167_v58 = vmul.f32 %v1632_v50, %v1907_v2  ;;  %v235_v59 = vadd.f32 %v1918_v8, %v164_v53  ;;  %v1637_v62 = vunpack.c.h.bf16 %v1740_v51  ;;  %v236_v1 = vadd.f32 %v1918_v8, %v165_v54 }
   0xf   :  { %1804 = vmatprep.mubr.msk.bf16.mxu0 %vm387_vm1, %v356_v44  ;;  %v168_v60 = vmul.f32 %v1633_v55, %v1907_v2  ;;  %v298_v0 = vmax.f32 %v234_v56, 0.0  ;;  %v237_v3 = vadd.f32 %v1918_v8, %v166_v57  ;;  %v357_v5 = vpack.c.bf16 %v297_v52, %v296_v47  ;;  %v1746_v44 = vld [vmem:[%s2814_s0 + $0x68] sm:$0xff]   ;;  %v1747_v56 = vld [vmem:[%s2814_s0 + $0x70] sm:$0xff]  }
  0x10   :  { %v238_v4 = vadd.f32 %v1918_v8, %v167_v58  ;;  %v299_v6 = vmax.f32 %v235_v59, 0.0  ;;  %v1640_v10 = vunpack.c.l.bf16 %v1741_v63  ;;  %v169_v13 = vmul.f32 %v1636_v61, %v1907_v2 }
  0x11   :  { %v239_v7 = vadd.f32 %v1918_v8, %v168_v60  ;;  %v170_v14 = vmul.f32 %v1637_v62, %v1907_v2  ;;  %v1641_v15 = vunpack.c.h.bf16 %v1741_v63  ;;  %v300_v16 = vmax.f32 %v236_v1, 0.0  ;;  %v2017_v1 = vld [vmem:[%s2814_s0 + $0x78] sm:$0xff]  }
  0x12   :  { %v358_v12 = vpack.c.bf16 %v299_v6, %v298_v0  ;;  %v301_v17 = vmax.f32 %v237_v3, 0.0  ;;  %v302_v18 = vmax.f32 %v238_v4, 0.0  ;;  %v1644_v19 = vunpack.c.l.bf16 %v1742_v9  ;;  %v1749_v3 = vld [vmem:[%s2814_s0 + $0x80] sm:$0xff]  }
  0x13   :  { %v303_v21 = vmax.f32 %v239_v7, 0.0  ;;  %v171_v22 = vmul.f32 %v1640_v10, %v1907_v2  ;;  %v1645_v23 = vunpack.c.h.bf16 %v1742_v9  ;;  %v1648_v24 = vunpack.c.l.bf16 %v1743_v11 }
  0x14   :  { %v172_v25 = vmul.f32 %v1641_v15, %v1907_v2  ;;  %v173_v26 = vmul.f32 %v1644_v19, %v1907_v2  ;;  %v1649_v27 = vunpack.c.h.bf16 %v1743_v11  ;;  %v1652_v30 = vunpack.c.l.bf16 %v1744_v20  ;;  %v1750_v19 = vld [vmem:[%s2814_s0 + $0x88] sm:$0xff]  }
  0x15   :  { %v174_v28 = vmul.f32 %v1645_v23, %v1907_v2  ;;  %v175_v29 = vmul.f32 %v1648_v24, %v1907_v2  ;;  %v240_v32 = vadd.f32 %v1918_v8, %v169_v13  ;;  %v241_v33 = vadd.f32 %v1918_v8, %v170_v14  ;;  %v1751_v24 = vld [vmem:[%s2814_s0 + $0x90] sm:$0xff]  }
  0x16   :  { %1805 = vmatmul.mubr.msk.bf16.gmra.mrb[4].mxu0 %vm387_vm1, %v357_v5  ;;  %v176_v34 = vmul.f32 %v1649_v27, %v1907_v2  ;;  %v1653_v35 = vunpack.c.h.bf16 %v1744_v20  ;;  %v359_v36 = vpack.c.bf16 %v301_v17, %v300_v16  ;;  %v360_v37 = vpack.c.bf16 %v303_v21, %v302_v18 }
  0x17   :  { %1808 = vmatprep.mubr.msk.bf16.mxu0 %vm387_vm1, %v358_v12  ;;  %v242_v38 = vadd.f32 %v1918_v8, %v171_v22  ;;  %v177_v39 = vmul.f32 %v1652_v30, %v1907_v2  ;;  %v243_v40 = vadd.f32 %v1918_v8, %v172_v25  ;;  %v244_v41 = vadd.f32 %v1918_v8, %v173_v26 }
  0x18   :  { %v178_v42 = vmul.f32 %v1653_v35, %v1907_v2  ;;  %v1656_v43 = vunpack.c.l.bf16 %v1745_v31  ;;  %v245_v45 = vadd.f32 %v1918_v8, %v174_v28  ;;  %v246_v46 = vadd.f32 %v1918_v8, %v175_v29 }
  0x19   :  { %v247_v47 = vadd.f32 %v1918_v8, %v176_v34  ;;  %v248_v48 = vadd.f32 %v1918_v8, %v177_v39  ;;  %v1657_v50 = vunpack.c.h.bf16 %v1745_v31  ;;  %v304_v52 = vmax.f32 %v240_v32, 0.0 }
  0x1a   :  { %v249_v49 = vadd.f32 %v1918_v8, %v178_v42  ;;  %v179_v51 = vmul.f32 %v1656_v43, %v1907_v2  ;;  %v305_v53 = vmax.f32 %v241_v33, 0.0  ;;  %v1660_v54 = vunpack.c.l.bf16 %v1746_v44  ;;  %v1752_v33 = vld [vmem:[%s2814_s0 + $0x98] sm:$0xff]  }
  0x1b   :  { %v1661_v55 = vunpack.c.h.bf16 %v1746_v44  ;;  %v306_v57 = vmax.f32 %v242_v38, 0.0  ;;  %v307_v58 = vmax.f32 %v243_v40, 0.0  ;;  %v308_v59 = vmax.f32 %v244_v41, 0.0 }
  0x1c   :  { %v180_v60 = vmul.f32 %v1657_v50, %v1907_v2  ;;  %v309_v61 = vmax.f32 %v245_v45, 0.0  ;;  %v310_v62 = vmax.f32 %v246_v46, 0.0  ;;  %v311_v63 = vmax.f32 %v247_v47, 0.0  ;;  %v1753_v46 = vld [vmem:[%s2814_s0 + $0xa0] sm:$0xff]  }
  0x1d   :  { %v181_v0 = vmul.f32 %v1660_v54, %v1907_v2  ;;  %v312_v4 = vmax.f32 %v248_v48, 0.0  ;;  %v313_v5 = vmax.f32 %v249_v49, 0.0  ;;  %v2023_v6 = vadd.f32 %v1918_v8, %v179_v51 }
  0x1e   :  { %1809 = vmatmul.mubr.msk.bf16.gmra.mrb[8].mxu0 %vm387_vm1, %v359_v36  ;;  %v1664_v7 = vunpack.c.l.bf16 %v1747_v56  ;;  %v361_v9 = vpack.c.bf16 %v305_v53, %v304_v52  ;;  %v2026_v10 = vadd.f32 %v1918_v8, %v180_v60  ;;  %v182_v11 = vmul.f32 %v1661_v55, %v1907_v2  ;;  %v1754_v55 = vld [vmem:[%s2814_s0 + $0xa8] sm:$0xff]  }
  0x1f   :  { %1812 = vmatprep.mubr.msk.bf16.mxu0 %vm387_vm1, %v360_v37  ;;  %v1665_v12 = vunpack.c.h.bf16 %v1747_v56  ;;  %v362_v13 = vpack.c.bf16 %v307_v58, %v306_v57  ;;  %v1668_v14 = vunpack.c.l.bf16 %v2017_v1  ;;  %v1672_v15 = vunpack.c.l.bf16 %v1749_v3 }
  0x20   :  { %v363_v16 = vpack.c.bf16 %v309_v61, %v308_v59  ;;  %v364_v17 = vpack.c.bf16 %v311_v63, %v310_v62  ;;  %v2031_v18 = vadd.f32 %v1918_v8, %v181_v0  ;;  %v2036_v20 = vpack.c.bf16 %v313_v5, %v312_v4 }
  0x21   :  { %v314_v21 = vmax.f32 %v2023_v6, 0.0  ;;  %v183_v22 = vmul.f32 %v1664_v7, %v1907_v2  ;;  %v1673_v23 = vunpack.c.h.bf16 %v1749_v3  ;;  %v315_v25 = vmax.f32 %v2026_v10, 0.0  ;;  %v1755_v7 = vld [vmem:[%s2814_s0 + $0xb0] sm:$0xff]   ;;  %v1757_v6 = vld [vmem:[%s2814_s0 + $0xc0] sm:$0xff]  }
  0x22   :  { %v2046_v26 = vadd.f32 %v1918_v8, %v182_v11  ;;  %v184_v27 = vmul.f32 %v1665_v12, %v1907_v2  ;;  %v187_v28 = vmul.f32 %v1672_v15, %v1907_v2  ;;  %v1669_v29 = vunpack.c.h.bf16 %v2017_v1 }
  0x23   :  { %v2053_v30 = vmul.f32 %v1668_v14, %v1907_v2  ;;  %v188_v31 = vmul.f32 %v1673_v23, %v1907_v2  ;;  %v1676_v32 = vunpack.c.l.bf16 %v1750_v19  ;;  %v316_v34 = vmax.f32 %v2031_v18, 0.0  ;;  %v1759_v18 = vld [vmem:[%s2814_s0 + $0xd0] sm:$0xff]  }
  0x24   :  { %v258_v35 = vadd.f32 %v1918_v8, %v187_v28  ;;  %v1677_v36 = vunpack.c.h.bf16 %v1750_v19  ;;  %v1680_v37 = vunpack.c.l.bf16 %v1751_v24  ;;  %v2062_v38 = vadd.f32 %v1918_v8, %v183_v22 }
  0x25   :  { %v259_v39 = vadd.f32 %v1918_v8, %v188_v31  ;;  %v189_v40 = vmul.f32 %v1676_v32, %v1907_v2  ;;  %v1681_v41 = vunpack.c.h.bf16 %v1751_v24  ;;  %v1684_v45 = vunpack.c.l.bf16 %v1752_v33  ;;  %v1756_v24 = vld [vmem:[%s2814_s0 + $0xb8] sm:$0xff]  }
  0x26   :  { %1813 = vmatmul.mubr.msk.bf16.gmra.mrb[12].mxu0 %vm387_vm1, %v361_v9  ;;  %v322_v42 = vmax.f32 %v258_v35, 0.0  ;;  %v190_v43 = vmul.f32 %v1677_v36, %v1907_v2  ;;  %v191_v44 = vmul.f32 %v1680_v37, %v1907_v2  ;;  %v2072_v47 = vadd.f32 %v1918_v8, %v184_v27 }
  0x27   :  { %1816 = vmatprep.mubr.msk.bf16.mxu0 %vm387_vm1, %v362_v13  ;;  %v323_v48 = vmax.f32 %v259_v39, 0.0  ;;  %v260_v49 = vadd.f32 %v1918_v8, %v189_v40  ;;  %v192_v50 = vmul.f32 %v1681_v41, %v1907_v2  ;;  %v1685_v53 = vunpack.c.h.bf16 %v1752_v33 }
  0x28   :  { %v261_v51 = vadd.f32 %v1918_v8, %v190_v43  ;;  %v262_v52 = vadd.f32 %v1918_v8, %v191_v44  ;;  %v193_v54 = vmul.f32 %v1684_v45, %v1907_v2  ;;  %v1688_v59 = vunpack.c.l.bf16 %v1753_v46 }
  0x29   :  { %v370_v56 = vpack.c.bf16 %v323_v48, %v322_v42  ;;  %v324_v57 = vmax.f32 %v260_v49, 0.0  ;;  %v263_v58 = vadd.f32 %v1918_v8, %v192_v50  ;;  %v194_v62 = vmul.f32 %v1685_v53, %v1907_v2 }
  0x2a   :  { %v325_v60 = vmax.f32 %v261_v51, 0.0  ;;  %v326_v61 = vmax.f32 %v262_v52, 0.0  ;;  %v264_v63 = vadd.f32 %v1918_v8, %v193_v54  ;;  %v1689_v3 = vunpack.c.h.bf16 %v1753_v46  ;;  %v1758_v52 = vld [vmem:[%s2814_s0 + $0xc8] sm:$0xff]  }
  0x2b   :  { %1832 = vmatprep.mubr.msk.bf16.mxu1 %vm387_vm1, %v370_v56  ;;  %v327_v0 = vmax.f32 %v263_v58, 0.0  ;;  %v195_v4 = vmul.f32 %v1688_v59, %v1907_v2  ;;  %v1692_v5 = vunpack.c.l.bf16 %v1754_v55  ;;  %v265_v10 = vadd.f32 %v1918_v8, %v194_v62 }
  0x2c   :  { %v371_v9 = vpack.c.bf16 %v325_v60, %v324_v57  ;;  %v328_v11 = vmax.f32 %v264_v63, 0.0  ;;  %v1693_v12 = vunpack.c.h.bf16 %v1754_v55  ;;  %v196_v14 = vmul.f32 %v1689_v3, %v1907_v2 }
  0x2d   :  { %v372_v13 = vpack.c.bf16 %v327_v0, %v326_v61  ;;  %v266_v15 = vadd.f32 %v1918_v8, %v195_v4  ;;  %v1696_v22 = vunpack.c.l.bf16 %v1755_v7  ;;  %v1697_v23 = vunpack.c.h.bf16 %v1755_v7 }
  0x2e   :  { %1817 = vmatmul.mubr.msk.bf16.gmra.mrb[16].mxu0 %vm387_vm1, %v363_v16  ;;  %v197_v16 = vmul.f32 %v1692_v5, %v1907_v2  ;;  %1833 = vmatmul.mubr.msk.bf16.vlgmr.msra.gmra.mrb[0].mxu1 %vm387_vm1, %v371_v9  ;;  %v198_v19 = vmul.f32 %v1693_v12, %v1907_v2  ;;  %v366_v27 = vpack.c.bf16 %v315_v25, %v314_v21  ;;  %v317_v28 = vmax.f32 %v2046_v26, 0.0 }
  0x2f   :  { %1820 = vmatprep.mubr.msk.bf16.mxu0 %vm387_vm1, %v364_v17  ;;  %v329_v17 = vmax.f32 %v265_v10, 0.0  ;;  %1836 = vmatprep.mubr.msk.bf16.mxu1 %vm387_vm1, %v372_v13  ;;  %v267_v31 = vadd.f32 %v1918_v8, %v196_v14  ;;  %v330_v32 = vmax.f32 %v266_v15, 0.0  ;;  %v318_v33 = vmax.f32 %v2062_v38, 0.0  ;;  %v1760_v14 = vld [vmem:[%s2814_s0 + $0xd8] sm:$0xff]  }
  0x30   :  { %v186_v35 = vmul.f32 %v1669_v29, %v1907_v2  ;;  %v199_v36 = vmul.f32 %v1696_v22, %v1907_v2  ;;  %v200_v37 = vmul.f32 %v1697_v23, %v1907_v2  ;;  %v319_v21 = vmax.f32 %v2072_v47, 0.0 }
  0x31   :  { %v331_v25 = vmax.f32 %v267_v31, 0.0  ;;  %v1700_v26 = vunpack.c.l.bf16 %v1756_v24  ;;  %v1701_v39 = vunpack.c.h.bf16 %v1756_v24  ;;  %v373_v38 = vpack.c.bf16 %v329_v17, %v328_v11  ;;  %v1761_v17 = vld [vmem:[%s2814_s0 + $0xe0] sm:$0xff]  }
  0x32   :  { %v268_v1 = vadd.f32 %v1918_v8, %v197_v16  ;;  %v269_v29 = vadd.f32 %v1918_v8, %v198_v19  ;;  %v270_v40 = vadd.f32 %v1918_v8, %v199_v36  ;;  %v271_v42 = vadd.f32 %v1918_v8, %v200_v37 }
  0x33   :  { %v374_v41 = vpack.c.bf16 %v331_v25, %v330_v32  ;;  %v1704_v43 = vunpack.c.l.bf16 %v1757_v6  ;;  %v1705_v44 = vunpack.c.h.bf16 %v1757_v6  ;;  %v256_v45 = vadd.f32 %v1918_v8, %v2053_v30 }
  0x34   :  { %v257_v46 = vadd.f32 %v1918_v8, %v186_v35  ;;  %v202_v47 = vmul.f32 %v1701_v39, %v1907_v2  ;;  %v367_v48 = vpack.c.bf16 %v317_v28, %v316_v34  ;;  %v368_v49 = vpack.c.bf16 %v319_v21, %v318_v33  ;;  %v1762_v39 = vld [vmem:[%s2814_s0 + $0xe8] sm:$0xff]  }
  0x35   :  { %v332_v50 = vmax.f32 %v268_v1, 0.0  ;;  %v333_v51 = vmax.f32 %v269_v29, 0.0  ;;  %v334_v30 = vmax.f32 %v270_v40, 0.0  ;;  %v335_v53 = vmax.f32 %v271_v42, 0.0  ;;  %v1763_v29 = vld [vmem:[%s2814_s0 + $0xf0] sm:$0xff]  }
  0x36   :  { %1821 = vmatmul.mubr.msk.bf16.gmra.mrb[20].mxu0 %vm387_vm1, %v2036_v20  ;;  %v201_v20 = vmul.f32 %v1700_v26, %v1907_v2  ;;  %1837 = vmatmul.mubr.msk.bf16.gmra.mrb[4].mxu1 %vm387_vm1, %v373_v38  ;;  %v203_v54 = vmul.f32 %v1704_v43, %v1907_v2  ;;  %v204_v55 = vmul.f32 %v1705_v44, %v1907_v2  ;;  %v320_v34 = vmax.f32 %v256_v45, 0.0 }
  0x37   :  { %1824 = vmatprep.mubr.msk.bf16.mxu0 %vm387_vm1, %v366_v27  ;;  %1840 = vmatprep.mubr.msk.bf16.mxu1 %vm387_vm1, %v374_v41  ;;  %v321_v56 = vmax.f32 %v257_v46, 0.0  ;;  %v273_v58 = vadd.f32 %v1918_v8, %v202_v47  ;;  %v1708_v59 = vunpack.c.l.bf16 %v1758_v52  ;;  %v375_v60 = vpack.c.bf16 %v333_v51, %v332_v50 }
  0x38   :  { %v272_v57 = vadd.f32 %v1918_v8, %v201_v20  ;;  %v1709_v61 = vunpack.c.h.bf16 %v1758_v52  ;;  %v1712_v62 = vunpack.c.l.bf16 %v1759_v18  ;;  %v1713_v63 = vunpack.c.h.bf16 %v1759_v18  ;;  %v1764_v18 = vld [vmem:[%s2814_s0 + $0xf8] sm:$0xff]  }
  0x39   :  { %v376_v0 = vpack.c.bf16 %v335_v53, %v334_v30  ;;  %v274_v3 = vadd.f32 %v1918_v8, %v203_v54  ;;  %v275_v4 = vadd.f32 %v1918_v8, %v204_v55  ;;  %v337_v7 = vmax.f32 %v273_v58, 0.0 }
  0x3a   :  { %v336_v5 = vmax.f32 %v272_v57, 0.0  ;;  %v205_v9 = vmul.f32 %v1708_v59, %v1907_v2  ;;  %v369_v10 = vpack.c.bf16 %v321_v56, %v320_v34  ;;  %v206_v11 = vmul.f32 %v1709_v61, %v1907_v2 }
  0x3b   :  { %v207_v12 = vmul.f32 %v1712_v62, %v1907_v2  ;;  %v208_v13 = vmul.f32 %v1713_v63, %v1907_v2  ;;  %v338_v15 = vmax.f32 %v274_v3, 0.0  ;;  %v339_v16 = vmax.f32 %v275_v4, 0.0 }
  0x3c   :  { %v377_v19 = vpack.c.bf16 %v337_v7, %v336_v5  ;;  %v276_v22 = vadd.f32 %v1918_v8, %v205_v9  ;;  %v1716_v23 = vunpack.c.l.bf16 %v1760_v14  ;;  %v277_v24 = vadd.f32 %v1918_v8, %v206_v11 }
  0x3d   :  { %v278_v27 = vadd.f32 %v1918_v8, %v207_v12  ;;  %v279_v28 = vadd.f32 %v1918_v8, %v208_v13  ;;  %v1717_v31 = vunpack.c.h.bf16 %v1760_v14  ;;  %v378_v32 = vpack.c.bf16 %v339_v16, %v338_v15 }
  0x3e   :  { %1825 = vmatmul.mubr.msk.bf16.gmra.mrb[24].mxu0 %vm387_vm1, %v367_v48  ;;  %1841 = vmatmul.mubr.msk.bf16.gmra.mrb[8].mxu1 %vm387_vm1, %v375_v60  ;;  %v1720_v33 = vunpack.c.l.bf16 %v1761_v17  ;;  %v1721_v35 = vunpack.c.h.bf16 %v1761_v17  ;;  %v340_v36 = vmax.f32 %v276_v22, 0.0  ;;  %v209_v37 = vmul.f32 %v1716_v23, %v1907_v2 }
  0x3f   :  { %1828 = vmatprep.mubr.msk.bf16.mxu0 %vm387_vm1, %v368_v49  ;;  %1844 = vmatprep.mubr.msk.bf16.mxu1 %vm387_vm1, %v376_v0  ;;  %v341_v6 = vmax.f32 %v277_v24, 0.0  ;;  %v342_v21 = vmax.f32 %v278_v27, 0.0  ;;  %v343_v25 = vmax.f32 %v279_v28, 0.0  ;;  %v210_v26 = vmul.f32 %v1717_v31, %v1907_v2 }
  0x40   :  { %v211_v38 = vmul.f32 %v1720_v33, %v1907_v2  ;;  %v212_v1 = vmul.f32 %v1721_v35, %v1907_v2  ;;  %v280_v40 = vadd.f32 %v1918_v8, %v209_v37  ;;  %v1724_v41 = vunpack.c.l.bf16 %v1762_v39 }
  0x41   :  { %v379_v42 = vpack.c.bf16 %v341_v6, %v340_v36  ;;  %v380_v43 = vpack.c.bf16 %v343_v25, %v342_v21  ;;  %v281_v44 = vadd.f32 %v1918_v8, %v210_v26  ;;  %v1725_v45 = vunpack.c.h.bf16 %v1762_v39 }
  0x42   :  { %v282_v46 = vadd.f32 %v1918_v8, %v211_v38  ;;  %v283_v20 = vadd.f32 %v1918_v8, %v212_v1  ;;  %v1728_v47 = vunpack.c.l.bf16 %v1763_v29  ;;  %v1729_v48 = vunpack.c.h.bf16 %v1763_v29 }
  0x43   :  { %v213_v49 = vmul.f32 %v1724_v41, %v1907_v2  ;;  %v344_v50 = vmax.f32 %v280_v40, 0.0  ;;  %v345_v51 = vmax.f32 %v281_v44, 0.0  ;;  %v214_v52 = vmul.f32 %v1725_v45, %v1907_v2 }
  0x44   :  { %v346_v30 = vmax.f32 %v282_v46, 0.0  ;;  %v347_v53 = vmax.f32 %v283_v20, 0.0  ;;  %v215_v54 = vmul.f32 %v1728_v47, %v1907_v2  ;;  %v216_v55 = vmul.f32 %v1729_v48, %v1907_v2 }
  0x45   :  { %v284_v34 = vadd.f32 %v1918_v8, %v213_v49  ;;  %v381_v56 = vpack.c.bf16 %v345_v51, %v344_v50  ;;  %v285_v57 = vadd.f32 %v1918_v8, %v214_v52  ;;  %v1732_v58 = vunpack.c.l.bf16 %v1764_v18 }
  0x46   :  { %1829 = vmatmul.mubr.msk.bf16.gmra.mrb[28].mxu0 %vm387_vm1, %v369_v10  ;;  %1845 = vmatmul.mubr.msk.bf16.gmra.mrb[12].mxu1 %vm387_vm1, %v377_v19  ;;  %v1733_v59 = vunpack.c.h.bf16 %v1764_v18  ;;  %v382_v60 = vpack.c.bf16 %v347_v53, %v346_v30  ;;  %v286_v61 = vadd.f32 %v1918_v8, %v215_v54  ;;  %v287_v62 = vadd.f32 %v1918_v8, %v216_v55 }
  0x47   :  { %1848 = vmatprep.mubr.msk.bf16.mxu1 %vm387_vm1, %v378_v32  ;;  %v348_v63 = vmax.f32 %v284_v34, 0.0  ;;  %v349_v0 = vmax.f32 %v285_v57, 0.0  ;;  %v217_v3 = vmul.f32 %v1732_v58, %v1907_v2 }
  0x48   :  { %v218_v4 = vmul.f32 %v1733_v59, %v1907_v2  ;;  %v350_v5 = vmax.f32 %v286_v61, 0.0  ;;  %v351_v7 = vmax.f32 %v287_v62, 0.0 }
  0x49   :  { %v383_v9 = vpack.c.bf16 %v349_v0, %v348_v63  ;;  %v288_v10 = vadd.f32 %v1918_v8, %v217_v3 }
  0x4a   :  { %v289_v11 = vadd.f32 %v1918_v8, %v218_v4  ;;  %v384_v12 = vpack.c.bf16 %v351_v7, %v350_v5 }
  0x4b   :  { %v352_v13 = vmax.f32 %v288_v10, 0.0 }
  0x4c   :  { %v353_v14 = vmax.f32 %v289_v11, 0.0 }
  0x4e   :  { %1849 = vmatmul.mubr.msk.bf16.gmra.mrb[16].mxu1 %vm387_vm1, %v379_v42  ;;  %v385_v15 = vpack.c.bf16 %v353_v14, %v352_v13 }
  0x4f   :  { %1852 = vmatprep.mubr.msk.bf16.mxu1 %vm387_vm1, %v380_v43 }
  0x56   :  { %1853 = vmatmul.mubr.msk.bf16.gmra.mrb[20].mxu1 %vm387_vm1, %v381_v56 }
  0x57   :  { %1856 = vmatprep.mubr.msk.bf16.mxu1 %vm387_vm1, %v382_v60 }
  0x5e   :  { %1857 = vmatmul.mubr.msk.bf16.gmra.mrb[24].mxu1 %vm387_vm1, %v383_v9 }
  0x5f   :  { %1860 = vmatprep.mubr.msk.bf16.mxu1 %vm387_vm1, %v384_v12 }
  0x66   :  { %1861 = vmatmul.mubr.msk.bf16.gmra.mrb[28].mxu1 %vm387_vm1, %v385_v15 }
  0xe1   :  { %v1802_v2 = vpop.f32.mrb[0].mxu0 }
  0xe2   :  { %v1544_v16 = vpack.c.bf16 %v1802_v2, %v1802_v2  ;;  %v522_v17 = vpop.f32.mrb[1].mxu0  ;;  %v1234_v8 = vmul.f32 %v1802_v2, %v1802_v2  ;;  %v1102_v37 = vsel %vm1098_vm3, %v1802_v2, 0.0 }
  0xe3   :  { %v1542_v19 = vpack.c.bf16 %v522_v17, %v522_v17  ;;  %v1232_v22 = vmul.f32 %v522_v17, %v522_v17  ;;  %v1803_v23 = vpop.f32.mrb[2].mxu0  ;;  %v1099_v28 = vsel %vm1098_vm3, %v522_v17, 0.0 }
  0xe4   :  { %1036 = vst.msk [vmem:[%s2817_s4 + $0x8] sm:$0xf] %vm1033_vm2, %v1544_v16  ;;  %v1545_v24 = vpack.c.bf16 %v1803_v23, %v1803_v23  ;;  %v525_v27 = vpop.f32.mrb[3].mxu0  ;;  %v1235_v35 = vmul.f32 %v1803_v23, %v1803_v23  ;;  %v1299_v39 = vsel %vm1098_vm3, %v1234_v8, 0.0  ;;  %v1104_v1 = vsel %vm1098_vm3, %v1803_v23, 0.0 }
  0xe5   :  { %1034 = vst.msk [vmem:[%s2817_s4] sm:$0xf] %vm1033_vm2, %v1542_v19  ;;  %v1543_v31 = vpack.c.bf16 %v525_v27, %v525_v27  ;;  %v1100_v32 = vsel %vm1098_vm3, %v525_v27, 0.0  ;;  %v1233_v33 = vmul.f32 %v525_v27, %v525_v27  ;;  %v1296_v6 = vsel %vm1098_vm3, %v1232_v22, 0.0 }
  0xe6   :  { %1037 = vst.msk [vmem:[%s2817_s4 + $0xc] sm:$0xf] %vm1033_vm2, %v1545_v24  ;;  %v1101_v36 = vadd.f32 %v1100_v32, %v1099_v28  ;;  %v1301_v29 = vsel %vm1098_vm3, %v1235_v35, 0.0 }
  0xe7   :  { %1035 = vst.msk [vmem:[%s2817_s4 + $0x4] sm:$0xf] %vm1033_vm2, %v1543_v31  ;;  %v1297_v21 = vsel %vm1098_vm3, %v1233_v33, 0.0 }
  0xe8   :  { %v1103_v25 = vadd.f32 %v1102_v37, %v1101_v36  ;;  %v1298_v26 = vadd.f32 %v1297_v21, %v1296_v6 }
  0xe9   :  { %v1806_v38 = vpop.f32.mrb[4].mxu0 }
  0xea   :  { %v1300_v40 = vadd.f32 %v1299_v39, %v1298_v26  ;;  %v1548_v41 = vpack.c.bf16 %v1806_v38, %v1806_v38  ;;  %v538_v42 = vpop.f32.mrb[5].mxu0  ;;  %v1105_v44 = vadd.f32 %v1104_v1, %v1103_v25  ;;  %v1238_v30 = vmul.f32 %v1806_v38, %v1806_v38 }
  0xeb   :  { %v1546_v43 = vpack.c.bf16 %v538_v42, %v538_v42  ;;  %v1106_v45 = vsel %vm1098_vm3, %v538_v42, 0.0  ;;  %v1236_v46 = vmul.f32 %v538_v42, %v538_v42  ;;  %v1807_v20 = vpop.f32.mrb[6].mxu0  ;;  %v1110_v34 = vsel %vm1098_vm3, %v1806_v38, 0.0 }
  0xec   :  { %1040 = vst.msk [vmem:[%s2817_s4 + $0x18] sm:$0xf] %vm1033_vm2, %v1548_v41  ;;  %v1302_v47 = vadd.f32 %v1301_v29, %v1300_v40  ;;  %v1549_v48 = vpack.c.bf16 %v1807_v20, %v1807_v20  ;;  %v541_v49 = vpop.f32.mrb[7].mxu0  ;;  %v1107_v50 = vadd.f32 %v1106_v45, %v1105_v44  ;;  %v1239_v56 = vmul.f32 %v1807_v20, %v1807_v20 }
  0xed   :  { %1038 = vst.msk [vmem:[%s2817_s4 + $0x10] sm:$0xf] %vm1033_vm2, %v1546_v43  ;;  %v1303_v51 = vsel %vm1098_vm3, %v1236_v46, 0.0  ;;  %v1547_v52 = vpack.c.bf16 %v541_v49, %v541_v49  ;;  %v1108_v54 = vsel %vm1098_vm3, %v541_v49, 0.0  ;;  %v1237_v55 = vmul.f32 %v541_v49, %v541_v49 }
  0xee   :  { %v1304_v53 = vadd.f32 %v1303_v51, %v1302_v47  ;;  %1041 = vst.msk [vmem:[%s2817_s4 + $0x1c] sm:$0xf] %vm1033_vm2, %v1549_v48  ;;  %v1109_v18 = vadd.f32 %v1108_v54, %v1107_v50  ;;  %v1307_v61 = vsel %vm1098_vm3, %v1238_v30, 0.0  ;;  %v1112_v62 = vsel %vm1098_vm3, %v1807_v20, 0.0 }
  0xef   :  { %1039 = vst.msk [vmem:[%s2817_s4 + $0x14] sm:$0xf] %vm1033_vm2, %v1547_v52  ;;  %v1305_v57 = vsel %vm1098_vm3, %v1237_v55, 0.0  ;;  %v1309_v10 = vsel %vm1098_vm3, %v1239_v56, 0.0 }
  0xf0   :  { %v1111_v58 = vadd.f32 %v1110_v34, %v1109_v18  ;;  %v1306_v59 = vadd.f32 %v1305_v57, %v1304_v53 }
  0xf1   :  { %v1810_v60 = vpop.f32.mrb[8].mxu0 }
  0xf2   :  { %v1552_v63 = vpack.c.bf16 %v1810_v60, %v1810_v60  ;;  %v554_v0 = vpop.f32.mrb[9].mxu0  ;;  %v1308_v3 = vadd.f32 %v1307_v61, %v1306_v59  ;;  %v1113_v5 = vadd.f32 %v1112_v62, %v1111_v58  ;;  %v1242_v16 = vmul.f32 %v1810_v60, %v1810_v60 }
  0xf3   :  { %v1550_v4 = vpack.c.bf16 %v554_v0, %v554_v0  ;;  %v1114_v7 = vsel %vm1098_vm3, %v554_v0, 0.0  ;;  %v1811_v9 = vpop.f32.mrb[10].mxu0  ;;  %v1240_v11 = vmul.f32 %v554_v0, %v554_v0  ;;  %v1118_v24 = vsel %vm1098_vm3, %v1810_v60, 0.0 }
  0xf4   :  { %1044 = vst.msk [vmem:[%s2817_s4 + $0x28] sm:$0xf] %vm1033_vm2, %v1552_v63  ;;  %v1553_v12 = vpack.c.bf16 %v1811_v9, %v1811_v9  ;;  %v557_v13 = vpop.f32.mrb[11].mxu0  ;;  %v1115_v14 = vadd.f32 %v1114_v7, %v1113_v5  ;;  %v1310_v15 = vadd.f32 %v1309_v10, %v1308_v3  ;;  %v1243_v27 = vmul.f32 %v1811_v9, %v1811_v9 }
  0xf5   :  { %1042 = vst.msk [vmem:[%s2817_s4 + $0x20] sm:$0xf] %vm1033_vm2, %v1550_v4  ;;  %v1551_v2 = vpack.c.bf16 %v557_v13, %v557_v13  ;;  %v1311_v17 = vsel %vm1098_vm3, %v1240_v11, 0.0  ;;  %v1116_v19 = vsel %vm1098_vm3, %v557_v13, 0.0  ;;  %v1241_v22 = vmul.f32 %v557_v13, %v557_v13 }
  0xf6   :  { %1045 = vst.msk [vmem:[%s2817_s4 + $0x2c] sm:$0xf] %vm1033_vm2, %v1553_v12  ;;  %v1312_v23 = vadd.f32 %v1311_v17, %v1310_v15  ;;  %v1117_v8 = vadd.f32 %v1116_v19, %v1115_v14  ;;  %v1315_v35 = vsel %vm1098_vm3, %v1242_v16, 0.0  ;;  %v1120_v36 = vsel %vm1098_vm3, %v1811_v9, 0.0 }
  0xf7   :  { %1043 = vst.msk [vmem:[%s2817_s4 + $0x24] sm:$0xf] %vm1033_vm2, %v1551_v2  ;;  %v1313_v28 = vsel %vm1098_vm3, %v1241_v22, 0.0  ;;  %v1317_v1 = vsel %vm1098_vm3, %v1243_v27, 0.0 }
  0xf8   :  { %v1119_v31 = vadd.f32 %v1118_v24, %v1117_v8  ;;  %v1314_v32 = vadd.f32 %v1313_v28, %v1312_v23 }
  0xf9   :  { %v1814_v33 = vpop.f32.mrb[12].mxu0 }
  0xfa   :  { %v1556_v37 = vpack.c.bf16 %v1814_v33, %v1814_v33  ;;  %v570_v6 = vpop.f32.mrb[13].mxu0  ;;  %v1316_v21 = vadd.f32 %v1315_v35, %v1314_v32  ;;  %v1121_v26 = vadd.f32 %v1120_v36, %v1119_v31  ;;  %v1246_v45 = vmul.f32 %v1814_v33, %v1814_v33 }
  0xfb   :  { %v1554_v25 = vpack.c.bf16 %v570_v6, %v570_v6  ;;  %v1122_v39 = vsel %vm1098_vm3, %v570_v6, 0.0  ;;  %v1815_v38 = vpop.f32.mrb[14].mxu0  ;;  %v1244_v29 = vmul.f32 %v570_v6, %v570_v6  ;;  %v1126_v50 = vsel %vm1098_vm3, %v1814_v33, 0.0 }
  0xfc   :  { %1048 = vst.msk [vmem:[%s2817_s4 + $0x38] sm:$0xf] %vm1033_vm2, %v1556_v37  ;;  %v1557_v40 = vpack.c.bf16 %v1815_v38, %v1815_v38  ;;  %v573_v41 = vpop.f32.mrb[15].mxu0  ;;  %v1123_v42 = vadd.f32 %v1122_v39, %v1121_v26  ;;  %v1318_v43 = vadd.f32 %v1317_v1, %v1316_v21  ;;  %v1247_v51 = vmul.f32 %v1815_v38, %v1815_v38 }
  0xfd   :  { %1046 = vst.msk [vmem:[%s2817_s4 + $0x30] sm:$0xf] %vm1033_vm2, %v1554_v25  ;;  %v1555_v44 = vpack.c.bf16 %v573_v41, %v573_v41  ;;  %v1319_v46 = vsel %vm1098_vm3, %v1244_v29, 0.0  ;;  %v1124_v20 = vsel %vm1098_vm3, %v573_v41, 0.0  ;;  %v1245_v47 = vmul.f32 %v573_v41, %v573_v41 }
  0xfe   :  { %1049 = vst.msk [vmem:[%s2817_s4 + $0x3c] sm:$0xf] %vm1033_vm2, %v1557_v40  ;;  %v1320_v48 = vadd.f32 %v1319_v46, %v1318_v43  ;;  %v1125_v49 = vadd.f32 %v1124_v20, %v1123_v42  ;;  %v1323_v55 = vsel %vm1098_vm3, %v1246_v45, 0.0  ;;  %v1128_v18 = vsel %vm1098_vm3, %v1815_v38, 0.0 }
  0xff   :  { %1047 = vst.msk [vmem:[%s2817_s4 + $0x34] sm:$0xf] %vm1033_vm2, %v1555_v44  ;;  %v1321_v52 = vsel %vm1098_vm3, %v1245_v47, 0.0  ;;  %v1325_v62 = vsel %vm1098_vm3, %v1247_v51, 0.0 }
 0x100   :  { %v1127_v30 = vadd.f32 %v1126_v50, %v1125_v49  ;;  %v1322_v53 = vadd.f32 %v1321_v52, %v1320_v48 }
 0x101   :  { %v1818_v54 = vpop.f32.mrb[16].mxu0  ;;  %v2306_v10 = vpop.f32.mrb[0].mxu1 }
 0x102   :  { %v1560_v34 = vpack.c.bf16 %v1818_v54, %v1818_v54  ;;  %v586_v56 = vpop.f32.mrb[17].mxu0  ;;  %v1324_v57 = vadd.f32 %v1323_v55, %v1322_v53  ;;  %v1129_v59 = vadd.f32 %v1128_v18, %v1127_v30  ;;  %v1250_v4 = vmul.f32 %v1818_v54, %v1818_v54  ;;  %v2316_v15 = vpop.f32.mrb[1].mxu1 }
 0x103   :  { %v1558_v58 = vpack.c.bf16 %v586_v56, %v586_v56  ;;  %v1130_v60 = vsel %vm1098_vm3, %v586_v56, 0.0  ;;  %v1819_v61 = vpop.f32.mrb[18].mxu0  ;;  %v1248_v63 = vmul.f32 %v586_v56, %v586_v56  ;;  %v1576_v14 = vpack.c.bf16 %v2306_v10, %v2306_v10  ;;  %v2322_v17 = vpop.f32.mrb[2].mxu1 }
 0x104   :  { %1052 = vst.msk [vmem:[%s2817_s4 + $0x48] sm:$0xf] %vm1033_vm2, %v1560_v34  ;;  %v1561_v0 = vpack.c.bf16 %v1819_v61, %v1819_v61  ;;  %v589_v3 = vpop.f32.mrb[19].mxu0  ;;  %v1131_v5 = vadd.f32 %v1130_v60, %v1129_v59  ;;  %v1326_v7 = vadd.f32 %v1325_v62, %v1324_v57  ;;  %v1134_v19 = vsel %vm1098_vm3, %v1818_v54, 0.0  ;;  %v2332_v24 = vpop.f32.mrb[3].mxu1 }
 0x105   :  { %1050 = vst.msk [vmem:[%s2817_s4 + $0x40] sm:$0xf] %vm1033_vm2, %v1558_v58  ;;  %v1559_v9 = vpack.c.bf16 %v589_v3, %v589_v3  ;;  %v1327_v11 = vsel %vm1098_vm3, %v1248_v63, 0.0  ;;  %v1132_v12 = vsel %vm1098_vm3, %v589_v3, 0.0  ;;  %v1249_v13 = vmul.f32 %v589_v3, %v589_v3  ;;  %1068 = vst.msk [vmem:[%s2817_s4 + $0x88] sm:$0xf] %vm1033_vm2, %v1576_v14 }
 0x106   :  { %1053 = vst.msk [vmem:[%s2817_s4 + $0x4c] sm:$0xf] %vm1033_vm2, %v1561_v0  ;;  %v1328_v2 = vadd.f32 %v1327_v11, %v1326_v7  ;;  %v1133_v16 = vadd.f32 %v1132_v12, %v1131_v5  ;;  %v1251_v22 = vmul.f32 %v1819_v61, %v1819_v61  ;;  %v1574_v8 = vpack.c.bf16 %v2316_v15, %v2316_v15 }
 0x107   :  { %1051 = vst.msk [vmem:[%s2817_s4 + $0x44] sm:$0xf] %vm1033_vm2, %v1559_v9  ;;  %v1329_v23 = vsel %vm1098_vm3, %v1249_v13, 0.0  ;;  %v1577_v32 = vpack.c.bf16 %v2322_v17, %v2322_v17  ;;  %v1331_v33 = vsel %vm1098_vm3, %v1250_v4, 0.0  ;;  %v1136_v35 = vsel %vm1098_vm3, %v1819_v61, 0.0 }
 0x108   :  { %v1135_v27 = vadd.f32 %v1134_v19, %v1133_v16  ;;  %v1330_v28 = vadd.f32 %v1329_v23, %v1328_v2  ;;  %1066 = vst.msk [vmem:[%s2817_s4 + $0x80] sm:$0xf] %vm1033_vm2, %v1574_v8  ;;  %v1333_v38 = vsel %vm1098_vm3, %v1251_v22, 0.0  ;;  %v1575_v54 = vpack.c.bf16 %v2332_v24, %v2332_v24 }
 0x109   :  { %v1822_v31 = vpop.f32.mrb[20].mxu0  ;;  %1069 = vst.msk [vmem:[%s2817_s4 + $0x8c] sm:$0xf] %vm1033_vm2, %v1577_v32  ;;  %v2356_v44 = vpop.f32.mrb[4].mxu1 }
 0x10a   :  { %v1564_v36 = vpack.c.bf16 %v1822_v31, %v1822_v31  ;;  %v602_v37 = vpop.f32.mrb[21].mxu0  ;;  %v1332_v6 = vadd.f32 %v1331_v33, %v1330_v28  ;;  %v1137_v25 = vadd.f32 %v1136_v35, %v1135_v27  ;;  %v1254_v45 = vmul.f32 %v1822_v31, %v1822_v31  ;;  %v2364_v48 = vpop.f32.mrb[5].mxu1  ;;  %1067 = vst.msk [vmem:[%s2817_s4 + $0x84] sm:$0xf] %vm1033_vm2, %v1575_v54 }
 0x10b   :  { %v1562_v21 = vpack.c.bf16 %v602_v37, %v602_v37  ;;  %v1138_v26 = vsel %vm1098_vm3, %v602_v37, 0.0  ;;  %v1823_v39 = vpop.f32.mrb[22].mxu0  ;;  %v1252_v1 = vmul.f32 %v602_v37, %v602_v37  ;;  %v2370_v51 = vpop.f32.mrb[6].mxu1  ;;  %v1142_v52 = vsel %vm1098_vm3, %v1822_v31, 0.0 }
 0x10c   :  { %1056 = vst.msk [vmem:[%s2817_s4 + $0x58] sm:$0xf] %vm1033_vm2, %v1564_v36  ;;  %v1565_v29 = vpack.c.bf16 %v1823_v39, %v1823_v39  ;;  %v605_v40 = vpop.f32.mrb[23].mxu0  ;;  %v1139_v41 = vadd.f32 %v1138_v26, %v1137_v25  ;;  %v1334_v42 = vadd.f32 %v1333_v38, %v1332_v6  ;;  %v1255_v30 = vmul.f32 %v1823_v39, %v1823_v39  ;;  %v2376_v55 = vpop.f32.mrb[7].mxu1 }
 0x10d   :  { %1054 = vst.msk [vmem:[%s2817_s4 + $0x50] sm:$0xf] %vm1033_vm2, %v1562_v21  ;;  %v1563_v43 = vpack.c.bf16 %v605_v40, %v605_v40  ;;  %v1335_v46 = vsel %vm1098_vm3, %v1252_v1, 0.0  ;;  %v1140_v20 = vsel %vm1098_vm3, %v605_v40, 0.0  ;;  %v1253_v47 = vmul.f32 %v605_v40, %v605_v40 }
 0x10e   :  { %1057 = vst.msk [vmem:[%s2817_s4 + $0x5c] sm:$0xf] %vm1033_vm2, %v1565_v29  ;;  %v1336_v49 = vadd.f32 %v1335_v46, %v1334_v42  ;;  %v1141_v50 = vadd.f32 %v1140_v20, %v1139_v41  ;;  %v1580_v57 = vpack.c.bf16 %v2356_v44, %v2356_v44  ;;  %v1339_v58 = vsel %vm1098_vm3, %v1254_v45, 0.0 }
 0x10f   :  { %1055 = vst.msk [vmem:[%s2817_s4 + $0x54] sm:$0xf] %vm1033_vm2, %v1563_v43  ;;  %v1337_v53 = vsel %vm1098_vm3, %v1253_v47, 0.0  ;;  %v1144_v59 = vsel %vm1098_vm3, %v1823_v39, 0.0  ;;  %v1341_v5 = vsel %vm1098_vm3, %v1255_v30, 0.0  ;;  %v1578_v36 = vpack.c.bf16 %v2364_v48, %v2364_v48 }
 0x110   :  { %v1143_v18 = vadd.f32 %v1142_v52, %v1141_v50  ;;  %v1338_v34 = vadd.f32 %v1337_v53, %v1336_v49  ;;  %1072 = vst.msk [vmem:[%s2817_s4 + $0x98] sm:$0xf] %vm1033_vm2, %v1580_v57  ;;  %v1581_v26 = vpack.c.bf16 %v2370_v51, %v2370_v51 }
 0x111   :  { %v1826_v56 = vpop.f32.mrb[24].mxu0  ;;  %v2400_v2 = vpop.f32.mrb[8].mxu1  ;;  %1070 = vst.msk [vmem:[%s2817_s4 + $0x90] sm:$0xf] %vm1033_vm2, %v1578_v36  ;;  %v1266_v36 = vmul.f32 %v2306_v10, %v2306_v10 }
 0x112   :  { %v1568_v60 = vpack.c.bf16 %v1826_v56, %v1826_v56  ;;  %v618_v61 = vpop.f32.mrb[25].mxu0  ;;  %v1340_v62 = vadd.f32 %v1339_v58, %v1338_v34  ;;  %v1145_v0 = vadd.f32 %v1144_v59, %v1143_v18  ;;  %v1258_v16 = vmul.f32 %v1826_v56, %v1826_v56  ;;  %v2408_v8 = vpop.f32.mrb[9].mxu1  ;;  %1073 = vst.msk [vmem:[%s2817_s4 + $0x9c] sm:$0xf] %vm1033_vm2, %v1581_v26 }
 0x113   :  { %v1566_v63 = vpack.c.bf16 %v618_v61, %v618_v61  ;;  %v1146_v3 = vsel %vm1098_vm3, %v618_v61, 0.0  ;;  %v1827_v4 = vpop.f32.mrb[26].mxu0  ;;  %v1256_v7 = vmul.f32 %v618_v61, %v618_v61  ;;  %v2414_v31 = vpop.f32.mrb[10].mxu1  ;;  %v1150_v32 = vsel %vm1098_vm3, %v1826_v56, 0.0 }
 0x114   :  { %1060 = vst.msk [vmem:[%s2817_s4 + $0x68] sm:$0xf] %vm1033_vm2, %v1568_v60  ;;  %v1569_v9 = vpack.c.bf16 %v1827_v4, %v1827_v4  ;;  %v621_v11 = vpop.f32.mrb[27].mxu0  ;;  %v1147_v12 = vadd.f32 %v1146_v3, %v1145_v0  ;;  %v1342_v13 = vadd.f32 %v1341_v5, %v1340_v62  ;;  %v1259_v33 = vmul.f32 %v1827_v4, %v1827_v4  ;;  %v2420_v37 = vpop.f32.mrb[11].mxu1 }
 0x115   :  { %1058 = vst.msk [vmem:[%s2817_s4 + $0x60] sm:$0xf] %vm1033_vm2, %v1566_v63  ;;  %v1567_v14 = vpack.c.bf16 %v621_v11, %v621_v11  ;;  %v1343_v19 = vsel %vm1098_vm3, %v1256_v7, 0.0  ;;  %v1148_v22 = vsel %vm1098_vm3, %v621_v11, 0.0  ;;  %v1257_v23 = vmul.f32 %v621_v11, %v621_v11 }
 0x116   :  { %1061 = vst.msk [vmem:[%s2817_s4 + $0x6c] sm:$0xf] %vm1033_vm2, %v1569_v9  ;;  %v1344_v27 = vadd.f32 %v1343_v19, %v1342_v13  ;;  %v1149_v28 = vadd.f32 %v1148_v22, %v1147_v12  ;;  %v1347_v39 = vsel %vm1098_vm3, %v1258_v16, 0.0  ;;  %v1152_v38 = vsel %vm1098_vm3, %v1827_v4, 0.0 }
 0x117   :  { %1059 = vst.msk [vmem:[%s2817_s4 + $0x64] sm:$0xf] %vm1033_vm2, %v1567_v14  ;;  %v1345_v35 = vsel %vm1098_vm3, %v1257_v23, 0.0  ;;  %v1349_v46 = vsel %vm1098_vm3, %v1259_v33, 0.0  ;;  %v1264_v60 = vmul.f32 %v2316_v15, %v2316_v15  ;;  %v1579_v3 = vpack.c.bf16 %v2376_v55, %v2376_v55 }
 0x118   :  { %v1151_v6 = vadd.f32 %v1150_v32, %v1149_v28  ;;  %v1346_v21 = vadd.f32 %v1345_v35, %v1344_v27  ;;  %v1584_v9 = vpack.c.bf16 %v2400_v2, %v2400_v2  ;;  %v1162_v13 = vsel %vm1098_vm3, %v2316_v15, 0.0 }
 0x119   :  { %v1830_v25 = vpop.f32.mrb[28].mxu0  ;;  %v2444_v53 = vpop.f32.mrb[12].mxu1  ;;  %1071 = vst.msk [vmem:[%s2817_s4 + $0x94] sm:$0xf] %vm1033_vm2, %v1579_v3  ;;  %v1582_v14 = vpack.c.bf16 %v2408_v8, %v2408_v8  ;;  %v1359_v23 = vsel %vm1098_vm3, %v1264_v60, 0.0  ;;  %v1265_v15 = vmul.f32 %v2332_v24, %v2332_v24  ;;  %v1585_v27 = vpack.c.bf16 %v2414_v31, %v2414_v31 }
 0x11a   :  { %v1572_v1 = vpack.c.bf16 %v1830_v25, %v1830_v25  ;;  %v634_v29 = vpop.f32.mrb[29].mxu0  ;;  %v1348_v40 = vadd.f32 %v1347_v39, %v1346_v21  ;;  %v1153_v42 = vadd.f32 %v1152_v38, %v1151_v6  ;;  %v1262_v54 = vmul.f32 %v1830_v25, %v1830_v25  ;;  %v2452_v57 = vpop.f32.mrb[13].mxu1  ;;  %1076 = vst.msk [vmem:[%s2817_s4 + $0xa8] sm:$0xf] %vm1033_vm2, %v1584_v9 }
 0x11b   :  { %v1570_v41 = vpack.c.bf16 %v634_v29, %v634_v29  ;;  %v1154_v43 = vsel %vm1098_vm3, %v634_v29, 0.0  ;;  %v1831_v45 = vpop.f32.mrb[30].mxu0  ;;  %v1260_v20 = vmul.f32 %v634_v29, %v634_v29  ;;  %v2460_v61 = vpop.f32.mrb[14].mxu1  ;;  %v1158_v62 = vsel %vm1098_vm3, %v1830_v25, 0.0  ;;  %1074 = vst.msk [vmem:[%s2817_s4 + $0xa0] sm:$0xf] %vm1033_vm2, %v1582_v14 }
 0x11c   :  { %1064 = vst.msk [vmem:[%s2817_s4 + $0x78] sm:$0xf] %vm1033_vm2, %v1572_v1  ;;  %v1573_v47 = vpack.c.bf16 %v1831_v45, %v1831_v45  ;;  %v637_v49 = vpop.f32.mrb[31].mxu0  ;;  %v1155_v50 = vadd.f32 %v1154_v43, %v1153_v42  ;;  %v1350_v52 = vadd.f32 %v1349_v46, %v1348_v40  ;;  %v1263_v63 = vmul.f32 %v1831_v45, %v1831_v45  ;;  %v2466_v4 = vpop.f32.mrb[15].mxu1 }
 0x11d   :  { %1062 = vst.msk [vmem:[%s2817_s4 + $0x70] sm:$0xf] %vm1033_vm2, %v1570_v41  ;;  %v1571_v30 = vpack.c.bf16 %v637_v49, %v637_v49  ;;  %v1351_v18 = vsel %vm1098_vm3, %v1260_v20, 0.0  ;;  %v1156_v34 = vsel %vm1098_vm3, %v637_v49, 0.0  ;;  %v1261_v56 = vmul.f32 %v637_v49, %v637_v49  ;;  %1077 = vst.msk [vmem:[%s2817_s4 + $0xac] sm:$0xf] %vm1033_vm2, %v1585_v27 }
 0x11e   :  { %1065 = vst.msk [vmem:[%s2817_s4 + $0x7c] sm:$0xf] %vm1033_vm2, %v1573_v47  ;;  %v1352_v58 = vadd.f32 %v1351_v18, %v1350_v52  ;;  %v1157_v59 = vadd.f32 %v1156_v34, %v1155_v50  ;;  %v1355_v11 = vsel %vm1098_vm3, %v1262_v54, 0.0  ;;  %v1160_v12 = vsel %vm1098_vm3, %v1831_v45, 0.0 }
 0x11f   :  { %1063 = vst.msk [vmem:[%s2817_s4 + $0x74] sm:$0xf] %vm1033_vm2, %v1571_v30  ;;  %v1353_v0 = vsel %vm1098_vm3, %v1261_v56, 0.0  ;;  %v1357_v22 = vsel %vm1098_vm3, %v1263_v63, 0.0  ;;  %v1583_v33 = vpack.c.bf16 %v2420_v37, %v2420_v37  ;;  %v1164_v6 = vsel %vm1098_vm3, %v2332_v24, 0.0 }
 0x120   :  { %v1159_v5 = vadd.f32 %v1158_v62, %v1157_v59  ;;  %v1354_v7 = vadd.f32 %v1353_v0, %v1352_v58  ;;  %v1588_v21 = vpack.c.bf16 %v2444_v53, %v2444_v53  ;;  %v1166_v26 = vsel %vm1098_vm3, %v2306_v10, 0.0 }
 0x121   :  { %v2496_v35 = vpop.f32.mrb[16].mxu1  ;;  %1075 = vst.msk [vmem:[%s2817_s4 + $0xa4] sm:$0xf] %vm1033_vm2, %v1583_v33  ;;  %v1267_v1 = vmul.f32 %v2322_v17, %v2322_v17  ;;  %v1361_v29 = vsel %vm1098_vm3, %v1265_v15, 0.0  ;;  %v1268_v40 = vmul.f32 %v2364_v48, %v2364_v48  ;;  %v1586_v10 = vpack.c.bf16 %v2452_v57, %v2452_v57 }
 0x122   :  { %v1356_v16 = vadd.f32 %v1355_v11, %v1354_v7  ;;  %v1161_v19 = vadd.f32 %v1160_v12, %v1159_v5  ;;  %v2508_v25 = vpop.f32.mrb[17].mxu1  ;;  %1080 = vst.msk [vmem:[%s2817_s4 + $0xb8] sm:$0xf] %vm1033_vm2, %v1588_v21  ;;  %v1589_v45 = vpack.c.bf16 %v2460_v61, %v2460_v61  ;;  %v1363_v46 = vsel %vm1098_vm3, %v1266_v36, 0.0 }
 0x123   :  { %v2516_v24 = vpop.f32.mrb[18].mxu1  ;;  %v1168_v20 = vsel %vm1098_vm3, %v2322_v17, 0.0  ;;  %v1170_v47 = vsel %vm1098_vm3, %v2364_v48, 0.0  ;;  %1078 = vst.msk [vmem:[%s2817_s4 + $0xb0] sm:$0xf] %vm1033_vm2, %v1586_v10  ;;  %v1587_v49 = vpack.c.bf16 %v2466_v4, %v2466_v4  ;;  %v1365_v17 = vsel %vm1098_vm3, %v1267_v1, 0.0 }
 0x124   :  { %v1163_v28 = vadd.f32 %v1162_v13, %v1161_v19  ;;  %v1358_v32 = vadd.f32 %v1357_v22, %v1356_v16  ;;  %v2529_v41 = vpop.f32.mrb[19].mxu1  ;;  %1081 = vst.msk [vmem:[%s2817_s4 + $0xbc] sm:$0xf] %vm1033_vm2, %v1589_v45  ;;  %v1367_v30 = vsel %vm1098_vm3, %v1268_v40, 0.0  ;;  %v1269_v48 = vmul.f32 %v2376_v55, %v2376_v55 }
 0x125   :  { %1079 = vst.msk [vmem:[%s2817_s4 + $0xb4] sm:$0xf] %vm1033_vm2, %v1587_v49  ;;  %v1592_v54 = vpack.c.bf16 %v2496_v35, %v2496_v35  ;;  %v1590_v56 = vpack.c.bf16 %v2508_v25, %v2508_v25  ;;  %v1270_v59 = vmul.f32 %v2356_v44, %v2356_v44  ;;  %v1172_v60 = vsel %vm1098_vm3, %v2376_v55, 0.0 }
 0x126   :  { %v1360_v39 = vadd.f32 %v1359_v23, %v1358_v32  ;;  %v1165_v38 = vadd.f32 %v1164_v6, %v1163_v28  ;;  %v1593_v62 = vpack.c.bf16 %v2516_v24, %v2516_v24  ;;  %v1174_v0 = vsel %vm1098_vm3, %v2356_v44, 0.0 }
 0x127   :  { %1084 = vst.msk [vmem:[%s2817_s4 + $0xc8] sm:$0xf] %vm1033_vm2, %v1592_v54  ;;  %1082 = vst.msk [vmem:[%s2817_s4 + $0xc0] sm:$0xf] %vm1033_vm2, %v1590_v56  ;;  %v1271_v7 = vmul.f32 %v2370_v51, %v2370_v51  ;;  %v1369_v9 = vsel %vm1098_vm3, %v1269_v48, 0.0  ;;  %v1272_v11 = vmul.f32 %v2408_v8, %v2408_v8  ;;  %v1591_v44 = vpack.c.bf16 %v2529_v41, %v2529_v41 }
 0x128   :  { %v1167_v42 = vadd.f32 %v1166_v26, %v1165_v38  ;;  %v1362_v43 = vadd.f32 %v1361_v29, %v1360_v39  ;;  %1085 = vst.msk [vmem:[%s2817_s4 + $0xcc] sm:$0xf] %vm1033_vm2, %v1593_v62  ;;  %v1371_v19 = vsel %vm1098_vm3, %v1270_v59, 0.0  ;;  %v1176_v22 = vsel %vm1098_vm3, %v2370_v51, 0.0 }
 0x129   :  { %v2560_v58 = vpop.f32.mrb[20].mxu1  ;;  %v1178_v23 = vsel %vm1098_vm3, %v2408_v8, 0.0  ;;  %1083 = vst.msk [vmem:[%s2817_s4 + $0xc4] sm:$0xf] %vm1033_vm2, %v1591_v44  ;;  %v1373_v51 = vsel %vm1098_vm3, %v1271_v7, 0.0  ;;  %v1375_v32 = vsel %vm1098_vm3, %v1272_v11, 0.0  ;;  %v1273_v8 = vmul.f32 %v2420_v37, %v2420_v37 }
 0x12a   :  { %v1364_v50 = vadd.f32 %v1363_v46, %v1362_v43  ;;  %v1169_v52 = vadd.f32 %v1168_v20, %v1167_v42  ;;  %v2572_v63 = vpop.f32.mrb[21].mxu1  ;;  %v1596_v16 = vpack.c.bf16 %v2560_v58, %v2560_v58  ;;  %v1274_v39 = vmul.f32 %v2400_v2, %v2400_v2 }
 0x12b   :  { %v2580_v55 = vpop.f32.mrb[22].mxu1  ;;  %v1594_v15 = vpack.c.bf16 %v2572_v63, %v2572_v63  ;;  %v1180_v38 = vsel %vm1098_vm3, %v2420_v37, 0.0  ;;  %v1182_v40 = vsel %vm1098_vm3, %v2400_v2, 0.0  ;;  %v1275_v43 = vmul.f32 %v2414_v31, %v2414_v31 }
 0x12c   :  { %v1171_v18 = vadd.f32 %v1170_v47, %v1169_v52  ;;  %v1366_v34 = vadd.f32 %v1365_v17, %v1364_v50  ;;  %v2593_v12 = vpop.f32.mrb[23].mxu1  ;;  %1088 = vst.msk [vmem:[%s2817_s4 + $0xd8] sm:$0xf] %vm1033_vm2, %v1596_v16  ;;  %v1597_v33 = vpack.c.bf16 %v2580_v55, %v2580_v55  ;;  %v1377_v45 = vsel %vm1098_vm3, %v1273_v8, 0.0 }
 0x12d   :  { %1086 = vst.msk [vmem:[%s2817_s4 + $0xd0] sm:$0xf] %vm1033_vm2, %v1594_v15  ;;  %v1595_v21 = vpack.c.bf16 %v2593_v12, %v2593_v12  ;;  %v1276_v46 = vmul.f32 %v2452_v57, %v2452_v57  ;;  %v1379_v52 = vsel %vm1098_vm3, %v1274_v39, 0.0  ;;  %v1184_v17 = vsel %vm1098_vm3, %v2414_v31, 0.0 }
 0x12e   :  { %v1368_v3 = vadd.f32 %v1367_v30, %v1366_v34  ;;  %v1173_v5 = vadd.f32 %v1172_v60, %v1171_v18  ;;  %1089 = vst.msk [vmem:[%s2817_s4 + $0xdc] sm:$0xf] %vm1033_vm2, %v1597_v33  ;;  %v1186_v30 = vsel %vm1098_vm3, %v2452_v57, 0.0  ;;  %v1381_v31 = vsel %vm1098_vm3, %v1275_v43, 0.0 }
 0x12f   :  { %1087 = vst.msk [vmem:[%s2817_s4 + $0xd4] sm:$0xf] %vm1033_vm2, %v1595_v21  ;;  %v1383_v34 = vsel %vm1098_vm3, %v1276_v46, 0.0  ;;  %v1277_v57 = vmul.f32 %v2466_v4, %v2466_v4  ;;  %v1278_v62 = vmul.f32 %v2444_v53, %v2444_v53  ;;  %v1190_v7 = vsel %vm1098_vm3, %v2444_v53, 0.0 }
 0x130   :  { %v1175_v13 = vadd.f32 %v1174_v0, %v1173_v5  ;;  %v1370_v14 = vadd.f32 %v1369_v9, %v1368_v3  ;;  %v1188_v0 = vsel %vm1098_vm3, %v2466_v4, 0.0  ;;  %v1280_v16 = vmul.f32 %v2508_v25, %v2508_v25 }
 0x131   :  { %v2624_v26 = vpop.f32.mrb[24].mxu1  ;;  %v1385_v4 = vsel %vm1098_vm3, %v1277_v57, 0.0  ;;  %v1282_v21 = vmul.f32 %v2496_v35, %v2496_v35  ;;  %v1196_v39 = vsel %vm1098_vm3, %v2529_v41, 0.0  ;;  %v1284_v43 = vmul.f32 %v2572_v63, %v2572_v63 }
 0x132   :  { %v1372_v27 = vadd.f32 %v1371_v19, %v1370_v14  ;;  %v1177_v28 = vadd.f32 %v1176_v22, %v1175_v13  ;;  %v1600_v1 = vpack.c.bf16 %v2624_v26, %v2624_v26  ;;  %v2636_v29 = vpop.f32.mrb[25].mxu1  ;;  %v1279_v14 = vmul.f32 %v2460_v61, %v2460_v61 }
 0x133   :  { %v2644_v37 = vpop.f32.mrb[26].mxu1  ;;  %v1598_v2 = vpack.c.bf16 %v2636_v29, %v2636_v29 }
 0x134   :  { %v1179_v36 = vadd.f32 %v1178_v23, %v1177_v28  ;;  %v1374_v6 = vadd.f32 %v1373_v51, %v1372_v27  ;;  %1092 = vst.msk [vmem:[%s2817_s4 + $0xe8] sm:$0xf] %vm1033_vm2, %v1600_v1  ;;  %v2657_v20 = vpop.f32.mrb[27].mxu1  ;;  %v1601_v50 = vpack.c.bf16 %v2644_v37, %v2644_v37  ;;  %v1387_v27 = vsel %vm1098_vm3, %v1278_v62, 0.0 }
 0x135   :  { %1090 = vst.msk [vmem:[%s2817_s4 + $0xe0] sm:$0xf] %vm1033_vm2, %v1598_v2  ;;  %v1599_v48 = vpack.c.bf16 %v2657_v20, %v2657_v20  ;;  %v1192_v28 = vsel %vm1098_vm3, %v2460_v61, 0.0  ;;  %v1194_v51 = vsel %vm1098_vm3, %v2508_v25, 0.0  ;;  %v1389_v33 = vsel %vm1098_vm3, %v1279_v14, 0.0 }
 0x136   :  { %v1376_v10 = vadd.f32 %v1375_v32, %v1374_v6  ;;  %v1181_v42 = vadd.f32 %v1180_v38, %v1179_v36  ;;  %1093 = vst.msk [vmem:[%s2817_s4 + $0xec] sm:$0xf] %vm1033_vm2, %v1601_v50  ;;  %v1391_v36 = vsel %vm1098_vm3, %v1280_v16, 0.0  ;;  %v1281_v61 = vmul.f32 %v2529_v41, %v2529_v41 }
 0x137   :  { %1091 = vst.msk [vmem:[%s2817_s4 + $0xe4] sm:$0xf] %vm1033_vm2, %v1599_v48  ;;  %v1395_v2 = vsel %vm1098_vm3, %v1282_v21, 0.0  ;;  %v1200_v41 = vsel %vm1098_vm3, %v2516_v24, 0.0  ;;  %v1290_v16 = vmul.f32 %v2624_v26, %v2624_v26 }
 0x138   :  { %v1183_v47 = vadd.f32 %v1182_v40, %v1181_v42  ;;  %v1378_v49 = vadd.f32 %v1377_v45, %v1376_v10  ;;  %v1198_v40 = vsel %vm1098_vm3, %v2496_v35, 0.0  ;;  %v1283_v10 = vmul.f32 %v2516_v24, %v2516_v24 }
 0x139   :  { %v2684_v60 = vpop.f32.mrb[28].mxu1  ;;  %v1393_v42 = vsel %vm1098_vm3, %v1281_v61, 0.0  ;;  %v1204_v24 = vsel %vm1098_vm3, %v2593_v12, 0.0 }
 0x13a   :  { %v1380_v54 = vadd.f32 %v1379_v52, %v1378_v49  ;;  %v1185_v18 = vadd.f32 %v1184_v17, %v1183_v47  ;;  %v1604_v3 = vpack.c.bf16 %v2684_v60, %v2684_v60  ;;  %v2692_v5 = vpop.f32.mrb[29].mxu1  ;;  %v1202_v47 = vsel %vm1098_vm3, %v2572_v63, 0.0 }
 0x13b   :  { %v1602_v44 = vpack.c.bf16 %v2692_v5, %v2692_v5  ;;  %v2698_v13 = vpop.f32.mrb[30].mxu1  ;;  %v1397_v50 = vsel %vm1098_vm3, %v1283_v10, 0.0  ;;  %v1399_v52 = vsel %vm1098_vm3, %v1284_v43, 0.0  ;;  %v1285_v17 = vmul.f32 %v2593_v12, %v2593_v12 }
 0x13c   :  { %v1187_v56 = vadd.f32 %v1186_v30, %v1185_v18  ;;  %v1382_v59 = vadd.f32 %v1381_v31, %v1380_v54  ;;  %1096 = vst.msk [vmem:[%s2817_s4 + $0xf8] sm:$0xf] %vm1033_vm2, %v1604_v3  ;;  %v1605_v53 = vpack.c.bf16 %v2698_v13, %v2698_v13  ;;  %v2711_v19 = vpop.f32.mrb[31].mxu1  ;;  %v1286_v54 = vmul.f32 %v2560_v58, %v2560_v58 }
 0x13d   :  { %1094 = vst.msk [vmem:[%s2817_s4 + $0xf0] sm:$0xf] %vm1033_vm2, %v1602_v44  ;;  %v1603_v15 = vpack.c.bf16 %v2711_v19, %v2711_v19  ;;  %v1206_v63 = vsel %vm1098_vm3, %v2560_v58, 0.0  ;;  %v1401_v57 = vsel %vm1098_vm3, %v1285_v17, 0.0  ;;  %v1208_v12 = vsel %vm1098_vm3, %v2580_v55, 0.0 }
 0x13e   :  { %v1384_v9 = vadd.f32 %v1383_v34, %v1382_v59  ;;  %v1189_v11 = vadd.f32 %v1188_v0, %v1187_v56  ;;  %1097 = vst.msk [vmem:[%s2817_s4 + $0xfc] sm:$0xf] %vm1033_vm2, %v1605_v53  ;;  %v1287_v34 = vmul.f32 %v2580_v55, %v2580_v55  ;;  %v1288_v56 = vmul.f32 %v2636_v29, %v2636_v29 }
 0x13f   :  { %1095 = vst.msk [vmem:[%s2817_s4 + $0xf4] sm:$0xf] %vm1033_vm2, %v1603_v15  ;;  %v1403_v0 = vsel %vm1098_vm3, %v1286_v54, 0.0  ;;  %v1210_v3 = vsel %vm1098_vm3, %v2636_v29, 0.0  ;;  %v1289_v44 = vmul.f32 %v2657_v20, %v2657_v20  ;;  %v1212_v55 = vsel %vm1098_vm3, %v2657_v20, 0.0 }
 0x140   :  { %v1191_v22 = vadd.f32 %v1190_v7, %v1189_v11  ;;  %v1386_v23 = vadd.f32 %v1385_v4, %v1384_v9  ;;  %v1405_v9 = vsel %vm1098_vm3, %v1287_v34, 0.0  ;;  %v1407_v11 = vsel %vm1098_vm3, %v1288_v56, 0.0 }
 0x141   :  { %v1214_v29 = vsel %vm1098_vm3, %v2624_v26, 0.0  ;;  %v1409_v15 = vsel %vm1098_vm3, %v1289_v44, 0.0  ;;  %v1216_v20 = vsel %vm1098_vm3, %v2644_v37, 0.0 }
 0x142   :  { %v1388_v32 = vadd.f32 %v1387_v27, %v1386_v23  ;;  %v1193_v8 = vadd.f32 %v1192_v28, %v1191_v22  ;;  %v1291_v23 = vmul.f32 %v2644_v37, %v2644_v37  ;;  %v1292_v27 = vmul.f32 %v2692_v5, %v2692_v5 }
 0x143   :  { %v1220_v37 = vsel %vm1098_vm3, %v2711_v19, 0.0 }
 0x144   :  { %v1195_v25 = vadd.f32 %v1194_v51, %v1193_v8  ;;  %v1390_v6 = vadd.f32 %v1389_v33, %v1388_v32  ;;  %v1411_v32 = vsel %vm1098_vm3, %v1290_v16, 0.0  ;;  %v1218_v8 = vsel %vm1098_vm3, %v2692_v5, 0.0 }
 0x145   :  { %v1415_v61 = vsel %vm1098_vm3, %v1292_v27, 0.0  ;;  %v1222_v5 = vsel %vm1098_vm3, %v2684_v60, 0.0 }
 0x146   :  { %v1392_v38 = vadd.f32 %v1391_v36, %v1390_v6  ;;  %v1197_v1 = vadd.f32 %v1196_v39, %v1195_v25  ;;  %v1413_v36 = vsel %vm1098_vm3, %v1291_v23, 0.0  ;;  %v1293_v25 = vmul.f32 %v2711_v19, %v2711_v19 }
 0x147   :  { %v1294_v39 = vmul.f32 %v2684_v60, %v2684_v60 }
 0x148   :  { %v1199_v45 = vadd.f32 %v1198_v40, %v1197_v1  ;;  %v1394_v46 = vadd.f32 %v1393_v42, %v1392_v38  ;;  %v1295_v40 = vmul.f32 %v2698_v13, %v2698_v13  ;;  %v1417_v10 = vsel %vm1098_vm3, %v1293_v25, 0.0 }
 0x14a   :  { %v1396_v49 = vadd.f32 %v1395_v2, %v1394_v46  ;;  %v1201_v35 = vadd.f32 %v1200_v41, %v1199_v45  ;;  %v1419_v45 = vsel %vm1098_vm3, %v1294_v39, 0.0  ;;  %v1224_v46 = vsel %vm1098_vm3, %v2698_v13, 0.0 }
 0x14b   :  { %v1421_v19 = vsel %vm1098_vm3, %v1295_v40, 0.0 }
 0x14c   :  { %v1203_v30 = vadd.f32 %v1202_v47, %v1201_v35  ;;  %v1398_v48 = vadd.f32 %v1397_v50, %v1396_v49  ;;  %v1429_v50 = vlaneseq }
 0x14e   :  { %v1400_v18 = vadd.f32 %v1399_v52, %v1398_v48  ;;  %v1205_v31 = vadd.f32 %v1204_v24, %v1203_v30  ;;  %v1430_v54 = vshrl.u32 %v1429_v50, 7 }
 0x150   :  { %v1207_v59 = vadd.f32 %v1206_v63, %v1205_v31  ;;  %v1402_v62 = vadd.f32 %v1401_v57, %v1400_v18  ;;  %vm1432_vm4 = vcmp.eq.s32.totalorder %v1430_v54, 1  ;;  %vm1431_vm5 = vcmp.eq.s32.totalorder %v1430_v54, 0 }
 0x152   :  { %v1404_v7 = vadd.f32 %v1403_v0, %v1402_v62  ;;  %v1209_v58 = vadd.f32 %v1208_v12, %v1207_v59 }
 0x154   :  { %v1211_v14 = vadd.f32 %v1210_v3, %v1209_v58  ;;  %v1406_v4 = vadd.f32 %v1405_v9, %v1404_v7 }
 0x156   :  { %v1408_v53 = vadd.f32 %v1407_v11, %v1406_v4  ;;  %v1213_v22 = vadd.f32 %v1212_v55, %v1211_v14 }
 0x158   :  { %v1215_v28 = vadd.f32 %v1214_v29, %v1213_v22  ;;  %v1410_v51 = vadd.f32 %v1409_v15, %v1408_v53 }
 0x15a   :  { %v1412_v33 = vadd.f32 %v1411_v32, %v1410_v51  ;;  %v1217_v26 = vadd.f32 %v1216_v20, %v1215_v28 }
 0x15c   :  { %v1219_v6 = vadd.f32 %v1218_v8, %v1217_v26  ;;  %v1414_v21 = vadd.f32 %v1413_v36, %v1412_v33 }
 0x15e   :  { %v1416_v38 = vadd.f32 %v1415_v61, %v1414_v21  ;;  %v1221_v1 = vadd.f32 %v1220_v37, %v1219_v6 }
 0x160   :  { %v1223_v42 = vadd.f32 %v1222_v5, %v1221_v1  ;;  %v1418_v43 = vadd.f32 %v1417_v10, %v1416_v38 }
 0x162   :  { %v1225_v2 = vadd.f32 %v1224_v46, %v1223_v42  ;;  %v1420_v41 = vadd.f32 %v1419_v45, %v1418_v43 }
 0x164   :  { %v1226_v47 = vrot.slane %v1225_v2, 4  ;;  %v1422_v49 = vadd.f32 %v1421_v19, %v1420_v41 }
 0x166   :  { %v1227_v35 = vadd.f32 %v1226_v47, %v1225_v2  ;;  %v1423_v60 = vrot.slane %v1422_v49, 4 }
 0x168   :  { %v1228_v52 = vrot.slane %v1227_v35, 2  ;;  %v1424_v17 = vadd.f32 %v1423_v60, %v1422_v49 }
 0x16a   :  { %v1229_v30 = vadd.f32 %v1228_v52, %v1227_v35  ;;  %v1425_v48 = vrot.slane %v1424_v17, 2 }
 0x16c   :  { %v1426_v24 = vadd.f32 %v1425_v48, %v1424_v17  ;;  %v1230_v18 = vrot.slane %v1229_v30, 1 }
 0x16e   :  { %v1427_v31 = vrot.slane %v1426_v24, 1  ;;  %v1231_v13 = vadd.f32 %v1230_v18, %v1229_v30 }
 0x170   :  { %v1428_v63 = vadd.f32 %v1427_v31, %v1426_v24 }
 0x172   :  { %v1433_v34 = vsel %vm1432_vm4, %v1428_v63, 0.0 }
 0x173   :  { %v1434_v57 = vsel %vm1431_vm5, %v1231_v13, %v1433_v34 }
 0x174   :  { %1435 = vst.msk [vmem:[%s2818_s5] sm:$0xff] %vm1098_vm3, %v1434_v57 }

// kernel: bottleneck_forward.7
= control target key start
LH: loop header
LB: loop body
LE: loop exit
PB: predicated region body
PF: predicated region fallthrough
CT: control target
= control target key end

     0   :  { %vm543_vm0 = vcmask 130048   ;;  %s1543_s0 = inlined_call_operand.vmem [shape: bf16[512,16], index: 0, kind: input, shape index: {}]   ;;  %s1544_s1 = inlined_call_operand.vmem [shape: f32[1,16], index: 1, kind: input, shape index: {}]   ;;  %s1545_s2 = inlined_call_operand.vmem [shape: f32[1,16], index: 2, kind: input, shape index: {}]   ;;  %s1546_s3 = inlined_call_operand.vmem [shape: bf16[512,16], index: 3, kind: input, shape index: {}]   ;;  %s1547_s4 = inlined_call_operand.vmem [shape: f32[512,16], index: 4, kind: output, shape index: {}]  }
   0x1   :  { %v615_v0 = vld [vmem:[%s1543_s0] sm:$0xff]   ;;  %v870_v5 = vld [vmem:[%s1543_s0 + $0x8] sm:$0xff]   ;;  %v871_v12 = vld [vmem:[%s1543_s0 + $0x10] sm:$0xff]  }
   0x2   :  { %v963_v1 = vld [vmem:[%s1544_s1] ss:$0 sm:$0xff]  ;;  %v616_v2 = vunpack.c.l.bf16 %v615_v0  ;;  %v617_v4 = vunpack.c.h.bf16 %v615_v0  ;;  %v901_v6 = vld [vmem:[%s1546_s3 + $0x8] sm:$0xff]   ;;  %v620_v10 = vunpack.c.l.bf16 %v870_v5  ;;  %v902_v13 = vld [vmem:[%s1546_s3 + $0x10] sm:$0xff]   ;;  %v621_v16 = vunpack.c.h.bf16 %v870_v5 }
   0x3   :  { %v743_v3 = vld [vmem:[%s1546_s3] sm:$0xff]   ;;  %v748_v11 = vunpack.c.l.bf16 %v901_v6  ;;  %v749_v17 = vunpack.c.h.bf16 %v901_v6  ;;  %v872_v18 = vld [vmem:[%s1543_s0 + $0x18] sm:$0xff]   ;;  %v624_v20 = vunpack.c.l.bf16 %v871_v12  ;;  %v752_v21 = vunpack.c.l.bf16 %v902_v13  ;;  %v874_v54 = vld [vmem:[%s1543_s0 + $0x28] sm:$0xff]  }
   0x4   :  { %v977_v7 = vld [vmem:[%s1545_s2] ss:$0 sm:$0xff]  ;;  %v744_v8 = vunpack.c.l.bf16 %v743_v3  ;;  %v745_v9 = vunpack.c.h.bf16 %v743_v3  ;;  %v152_v14 = vmul.f32 %v616_v2, %v963_v1  ;;  %v153_v15 = vmul.f32 %v617_v4, %v963_v1  ;;  %v903_v23 = vld [vmem:[%s1546_s3 + $0x18] sm:$0xff]   ;;  %v905_v55 = vld [vmem:[%s1546_s3 + $0x28] sm:$0xff]  }
   0x5   :  { %v154_v19 = vmul.f32 %v620_v10, %v963_v1  ;;  %v625_v22 = vunpack.c.h.bf16 %v871_v12  ;;  %v155_v26 = vmul.f32 %v621_v16, %v963_v1  ;;  %v753_v27 = vunpack.c.h.bf16 %v902_v13  ;;  %v873_v40 = vld [vmem:[%s1543_s0 + $0x20] sm:$0xff]   ;;  %v875_v0 = vld [vmem:[%s1543_s0 + $0x30] sm:$0xff]   ;;  %v876_v16 = vld [vmem:[%s1543_s0 + $0x38] sm:$0xff]  }
   0x6   :  { %v223_v24 = vadd.f32 %v977_v7, %v152_v14  ;;  %v224_v25 = vadd.f32 %v977_v7, %v153_v15  ;;  %v156_v29 = vmul.f32 %v624_v20, %v963_v1  ;;  %v628_v31 = vunpack.c.l.bf16 %v872_v18  ;;  %v904_v45 = vld [vmem:[%s1546_s3 + $0x20] sm:$0xff]   ;;  %v906_v2 = vld [vmem:[%s1546_s3 + $0x30] sm:$0xff]  }
   0x7   :  { %v225_v28 = vadd.f32 %v977_v7, %v154_v19  ;;  %v157_v30 = vmul.f32 %v625_v22, %v963_v1  ;;  %v226_v34 = vadd.f32 %v977_v7, %v155_v26  ;;  %v756_v35 = vunpack.c.l.bf16 %v903_v23 }
   0x8   :  { %v415_v32 = vadd.f32 %v744_v8, %v223_v24  ;;  %v416_v33 = vadd.f32 %v745_v9, %v224_v25  ;;  %v227_v37 = vadd.f32 %v977_v7, %v156_v29  ;;  %v158_v39 = vmul.f32 %v628_v31, %v963_v1 }
   0x9   :  { %v417_v36 = vadd.f32 %v748_v11, %v225_v28  ;;  %v228_v38 = vadd.f32 %v977_v7, %v157_v30  ;;  %v418_v43 = vadd.f32 %v749_v17, %v226_v34  ;;  %v629_v44 = vunpack.c.h.bf16 %v872_v18  ;;  %v877_v34 = vld [vmem:[%s1543_s0 + $0x40] sm:$0xff]  }
   0xa   :  { %v479_v41 = vmax.f32 %v415_v32, 0.0  ;;  %v480_v42 = vmax.f32 %v416_v33, 0.0  ;;  %v419_v47 = vadd.f32 %v752_v21, %v227_v37  ;;  %v229_v49 = vadd.f32 %v977_v7, %v158_v39  ;;  %v907_v21 = vld [vmem:[%s1546_s3 + $0x38] sm:$0xff]   ;;  %v908_v39 = vld [vmem:[%s1546_s3 + $0x40] sm:$0xff]  }
   0xb   :  { %v481_v46 = vmax.f32 %v417_v36, 0.0  ;;  %v420_v48 = vadd.f32 %v753_v27, %v228_v38  ;;  %v482_v50 = vmax.f32 %v418_v43, 0.0  ;;  %v159_v51 = vmul.f32 %v629_v44, %v963_v1 }
   0xc   :  { %544 = vst.msk [vmem:[%s1547_s4] sm:$0xff] %vm543_vm0, %v479_v41  ;;  %545 = vst.msk [vmem:[%s1547_s4 + $0x8] sm:$0xff] %vm543_vm0, %v480_v42  ;;  %v757_v52 = vunpack.c.h.bf16 %v903_v23  ;;  %v632_v53 = vunpack.c.l.bf16 %v873_v40  ;;  %v483_v56 = vmax.f32 %v419_v47, 0.0  ;;  %v421_v58 = vadd.f32 %v756_v35, %v229_v49  ;;  %v909_v49 = vld [vmem:[%s1546_s3 + $0x48] sm:$0xff]  }
   0xd   :  { %546 = vst.msk [vmem:[%s1547_s4 + $0x10] sm:$0xff] %vm543_vm0, %v481_v46  ;;  %v484_v57 = vmax.f32 %v420_v48, 0.0  ;;  %v760_v59 = vunpack.c.l.bf16 %v904_v45  ;;  %547 = vst.msk [vmem:[%s1547_s4 + $0x18] sm:$0xff] %vm543_vm0, %v482_v50  ;;  %v230_v60 = vadd.f32 %v977_v7, %v159_v51  ;;  %v633_v62 = vunpack.c.h.bf16 %v873_v40  ;;  %v878_v48 = vld [vmem:[%s1543_s0 + $0x48] sm:$0xff]  }
   0xe   :  { %v160_v61 = vmul.f32 %v632_v53, %v963_v1  ;;  %v761_v63 = vunpack.c.h.bf16 %v904_v45  ;;  %548 = vst.msk [vmem:[%s1547_s4 + $0x20] sm:$0xff] %vm543_vm0, %v483_v56  ;;  %v485_v3 = vmax.f32 %v421_v58, 0.0  ;;  %v636_v4 = vunpack.c.l.bf16 %v874_v54  ;;  %v879_v58 = vld [vmem:[%s1543_s0 + $0x50] sm:$0xff]  }
   0xf   :  { %549 = vst.msk [vmem:[%s1547_s4 + $0x28] sm:$0xff] %vm543_vm0, %v484_v57  ;;  %v764_v5 = vunpack.c.l.bf16 %v905_v55  ;;  %v637_v6 = vunpack.c.h.bf16 %v874_v54  ;;  %v422_v8 = vadd.f32 %v757_v52, %v230_v60  ;;  %v161_v10 = vmul.f32 %v633_v62, %v963_v1 }
  0x10   :  { %v231_v9 = vadd.f32 %v977_v7, %v160_v61  ;;  %v765_v11 = vunpack.c.h.bf16 %v905_v55  ;;  %550 = vst.msk [vmem:[%s1547_s4 + $0x30] sm:$0xff] %vm543_vm0, %v485_v3  ;;  %v162_v12 = vmul.f32 %v636_v4, %v963_v1  ;;  %v640_v14 = vunpack.c.l.bf16 %v875_v0 }
  0x11   :  { %v163_v13 = vmul.f32 %v637_v6, %v963_v1  ;;  %v768_v15 = vunpack.c.l.bf16 %v906_v2  ;;  %v486_v17 = vmax.f32 %v422_v8, 0.0  ;;  %v232_v19 = vadd.f32 %v977_v7, %v161_v10  ;;  %v880_v10 = vld [vmem:[%s1543_s0 + $0x58] sm:$0xff]  }
  0x12   :  { %v423_v18 = vadd.f32 %v760_v59, %v231_v9  ;;  %v641_v20 = vunpack.c.h.bf16 %v875_v0  ;;  %v233_v22 = vadd.f32 %v977_v7, %v162_v12  ;;  %v164_v24 = vmul.f32 %v640_v14, %v963_v1 }
  0x13   :  { %v234_v23 = vadd.f32 %v977_v7, %v163_v13  ;;  %v769_v25 = vunpack.c.h.bf16 %v906_v2  ;;  %551 = vst.msk [vmem:[%s1547_s4 + $0x38] sm:$0xff] %vm543_vm0, %v486_v17  ;;  %v424_v27 = vadd.f32 %v761_v63, %v232_v19  ;;  %v644_v29 = vunpack.c.l.bf16 %v876_v16  ;;  %v910_v63 = vld [vmem:[%s1546_s3 + $0x50] sm:$0xff]   ;;  %v911_v19 = vld [vmem:[%s1546_s3 + $0x58] sm:$0xff]  }
  0x14   :  { %v487_v26 = vmax.f32 %v423_v18, 0.0  ;;  %v165_v28 = vmul.f32 %v641_v20, %v963_v1  ;;  %v425_v30 = vadd.f32 %v764_v5, %v233_v22  ;;  %v235_v32 = vadd.f32 %v977_v7, %v164_v24 }
  0x15   :  { %v426_v31 = vadd.f32 %v765_v11, %v234_v23  ;;  %v772_v33 = vunpack.c.l.bf16 %v907_v21  ;;  %v488_v35 = vmax.f32 %v424_v27, 0.0  ;;  %v166_v37 = vmul.f32 %v644_v29, %v963_v1 }
  0x16   :  { %552 = vst.msk [vmem:[%s1547_s4 + $0x40] sm:$0xff] %vm543_vm0, %v487_v26  ;;  %v236_v36 = vadd.f32 %v977_v7, %v165_v28  ;;  %v645_v38 = vunpack.c.h.bf16 %v876_v16  ;;  %v489_v40 = vmax.f32 %v425_v30, 0.0  ;;  %v427_v42 = vadd.f32 %v768_v15, %v235_v32  ;;  %v881_v28 = vld [vmem:[%s1543_s0 + $0x60] sm:$0xff]  }
  0x17   :  { %v490_v41 = vmax.f32 %v426_v31, 0.0  ;;  %v773_v43 = vunpack.c.h.bf16 %v907_v21  ;;  %553 = vst.msk [vmem:[%s1547_s4 + $0x48] sm:$0xff] %vm543_vm0, %v488_v35  ;;  %v237_v45 = vadd.f32 %v977_v7, %v166_v37  ;;  %v648_v47 = vunpack.c.l.bf16 %v877_v34 }
  0x18   :  { %v428_v44 = vadd.f32 %v769_v25, %v236_v36  ;;  %v167_v46 = vmul.f32 %v645_v38, %v963_v1  ;;  %554 = vst.msk [vmem:[%s1547_s4 + $0x50] sm:$0xff] %vm543_vm0, %v489_v40  ;;  %v491_v50 = vmax.f32 %v427_v42, 0.0  ;;  %v776_v51 = vunpack.c.l.bf16 %v908_v39  ;;  %v882_v42 = vld [vmem:[%s1543_s0 + $0x68] sm:$0xff]  }
  0x19   :  { %555 = vst.msk [vmem:[%s1547_s4 + $0x58] sm:$0xff] %vm543_vm0, %v490_v41  ;;  %v649_v52 = vunpack.c.h.bf16 %v877_v34  ;;  %v777_v53 = vunpack.c.h.bf16 %v908_v39  ;;  %v429_v55 = vadd.f32 %v772_v33, %v237_v45  ;;  %v168_v57 = vmul.f32 %v648_v47, %v963_v1  ;;  %v912_v33 = vld [vmem:[%s1546_s3 + $0x60] sm:$0xff]  }
  0x1a   :  { %v492_v54 = vmax.f32 %v428_v44, 0.0  ;;  %v238_v56 = vadd.f32 %v977_v7, %v167_v46  ;;  %556 = vst.msk [vmem:[%s1547_s4 + $0x60] sm:$0xff] %vm543_vm0, %v491_v50  ;;  %v652_v60 = vunpack.c.l.bf16 %v878_v48  ;;  %v780_v61 = vunpack.c.l.bf16 %v909_v49 }
  0x1b   :  { %v169_v59 = vmul.f32 %v649_v52, %v963_v1  ;;  %v653_v62 = vunpack.c.h.bf16 %v878_v48  ;;  %v493_v0 = vmax.f32 %v429_v55, 0.0  ;;  %v239_v3 = vadd.f32 %v977_v7, %v168_v57  ;;  %v883_v52 = vld [vmem:[%s1543_s0 + $0x70] sm:$0xff]  }
  0x1c   :  { %557 = vst.msk [vmem:[%s1547_s4 + $0x68] sm:$0xff] %vm543_vm0, %v492_v54  ;;  %v430_v2 = vadd.f32 %v773_v43, %v238_v56  ;;  %v781_v4 = vunpack.c.h.bf16 %v909_v49  ;;  %v170_v6 = vmul.f32 %v652_v60, %v963_v1  ;;  %v656_v9 = vunpack.c.l.bf16 %v879_v58  ;;  %v913_v43 = vld [vmem:[%s1546_s3 + $0x68] sm:$0xff]   ;;  %v914_v57 = vld [vmem:[%s1546_s3 + $0x70] sm:$0xff]  }
  0x1d   :  { %v240_v5 = vadd.f32 %v977_v7, %v169_v59  ;;  %v171_v8 = vmul.f32 %v653_v62, %v963_v1  ;;  %558 = vst.msk [vmem:[%s1547_s4 + $0x70] sm:$0xff] %vm543_vm0, %v493_v0  ;;  %v431_v12 = vadd.f32 %v776_v51, %v239_v3  ;;  %v784_v13 = vunpack.c.l.bf16 %v910_v63  ;;  %v884_v3 = vld [vmem:[%s1543_s0 + $0x78] sm:$0xff]  }
  0x1e   :  { %v494_v11 = vmax.f32 %v430_v2, 0.0  ;;  %v657_v14 = vunpack.c.h.bf16 %v879_v58  ;;  %v241_v16 = vadd.f32 %v977_v7, %v170_v6  ;;  %v172_v18 = vmul.f32 %v656_v9, %v963_v1 }
  0x1f   :  { %v432_v15 = vadd.f32 %v777_v53, %v240_v5  ;;  %v242_v17 = vadd.f32 %v977_v7, %v171_v8  ;;  %v495_v20 = vmax.f32 %v431_v12, 0.0  ;;  %v785_v22 = vunpack.c.h.bf16 %v910_v63 }
  0x20   :  { %559 = vst.msk [vmem:[%s1547_s4 + $0x78] sm:$0xff] %vm543_vm0, %v494_v11  ;;  %v173_v21 = vmul.f32 %v657_v14, %v963_v1  ;;  %v660_v23 = vunpack.c.l.bf16 %v880_v10  ;;  %v433_v25 = vadd.f32 %v780_v61, %v241_v16  ;;  %v243_v27 = vadd.f32 %v977_v7, %v172_v18 }
  0x21   :  { %v496_v24 = vmax.f32 %v432_v15, 0.0  ;;  %v434_v26 = vadd.f32 %v781_v4, %v242_v17  ;;  %560 = vst.msk [vmem:[%s1547_s4 + $0x80] sm:$0xff] %vm543_vm0, %v495_v20  ;;  %v788_v31 = vunpack.c.l.bf16 %v911_v19  ;;  %v661_v32 = vunpack.c.h.bf16 %v880_v10 }
  0x22   :  { %v244_v29 = vadd.f32 %v977_v7, %v173_v21  ;;  %v174_v30 = vmul.f32 %v660_v23, %v963_v1  ;;  %v497_v34 = vmax.f32 %v433_v25, 0.0  ;;  %v435_v36 = vadd.f32 %v784_v13, %v243_v27  ;;  %v915_v13 = vld [vmem:[%s1546_s3 + $0x78] sm:$0xff]   ;;  %v916_v27 = vld [vmem:[%s1546_s3 + $0x80] sm:$0xff]  }
  0x23   :  { %561 = vst.msk [vmem:[%s1547_s4 + $0x88] sm:$0xff] %vm543_vm0, %v496_v24  ;;  %v498_v35 = vmax.f32 %v434_v26, 0.0  ;;  %v789_v37 = vunpack.c.h.bf16 %v911_v19  ;;  %v175_v40 = vmul.f32 %v661_v32, %v963_v1  ;;  %v664_v41 = vunpack.c.l.bf16 %v881_v28 }
  0x24   :  { %v436_v38 = vadd.f32 %v785_v22, %v244_v29  ;;  %v245_v39 = vadd.f32 %v977_v7, %v174_v30  ;;  %562 = vst.msk [vmem:[%s1547_s4 + $0x90] sm:$0xff] %vm543_vm0, %v497_v34  ;;  %v499_v44 = vmax.f32 %v435_v36, 0.0  ;;  %v792_v45 = vunpack.c.l.bf16 %v912_v33  ;;  %v885_v22 = vld [vmem:[%s1543_s0 + $0x80] sm:$0xff]   ;;  %v886_v36 = vld [vmem:[%s1543_s0 + $0x88] sm:$0xff]  }
  0x25   :  { %563 = vst.msk [vmem:[%s1547_s4 + $0x98] sm:$0xff] %vm543_vm0, %v498_v35  ;;  %v665_v46 = vunpack.c.h.bf16 %v881_v28  ;;  %v793_v47 = vunpack.c.h.bf16 %v912_v33  ;;  %v246_v50 = vadd.f32 %v977_v7, %v175_v40  ;;  %v176_v51 = vmul.f32 %v664_v41, %v963_v1 }
  0x26   :  { %v500_v48 = vmax.f32 %v436_v38, 0.0  ;;  %v437_v49 = vadd.f32 %v788_v31, %v245_v39  ;;  %564 = vst.msk [vmem:[%s1547_s4 + $0xa0] sm:$0xff] %vm543_vm0, %v499_v44  ;;  %v668_v54 = vunpack.c.l.bf16 %v882_v42  ;;  %v796_v55 = vunpack.c.l.bf16 %v913_v43 }
  0x27   :  { %v177_v53 = vmul.f32 %v665_v46, %v963_v1  ;;  %v669_v56 = vunpack.c.h.bf16 %v882_v42  ;;  %v438_v59 = vadd.f32 %v789_v37, %v246_v50  ;;  %v247_v60 = vadd.f32 %v977_v7, %v176_v51  ;;  %v917_v37 = vld [vmem:[%s1546_s3 + $0x88] sm:$0xff]   ;;  %v887_v46 = vld [vmem:[%s1543_s0 + $0x90] sm:$0xff]  }
  0x28   :  { %565 = vst.msk [vmem:[%s1547_s4 + $0xa8] sm:$0xff] %vm543_vm0, %v500_v48  ;;  %v501_v58 = vmax.f32 %v437_v49, 0.0  ;;  %v797_v61 = vunpack.c.h.bf16 %v913_v43  ;;  %v178_v63 = vmul.f32 %v668_v54, %v963_v1  ;;  %v672_v2 = vunpack.c.l.bf16 %v883_v52  ;;  %v918_v51 = vld [vmem:[%s1546_s3 + $0x90] sm:$0xff]  }
  0x29   :  { %v248_v62 = vadd.f32 %v977_v7, %v177_v53  ;;  %v179_v0 = vmul.f32 %v669_v56, %v963_v1  ;;  %v502_v4 = vmax.f32 %v438_v59, 0.0  ;;  %v439_v5 = vadd.f32 %v792_v45, %v247_v60  ;;  %v888_v60 = vld [vmem:[%s1543_s0 + $0x98] sm:$0xff]  }
  0x2a   :  { %566 = vst.msk [vmem:[%s1547_s4 + $0xb0] sm:$0xff] %vm543_vm0, %v501_v58  ;;  %v800_v6 = vunpack.c.l.bf16 %v914_v57  ;;  %v673_v8 = vunpack.c.h.bf16 %v883_v52  ;;  %v249_v10 = vadd.f32 %v977_v7, %v178_v63  ;;  %v180_v12 = vmul.f32 %v672_v2, %v963_v1 }
  0x2b   :  { %v440_v9 = vadd.f32 %v793_v47, %v248_v62  ;;  %v250_v11 = vadd.f32 %v977_v7, %v179_v0  ;;  %567 = vst.msk [vmem:[%s1547_s4 + $0xb8] sm:$0xff] %vm543_vm0, %v502_v4  ;;  %v503_v14 = vmax.f32 %v439_v5, 0.0  ;;  %v801_v16 = vunpack.c.h.bf16 %v914_v57 }
  0x2c   :  { %v181_v15 = vmul.f32 %v673_v8, %v963_v1  ;;  %v676_v17 = vunpack.c.l.bf16 %v884_v3  ;;  %v441_v19 = vadd.f32 %v796_v55, %v249_v10  ;;  %v251_v21 = vadd.f32 %v977_v7, %v180_v12 }
  0x2d   :  { %v504_v18 = vmax.f32 %v440_v9, 0.0  ;;  %v442_v20 = vadd.f32 %v797_v61, %v250_v11  ;;  %568 = vst.msk [vmem:[%s1547_s4 + $0xc0] sm:$0xff] %vm543_vm0, %v503_v14  ;;  %v804_v25 = vunpack.c.l.bf16 %v915_v13  ;;  %v677_v26 = vunpack.c.h.bf16 %v884_v3 }
  0x2e   :  { %v252_v23 = vadd.f32 %v977_v7, %v181_v15  ;;  %v182_v24 = vmul.f32 %v676_v17, %v963_v1  ;;  %v505_v28 = vmax.f32 %v441_v19, 0.0  ;;  %v443_v30 = vadd.f32 %v800_v6, %v251_v21  ;;  %v919_v6 = vld [vmem:[%s1546_s3 + $0x98] sm:$0xff]   ;;  %v920_v21 = vld [vmem:[%s1546_s3 + $0xa0] sm:$0xff]  }
  0x2f   :  { %569 = vst.msk [vmem:[%s1547_s4 + $0xc8] sm:$0xff] %vm543_vm0, %v504_v18  ;;  %v506_v29 = vmax.f32 %v442_v20, 0.0  ;;  %v805_v31 = vunpack.c.h.bf16 %v915_v13  ;;  %v183_v34 = vmul.f32 %v677_v26, %v963_v1  ;;  %v680_v35 = vunpack.c.l.bf16 %v885_v22 }
  0x30   :  { %v444_v32 = vadd.f32 %v801_v16, %v252_v23  ;;  %v253_v33 = vadd.f32 %v977_v7, %v182_v24  ;;  %570 = vst.msk [vmem:[%s1547_s4 + $0xd0] sm:$0xff] %vm543_vm0, %v505_v28  ;;  %v507_v38 = vmax.f32 %v443_v30, 0.0  ;;  %v808_v39 = vunpack.c.l.bf16 %v916_v27  ;;  %v889_v16 = vld [vmem:[%s1543_s0 + $0xa0] sm:$0xff]   ;;  %v890_v30 = vld [vmem:[%s1543_s0 + $0xa8] sm:$0xff]  }
  0x31   :  { %571 = vst.msk [vmem:[%s1547_s4 + $0xd8] sm:$0xff] %vm543_vm0, %v506_v29  ;;  %v681_v40 = vunpack.c.h.bf16 %v885_v22  ;;  %v809_v41 = vunpack.c.h.bf16 %v916_v27  ;;  %v254_v44 = vadd.f32 %v977_v7, %v183_v34  ;;  %v184_v45 = vmul.f32 %v680_v35, %v963_v1 }
  0x32   :  { %v508_v42 = vmax.f32 %v444_v32, 0.0  ;;  %v445_v43 = vadd.f32 %v804_v25, %v253_v33  ;;  %572 = vst.msk [vmem:[%s1547_s4 + $0xe0] sm:$0xff] %vm543_vm0, %v507_v38  ;;  %v684_v48 = vunpack.c.l.bf16 %v886_v36  ;;  %v812_v49 = vunpack.c.l.bf16 %v917_v37 }
  0x33   :  { %v185_v47 = vmul.f32 %v681_v40, %v963_v1  ;;  %v685_v50 = vunpack.c.h.bf16 %v886_v36  ;;  %v446_v53 = vadd.f32 %v805_v31, %v254_v44  ;;  %v255_v54 = vadd.f32 %v977_v7, %v184_v45  ;;  %v921_v31 = vld [vmem:[%s1546_s3 + $0xa8] sm:$0xff]   ;;  %v891_v40 = vld [vmem:[%s1543_s0 + $0xb0] sm:$0xff]  }
  0x34   :  { %573 = vst.msk [vmem:[%s1547_s4 + $0xe8] sm:$0xff] %vm543_vm0, %v508_v42  ;;  %v509_v52 = vmax.f32 %v445_v43, 0.0  ;;  %v813_v55 = vunpack.c.h.bf16 %v917_v37  ;;  %v186_v57 = vmul.f32 %v684_v48, %v963_v1  ;;  %v688_v59 = vunpack.c.l.bf16 %v887_v46  ;;  %v922_v45 = vld [vmem:[%s1546_s3 + $0xb0] sm:$0xff]  }
  0x35   :  { %v256_v56 = vadd.f32 %v977_v7, %v185_v47  ;;  %v187_v58 = vmul.f32 %v685_v50, %v963_v1  ;;  %v510_v61 = vmax.f32 %v446_v53, 0.0  ;;  %v447_v62 = vadd.f32 %v808_v39, %v255_v54  ;;  %v892_v54 = vld [vmem:[%s1543_s0 + $0xb8] sm:$0xff]  }
  0x36   :  { %574 = vst.msk [vmem:[%s1547_s4 + $0xf0] sm:$0xff] %vm543_vm0, %v509_v52  ;;  %v816_v63 = vunpack.c.l.bf16 %v918_v51  ;;  %v689_v0 = vunpack.c.h.bf16 %v887_v46  ;;  %v257_v3 = vadd.f32 %v977_v7, %v186_v57  ;;  %v188_v5 = vmul.f32 %v688_v59, %v963_v1 }
  0x37   :  { %v448_v2 = vadd.f32 %v809_v41, %v256_v56  ;;  %v258_v4 = vadd.f32 %v977_v7, %v187_v58  ;;  %575 = vst.msk [vmem:[%s1547_s4 + $0xf8] sm:$0xff] %vm543_vm0, %v510_v61  ;;  %v511_v8 = vmax.f32 %v447_v62, 0.0  ;;  %v817_v10 = vunpack.c.h.bf16 %v918_v51 }
  0x38   :  { %v189_v9 = vmul.f32 %v689_v0, %v963_v1  ;;  %v692_v11 = vunpack.c.l.bf16 %v888_v60  ;;  %v449_v13 = vadd.f32 %v812_v49, %v257_v3  ;;  %v259_v15 = vadd.f32 %v977_v7, %v188_v5 }
  0x39   :  { %v512_v12 = vmax.f32 %v448_v2, 0.0  ;;  %v450_v14 = vadd.f32 %v813_v55, %v258_v4  ;;  %576 = vst.msk [vmem:[%s1547_s4 + $0x100] sm:$0xff] %vm543_vm0, %v511_v8  ;;  %v820_v19 = vunpack.c.l.bf16 %v919_v6  ;;  %v693_v20 = vunpack.c.h.bf16 %v888_v60 }
  0x3a   :  { %v260_v17 = vadd.f32 %v977_v7, %v189_v9  ;;  %v190_v18 = vmul.f32 %v692_v11, %v963_v1  ;;  %v513_v22 = vmax.f32 %v449_v13, 0.0  ;;  %v451_v24 = vadd.f32 %v816_v63, %v259_v15  ;;  %v923_v63 = vld [vmem:[%s1546_s3 + $0xb8] sm:$0xff]   ;;  %v924_v15 = vld [vmem:[%s1546_s3 + $0xc0] sm:$0xff]  }
  0x3b   :  { %577 = vst.msk [vmem:[%s1547_s4 + $0x108] sm:$0xff] %vm543_vm0, %v512_v12  ;;  %v514_v23 = vmax.f32 %v450_v14, 0.0  ;;  %v821_v25 = vunpack.c.h.bf16 %v919_v6  ;;  %v191_v28 = vmul.f32 %v693_v20, %v963_v1  ;;  %v696_v29 = vunpack.c.l.bf16 %v889_v16 }
  0x3c   :  { %v452_v26 = vadd.f32 %v817_v10, %v260_v17  ;;  %v261_v27 = vadd.f32 %v977_v7, %v190_v18  ;;  %578 = vst.msk [vmem:[%s1547_s4 + $0x110] sm:$0xff] %vm543_vm0, %v513_v22  ;;  %v515_v32 = vmax.f32 %v451_v24, 0.0  ;;  %v824_v33 = vunpack.c.l.bf16 %v920_v21  ;;  %v893_v10 = vld [vmem:[%s1543_s0 + $0xc0] sm:$0xff]   ;;  %v894_v24 = vld [vmem:[%s1543_s0 + $0xc8] sm:$0xff]  }
  0x3d   :  { %579 = vst.msk [vmem:[%s1547_s4 + $0x118] sm:$0xff] %vm543_vm0, %v514_v23  ;;  %v697_v34 = vunpack.c.h.bf16 %v889_v16  ;;  %v825_v35 = vunpack.c.h.bf16 %v920_v21  ;;  %v262_v38 = vadd.f32 %v977_v7, %v191_v28  ;;  %v192_v39 = vmul.f32 %v696_v29, %v963_v1 }
  0x3e   :  { %v516_v36 = vmax.f32 %v452_v26, 0.0  ;;  %v453_v37 = vadd.f32 %v820_v19, %v261_v27  ;;  %580 = vst.msk [vmem:[%s1547_s4 + $0x120] sm:$0xff] %vm543_vm0, %v515_v32  ;;  %v700_v42 = vunpack.c.l.bf16 %v890_v30  ;;  %v828_v43 = vunpack.c.l.bf16 %v921_v31 }
  0x3f   :  { %v193_v41 = vmul.f32 %v697_v34, %v963_v1  ;;  %v701_v44 = vunpack.c.h.bf16 %v890_v30  ;;  %v454_v47 = vadd.f32 %v821_v25, %v262_v38  ;;  %v263_v48 = vadd.f32 %v977_v7, %v192_v39  ;;  %v925_v25 = vld [vmem:[%s1546_s3 + $0xc8] sm:$0xff]   ;;  %v895_v34 = vld [vmem:[%s1543_s0 + $0xd0] sm:$0xff]  }
  0x40   :  { %581 = vst.msk [vmem:[%s1547_s4 + $0x128] sm:$0xff] %vm543_vm0, %v516_v36  ;;  %v517_v46 = vmax.f32 %v453_v37, 0.0  ;;  %v829_v49 = vunpack.c.h.bf16 %v921_v31  ;;  %v194_v51 = vmul.f32 %v700_v42, %v963_v1  ;;  %v704_v53 = vunpack.c.l.bf16 %v891_v40  ;;  %v926_v39 = vld [vmem:[%s1546_s3 + $0xd0] sm:$0xff]  }
  0x41   :  { %v264_v50 = vadd.f32 %v977_v7, %v193_v41  ;;  %v195_v52 = vmul.f32 %v701_v44, %v963_v1  ;;  %v518_v55 = vmax.f32 %v454_v47, 0.0  ;;  %v455_v56 = vadd.f32 %v824_v33, %v263_v48  ;;  %v896_v48 = vld [vmem:[%s1543_s0 + $0xd8] sm:$0xff]  }
  0x42   :  { %582 = vst.msk [vmem:[%s1547_s4 + $0x130] sm:$0xff] %vm543_vm0, %v517_v46  ;;  %v832_v57 = vunpack.c.l.bf16 %v922_v45  ;;  %v705_v58 = vunpack.c.h.bf16 %v891_v40  ;;  %v265_v60 = vadd.f32 %v977_v7, %v194_v51  ;;  %v196_v62 = vmul.f32 %v704_v53, %v963_v1 }
  0x43   :  { %v456_v59 = vadd.f32 %v825_v35, %v264_v50  ;;  %v266_v61 = vadd.f32 %v977_v7, %v195_v52  ;;  %583 = vst.msk [vmem:[%s1547_s4 + $0x138] sm:$0xff] %vm543_vm0, %v518_v55  ;;  %v519_v0 = vmax.f32 %v455_v56, 0.0  ;;  %v833_v3 = vunpack.c.h.bf16 %v922_v45 }
  0x44   :  { %v197_v2 = vmul.f32 %v705_v58, %v963_v1  ;;  %v708_v4 = vunpack.c.l.bf16 %v892_v54  ;;  %v457_v6 = vadd.f32 %v828_v43, %v265_v60  ;;  %v267_v9 = vadd.f32 %v977_v7, %v196_v62 }
  0x45   :  { %v520_v5 = vmax.f32 %v456_v59, 0.0  ;;  %v458_v8 = vadd.f32 %v829_v49, %v266_v61  ;;  %584 = vst.msk [vmem:[%s1547_s4 + $0x140] sm:$0xff] %vm543_vm0, %v519_v0  ;;  %v836_v13 = vunpack.c.l.bf16 %v923_v63  ;;  %v709_v14 = vunpack.c.h.bf16 %v892_v54 }
  0x46   :  { %v268_v11 = vadd.f32 %v977_v7, %v197_v2  ;;  %v198_v12 = vmul.f32 %v708_v4, %v963_v1  ;;  %v521_v16 = vmax.f32 %v457_v6, 0.0  ;;  %v459_v18 = vadd.f32 %v832_v57, %v267_v9  ;;  %v927_v57 = vld [vmem:[%s1546_s3 + $0xd8] sm:$0xff]   ;;  %v928_v9 = vld [vmem:[%s1546_s3 + $0xe0] sm:$0xff]  }
  0x47   :  { %585 = vst.msk [vmem:[%s1547_s4 + $0x148] sm:$0xff] %vm543_vm0, %v520_v5  ;;  %v522_v17 = vmax.f32 %v458_v8, 0.0  ;;  %v837_v19 = vunpack.c.h.bf16 %v923_v63  ;;  %v199_v22 = vmul.f32 %v709_v14, %v963_v1  ;;  %v712_v23 = vunpack.c.l.bf16 %v893_v10 }
  0x48   :  { %v460_v20 = vadd.f32 %v833_v3, %v268_v11  ;;  %v269_v21 = vadd.f32 %v977_v7, %v198_v12  ;;  %586 = vst.msk [vmem:[%s1547_s4 + $0x150] sm:$0xff] %vm543_vm0, %v521_v16  ;;  %v523_v26 = vmax.f32 %v459_v18, 0.0  ;;  %v840_v27 = vunpack.c.l.bf16 %v924_v15  ;;  %v897_v3 = vld [vmem:[%s1543_s0 + $0xe0] sm:$0xff]   ;;  %v898_v18 = vld [vmem:[%s1543_s0 + $0xe8] sm:$0xff]  }
  0x49   :  { %587 = vst.msk [vmem:[%s1547_s4 + $0x158] sm:$0xff] %vm543_vm0, %v522_v17  ;;  %v713_v28 = vunpack.c.h.bf16 %v893_v10  ;;  %v841_v29 = vunpack.c.h.bf16 %v924_v15  ;;  %v270_v32 = vadd.f32 %v977_v7, %v199_v22  ;;  %v200_v33 = vmul.f32 %v712_v23, %v963_v1 }
  0x4a   :  { %v524_v30 = vmax.f32 %v460_v20, 0.0  ;;  %v461_v31 = vadd.f32 %v836_v13, %v269_v21  ;;  %588 = vst.msk [vmem:[%s1547_s4 + $0x160] sm:$0xff] %vm543_vm0, %v523_v26  ;;  %v716_v36 = vunpack.c.l.bf16 %v894_v24  ;;  %v844_v37 = vunpack.c.l.bf16 %v925_v25 }
  0x4b   :  { %v201_v35 = vmul.f32 %v713_v28, %v963_v1  ;;  %v717_v38 = vunpack.c.h.bf16 %v894_v24  ;;  %v462_v41 = vadd.f32 %v837_v19, %v270_v32  ;;  %v271_v42 = vadd.f32 %v977_v7, %v200_v33  ;;  %v929_v19 = vld [vmem:[%s1546_s3 + $0xe8] sm:$0xff]   ;;  %v899_v28 = vld [vmem:[%s1543_s0 + $0xf0] sm:$0xff]  }
  0x4c   :  { %589 = vst.msk [vmem:[%s1547_s4 + $0x168] sm:$0xff] %vm543_vm0, %v524_v30  ;;  %v525_v40 = vmax.f32 %v461_v31, 0.0  ;;  %v845_v43 = vunpack.c.h.bf16 %v925_v25  ;;  %v202_v45 = vmul.f32 %v716_v36, %v963_v1  ;;  %v720_v47 = vunpack.c.l.bf16 %v895_v34  ;;  %v930_v33 = vld [vmem:[%s1546_s3 + $0xf0] sm:$0xff]  }
  0x4d   :  { %v272_v44 = vadd.f32 %v977_v7, %v201_v35  ;;  %v203_v46 = vmul.f32 %v717_v38, %v963_v1  ;;  %v526_v49 = vmax.f32 %v462_v41, 0.0  ;;  %v463_v50 = vadd.f32 %v840_v27, %v271_v42  ;;  %v900_v42 = vld [vmem:[%s1543_s0 + $0xf8] sm:$0xff]  }
  0x4e   :  { %590 = vst.msk [vmem:[%s1547_s4 + $0x170] sm:$0xff] %vm543_vm0, %v525_v40  ;;  %v848_v51 = vunpack.c.l.bf16 %v926_v39  ;;  %v721_v52 = vunpack.c.h.bf16 %v895_v34  ;;  %v273_v54 = vadd.f32 %v977_v7, %v202_v45  ;;  %v204_v56 = vmul.f32 %v720_v47, %v963_v1 }
  0x4f   :  { %v464_v53 = vadd.f32 %v841_v29, %v272_v44  ;;  %v274_v55 = vadd.f32 %v977_v7, %v203_v46  ;;  %591 = vst.msk [vmem:[%s1547_s4 + $0x178] sm:$0xff] %vm543_vm0, %v526_v49  ;;  %v527_v58 = vmax.f32 %v463_v50, 0.0  ;;  %v849_v60 = vunpack.c.h.bf16 %v926_v39 }
  0x50   :  { %v205_v59 = vmul.f32 %v721_v52, %v963_v1  ;;  %v724_v61 = vunpack.c.l.bf16 %v896_v48  ;;  %v465_v63 = vadd.f32 %v844_v37, %v273_v54  ;;  %v275_v2 = vadd.f32 %v977_v7, %v204_v56 }
  0x51   :  { %v528_v62 = vmax.f32 %v464_v53, 0.0  ;;  %v466_v0 = vadd.f32 %v845_v43, %v274_v55  ;;  %592 = vst.msk [vmem:[%s1547_s4 + $0x180] sm:$0xff] %vm543_vm0, %v527_v58  ;;  %v852_v6 = vunpack.c.l.bf16 %v927_v57  ;;  %v725_v8 = vunpack.c.h.bf16 %v896_v48 }
  0x52   :  { %v276_v4 = vadd.f32 %v977_v7, %v205_v59  ;;  %v206_v5 = vmul.f32 %v724_v61, %v963_v1  ;;  %v529_v10 = vmax.f32 %v465_v63, 0.0  ;;  %v467_v12 = vadd.f32 %v848_v51, %v275_v2  ;;  %v931_v51 = vld [vmem:[%s1546_s3 + $0xf8] sm:$0xff]  }
  0x53   :  { %593 = vst.msk [vmem:[%s1547_s4 + $0x188] sm:$0xff] %vm543_vm0, %v528_v62  ;;  %v530_v11 = vmax.f32 %v466_v0, 0.0  ;;  %v853_v13 = vunpack.c.h.bf16 %v927_v57  ;;  %v207_v16 = vmul.f32 %v725_v8, %v963_v1  ;;  %v728_v17 = vunpack.c.l.bf16 %v897_v3 }
  0x54   :  { %v468_v14 = vadd.f32 %v849_v60, %v276_v4  ;;  %v277_v15 = vadd.f32 %v977_v7, %v206_v5  ;;  %594 = vst.msk [vmem:[%s1547_s4 + $0x190] sm:$0xff] %vm543_vm0, %v529_v10  ;;  %v531_v20 = vmax.f32 %v467_v12, 0.0  ;;  %v856_v21 = vunpack.c.l.bf16 %v928_v9 }
  0x55   :  { %595 = vst.msk [vmem:[%s1547_s4 + $0x198] sm:$0xff] %vm543_vm0, %v530_v11  ;;  %v729_v22 = vunpack.c.h.bf16 %v897_v3  ;;  %v857_v23 = vunpack.c.h.bf16 %v928_v9  ;;  %v278_v26 = vadd.f32 %v977_v7, %v207_v16  ;;  %v208_v27 = vmul.f32 %v728_v17, %v963_v1 }
  0x56   :  { %v532_v24 = vmax.f32 %v468_v14, 0.0  ;;  %v469_v25 = vadd.f32 %v852_v6, %v277_v15  ;;  %596 = vst.msk [vmem:[%s1547_s4 + $0x1a0] sm:$0xff] %vm543_vm0, %v531_v20  ;;  %v732_v30 = vunpack.c.l.bf16 %v898_v18  ;;  %v860_v31 = vunpack.c.l.bf16 %v929_v19 }
  0x57   :  { %v209_v29 = vmul.f32 %v729_v22, %v963_v1  ;;  %v733_v32 = vunpack.c.h.bf16 %v898_v18  ;;  %v470_v35 = vadd.f32 %v853_v13, %v278_v26  ;;  %v279_v36 = vadd.f32 %v977_v7, %v208_v27 }
  0x58   :  { %597 = vst.msk [vmem:[%s1547_s4 + $0x1a8] sm:$0xff] %vm543_vm0, %v532_v24  ;;  %v533_v34 = vmax.f32 %v469_v25, 0.0  ;;  %v861_v37 = vunpack.c.h.bf16 %v929_v19  ;;  %v210_v39 = vmul.f32 %v732_v30, %v963_v1  ;;  %v736_v41 = vunpack.c.l.bf16 %v899_v28 }
  0x59   :  { %v280_v38 = vadd.f32 %v977_v7, %v209_v29  ;;  %v211_v40 = vmul.f32 %v733_v32, %v963_v1  ;;  %v534_v43 = vmax.f32 %v470_v35, 0.0  ;;  %v471_v44 = vadd.f32 %v856_v21, %v279_v36 }
  0x5a   :  { %598 = vst.msk [vmem:[%s1547_s4 + $0x1b0] sm:$0xff] %vm543_vm0, %v533_v34  ;;  %v864_v45 = vunpack.c.l.bf16 %v930_v33  ;;  %v737_v46 = vunpack.c.h.bf16 %v899_v28  ;;  %v281_v48 = vadd.f32 %v977_v7, %v210_v39  ;;  %v212_v50 = vmul.f32 %v736_v41, %v963_v1 }
  0x5b   :  { %v472_v47 = vadd.f32 %v857_v23, %v280_v38  ;;  %v282_v49 = vadd.f32 %v977_v7, %v211_v40  ;;  %599 = vst.msk [vmem:[%s1547_s4 + $0x1b8] sm:$0xff] %vm543_vm0, %v534_v43  ;;  %v535_v52 = vmax.f32 %v471_v44, 0.0  ;;  %v865_v54 = vunpack.c.h.bf16 %v930_v33 }
  0x5c   :  { %v213_v53 = vmul.f32 %v737_v46, %v963_v1  ;;  %v740_v55 = vunpack.c.l.bf16 %v900_v42  ;;  %v473_v57 = vadd.f32 %v860_v31, %v281_v48  ;;  %v283_v59 = vadd.f32 %v977_v7, %v212_v50 }
  0x5d   :  { %v536_v56 = vmax.f32 %v472_v47, 0.0  ;;  %v474_v58 = vadd.f32 %v861_v37, %v282_v49  ;;  %600 = vst.msk [vmem:[%s1547_s4 + $0x1c0] sm:$0xff] %vm543_vm0, %v535_v52  ;;  %v868_v62 = vunpack.c.l.bf16 %v931_v51  ;;  %v741_v63 = vunpack.c.h.bf16 %v900_v42 }
  0x5e   :  { %v284_v60 = vadd.f32 %v977_v7, %v213_v53  ;;  %v214_v61 = vmul.f32 %v740_v55, %v963_v1  ;;  %v537_v0 = vmax.f32 %v473_v57, 0.0  ;;  %v475_v3 = vadd.f32 %v864_v45, %v283_v59 }
  0x5f   :  { %601 = vst.msk [vmem:[%s1547_s4 + $0x1c8] sm:$0xff] %vm543_vm0, %v536_v56  ;;  %v538_v2 = vmax.f32 %v474_v58, 0.0  ;;  %v215_v6 = vmul.f32 %v741_v63, %v963_v1  ;;  %v869_v8 = vunpack.c.h.bf16 %v931_v51 }
  0x60   :  { %v476_v4 = vadd.f32 %v865_v54, %v284_v60  ;;  %v285_v5 = vadd.f32 %v977_v7, %v214_v61  ;;  %602 = vst.msk [vmem:[%s1547_s4 + $0x1d0] sm:$0xff] %vm543_vm0, %v537_v0  ;;  %v539_v9 = vmax.f32 %v475_v3, 0.0 }
  0x61   :  { %603 = vst.msk [vmem:[%s1547_s4 + $0x1d8] sm:$0xff] %vm543_vm0, %v538_v2  ;;  %v286_v12 = vadd.f32 %v977_v7, %v215_v6 }
  0x62   :  { %v540_v10 = vmax.f32 %v476_v4, 0.0  ;;  %v477_v11 = vadd.f32 %v868_v62, %v285_v5  ;;  %604 = vst.msk [vmem:[%s1547_s4 + $0x1e0] sm:$0xff] %vm543_vm0, %v539_v9 }
  0x63   :  { %v478_v13 = vadd.f32 %v869_v8, %v286_v12 }
  0x64   :  { %605 = vst.msk [vmem:[%s1547_s4 + $0x1e8] sm:$0xff] %vm543_vm0, %v540_v10  ;;  %v541_v1 = vmax.f32 %v477_v11, 0.0 }
  0x65   :  { %v542_v14 = vmax.f32 %v478_v13, 0.0 }
  0x66   :  { %606 = vst.msk [vmem:[%s1547_s4 + $0x1f0] sm:$0xff] %vm543_vm0, %v541_v1 }
  0x67   :  { %607 = vst.msk [vmem:[%s1547_s4 + $0x1f8] sm:$0xff] %vm543_vm0, %v542_v14 }

// kernel: bottleneck_forward.5
= control target key start
LH: loop header
LB: loop body
LE: loop exit
PB: predicated region body
PF: predicated region fallthrough
CT: control target
= control target key end

     0   :  { %s3653_s24 = smov 0   ;;  %s3655_s25 = smov 0   ;;  %s4447_s0 = inlined_call_operand.vmem [shape: bf16[2,16,16,4], index: 0, kind: input, shape index: {}, may-alias: {0,1,2}]   ;;  %s4448_s1 = inlined_call_operand.vmem [shape: bf16[2,16,16,4], index: 1, kind: input, shape index: {}, may-alias: {0,1,2}]   ;;  %s4449_s2 = inlined_call_operand.vmem [shape: bf16[2,16,16,4], index: 2, kind: input, shape index: {}, may-alias: {0,1,2}]   ;;  %s4450_s3 = inlined_call_operand.vmem [shape: f32[1,4], index: 3, kind: input, shape index: {}]   ;;  %s4451_s4 = inlined_call_operand.vmem [shape: f32[1,4], index: 4, kind: input, shape index: {}]   ;;  %s4452_s5 = inlined_call_operand.vmem [shape: bf16[3,3,4,4], index: 5, kind: input, shape index: {}]   ;;  %s4453_s6 = inlined_call_operand.vmem [shape: bf16[2,16,16,4], index: 6, kind: output, shape index: {0}]   ;;  %s4454_s7 = inlined_call_operand.vmem [shape: f32[32,4], index: 7, kind: output, shape index: {1}]  }
   0x1   :  { %s3657_s26 = smov 0   ;;  %s3659_s27 = smov 0  }
   0x2   :  { %s3661_s28 = smov 0  }
   0x3 LB: > { %s27_s29 = sadd.s32 1, %s3603_s26  ;;  %s30_s30 = sadd.s32 1, %s3607_s27  ;;  %s3611_s28 = sphi %s3661_s28, %s18_s28   ;;  %s3607_s27 = sphi %s3659_s27, %s4469_s27   ;;  %s3603_s26 = sphi %s3657_s26, %s4468_s26   ;;  %s3599_s25 = sphi %s3655_s25, %s4467_s25   ;;  %s3595_s24 = sphi %s3653_s24, %s4466_s24  }
   0x4   : > { %p28_p0 = scmp.ge.s32.totalorder %s27_s29, 2  ;;  %p2878_p1 = scmp.ge.s32.totalorder %s3611_s28, 1 }
   0x5   : > { %p326_p2 = scmp.lt.s32.totalorder %s3611_s28, 5 }
   0x6   : > { %s4471_s29 = smov (%p28_p0, %s27_s29), 0  ;;  %s4473_s30 = smov (!%p28_p0, %s30_s30), %s3607_s27 }
   0x7   : > { %p327_p3 = pnand %p2878_p1, %p326_p2  ;;  %p32_p4 = scmp.ge.s32.totalorder %s4473_s30, 2 }
   0x8   : > { %vm1041_vm0 = vcmask (!%p327_p3), 1041408   ;;  %v2985_v0 = vld [vmem:[%s4452_s5 + $0x8] sm:$0x3] (!%p327_p3)  ;;  %s2879_s10 = sshll.u32 (!%p327_p3), %s3595_s24, 3  ;;  %p401_p5 = scmp.lt.s32.totalorder (!%p327_p3), %s3599_s25, 1  ;;  %vm693_vm1 = vcmask (!%p327_p3), 27651  }
   0x9   : > { %s4475_s30 = smov (%p32_p4, %s4473_s30), 0  ;;  %330 = sbr.rel (%p327_p3) target bundleno = 443 (0x1bb), region = 44 }
   0xa   : > { %3521 = vmatprep.subr.msk.bf16.mxu0 (!%p327_p3), %vm1041_vm0, %v2985_v0  ;;  %v3694_v1 = vsel (!%p327_p3), %vm1041_vm0, %v2985_v0, 0  ;;  %p403_p6 = scmp.lt.s32.totalorder (!%p327_p3), %s2879_s10, 15  ;;  %v2931_v2 = vld [vmem:[%s4452_s5 + $0x6] sm:$0x3] (!%p327_p3)  ;;  %vm694_vm2 = vsmask.f32 (!%p327_p3), 7950 }
   0xb   : > { %3298 = vmatpush3.bf16.msra.mxu0 (!%p327_p3), %v3694_v1  ;;  %3517 = vmatprep.subr.msk.bf16.mxu1 (!%p327_p3), %vm1041_vm0, %v2931_v2  ;;  %v1043_v3 = vsel (!%p327_p3), %vm1041_vm0, %v2931_v2, 0  ;;  %v699_v4 = vld [vmem:[#allocation2 + $0x18] sm:$0x8] (!%p327_p3)  ;;  %vm3705_vm3 = vmand (!%p327_p3), %vm693_vm1, %vm694_vm2  ;;  %s2883_s15 = sadd.s32 (!%p327_p3), 4294967295, %s3595_s24  ;;  %v967_v7 = vld [vmem:[%s4452_s5] sm:$0x3] (!%p327_p3) }
   0xc   : > { %3226 = vmatpush3.bf16.msra.mxu1 (!%p327_p3), %v1043_v3  ;;  %v700_v6 = vsel (!%p327_p3), %vm3705_vm3, 0, %v699_v4  ;;  %v2995_v8 = vld [vmem:[%s4452_s5 + $0xe] sm:$0x3] (!%p327_p3)  ;;  %v705_v10 = vld [vmem:[#allocation2 + $0x40] sm:$0x8] (!%p327_p3)  ;;  %p3730_p7 = scmp.gt.s32.totalorder (!%p327_p3), %s2883_s15, 0 }
   0xd   : > { %701 = vst [vmem:[#allocation2 + $0x18] sm:$0x8] (!%p327_p3), %v700_v6  ;;  %3518 = vmatprep.subr.msk.bf16.mxu1 (!%p327_p3), %vm1041_vm0, %v967_v7  ;;  %3523 = vmatprep.subr.msk.bf16.mxu0 (!%p327_p3), %vm1041_vm0, %v2995_v8  ;;  %v702_v9 = vld [vmem:[#allocation2 + $0x2c] sm:$0x8] (!%p327_p3)  ;;  %v706_v12 = vsel (!%p327_p3), %vm3705_vm3, 0, %v705_v10  ;;  %v3747_v15 = vsel (!%p327_p3), %vm1041_vm0, %v967_v7, 0 }
   0xe   : > { %v703_v11 = vsel (!%p327_p3), %vm3705_vm3, 0, %v702_v9  ;;  %v708_v13 = vld [vmem:[#allocation2 + $0x54] sm:$0x8] (!%p327_p3)  ;;  %v3744_v14 = vld [vmem:[%s4450_s3] ss:$0 sm:$0xff] (!%p327_p3)  ;;  %vm624_vm4 = vcmask (!%p327_p3), 27648  }
   0xf   : > { %704 = vst [vmem:[#allocation2 + $0x2c] sm:$0x8] (!%p327_p3), %v703_v11  ;;  %707 = vst [vmem:[#allocation2 + $0x40] sm:$0x8] (!%p327_p3), %v706_v12  ;;  %v709_v16 = vsel (!%p327_p3), %vm3705_vm3, 0, %v708_v13  ;;  %v3755_v21 = vsel (!%p327_p3), %vm1041_vm0, %v2995_v8, 0 }
  0x10   : > { %s402_s11 = scalar_select %p401_p5, %s3599_s25, 1  ;;  %v711_v17 = vld [vmem:[#allocation2 + $0x68] sm:$0x8]  ;;  %710 = vst [vmem:[#allocation2 + $0x54] sm:$0x8] %v709_v16  ;;  %vm1016_vm5 = vcmask 31744  }
  0x11   : > { %s4477_s10 = smov (!%p403_p6, %s2879_s10), 15  ;;  %v712_v22 = vsel %vm3705_vm3, 0, %v711_v17  ;;  %s4479_s15 = smov (!%p3730_p7, %s2883_s15), 0  ;;  %v3767_v28 = vld [vmem:[%s4451_s4] ss:$0 sm:$0xff]  ;;  %vm726_vm9 = vcmask 24576  }
  0x12   : > { %s3703_s14 = sshll.u32 %s402_s11, 5  ;;  %s2880_s16 = sshll.u32 %s4477_s10, 1  ;;  %713 = vst [vmem:[#allocation2 + $0x68] sm:$0x8] %v712_v22  ;;  %vm727_vm6 = vsmask.f32 256 }
  0x13   : > { %s3719_s21 = sadd.s32 %s3703_s14, %s2880_s16  ;;  %s2884_s17 = sshll.u32 %s4479_s15, 3  ;;  %vm789_vm7 = vsmask.f32 4368  ;;  %vm4082_vm10 = vmand %vm726_vm9, %vm727_vm6  ;;  %vm1858_vm11 = vsmask.f32 3328 }
  0x14   : > { %s2882_s22 = sshll.u32 %s3719_s21, 2  ;;  %p417_p8 = scmp.lt.s32.totalorder %s2884_s17, 15  ;;  %v762_v37 = vld [vmem:[#allocation2 + $0x18] sm:$0x8]  ;;  %vm3883_vm8 = vmor %vm727_vm6, %vm789_vm7  ;;  %vm1859_vm12 = vsmask.f32 7440 }
  0x15   : > { %s3739_s10 = scalar_lea.vmem %s4447_s0, %s2882_s22  ;;  %v814_v46 = vshrl.u32 %v762_v37, 16  ;;  %s428_s15 = sadd.s32 1, %s3595_s24  ;;  %vm4132_vm13 = vmor %vm1858_vm11, %vm1859_vm12 }
  0x16   : > { %v3097_v18 = vld [vmem:[%s3739_s10] sm:$0xff]   ;;  %v3136_v19 = vld [vmem:[%s3739_s10 + $0x8] sm:$0xff]   ;;  %v3137_v20 = vld [vmem:[%s3739_s10 + $0x10] sm:$0xff]   ;;  %s4481_s17 = smov (!%p417_p8, %s2884_s17), 15  ;;  %p3792_p9 = scmp.lt.s32.totalorder %s428_s15, 1 }
  0x17   : > { %v3098_v23 = vunpack.c.l.bf16 %v3097_v18  ;;  %v3099_v24 = vunpack.c.h.bf16 %v3097_v18  ;;  %v3102_v25 = vunpack.c.l.bf16 %v3136_v19  ;;  %v3103_v26 = vunpack.c.h.bf16 %v3136_v19  ;;  %v3138_v27 = vld [vmem:[%s3739_s10 + $0x18] sm:$0xff]   ;;  %v765_v47 = vld [vmem:[#allocation2 + $0x2c] sm:$0x8]  ;;  %v768_v55 = vld [vmem:[#allocation2 + $0x40] sm:$0x8]  ;;  %s2885_s18 = sshll.u32 %s4481_s17, 1 }
  0x18   : > { %v3106_v29 = vunpack.c.l.bf16 %v3137_v20  ;;  %v3107_v30 = vunpack.c.h.bf16 %v3137_v20  ;;  %v3110_v31 = vunpack.c.l.bf16 %v3138_v27  ;;  %v3111_v32 = vunpack.c.h.bf16 %v3138_v27  ;;  %v771_v59 = vld [vmem:[#allocation2 + $0x54] sm:$0x8]  ;;  %v3139_v60 = vld [vmem:[%s3739_s10 + $0x20] sm:$0xff]   ;;  %v3140_v2 = vld [vmem:[%s3739_s10 + $0x28] sm:$0xff]   ;;  %s421_s20 = sadd.s32 %s2885_s18, %s3703_s14  ;;  %s4483_s15 = smov (!%p3792_p9, %s428_s15), 1 }
  0x19   : > { %v505_v33 = vmul.f32 %v3098_v23, %v3744_v14  ;;  %v506_v34 = vmul.f32 %v3099_v24, %v3744_v14  ;;  %v507_v35 = vmul.f32 %v3102_v25, %v3744_v14  ;;  %v508_v36 = vmul.f32 %v3103_v26, %v3744_v14  ;;  %v3799_v8 = vld [vmem:[#allocation2 + $0x68] sm:$0x8]  ;;  %s2887_s23 = sshll.u32 %s421_s20, 2  ;;  %v714_v19 = vld [vmem:[#allocation2 + $0x7c] sm:$0x8]  ;;  %v3141_v20 = vld [vmem:[%s3739_s10 + $0x30] sm:$0xff]  }
  0x1a   : > { %v509_v38 = vmul.f32 %v3106_v29, %v3744_v14  ;;  %v510_v39 = vmul.f32 %v3107_v30, %v3744_v14  ;;  %v511_v40 = vmul.f32 %v3110_v31, %v3744_v14  ;;  %v512_v41 = vmul.f32 %v3111_v32, %v3744_v14  ;;  %s423_s11 = scalar_lea.vmem %s4448_s1, %s2887_s23  ;;  %v717_v26 = vld [vmem:[#allocation2 + $0x90] sm:$0x8]  ;;  %v3828_v32 = vld [vmem:[%s3739_s10 + $0x38] sm:$0xff]   ;;  %s2888_s12 = sshll.u32 %s4483_s15, 3 }
  0x1b   : > { %v527_v42 = vadd.f32 %v3767_v28, %v505_v33  ;;  %v528_v43 = vadd.f32 %v3767_v28, %v506_v34  ;;  %v529_v44 = vadd.f32 %v3767_v28, %v507_v35  ;;  %v530_v45 = vadd.f32 %v3767_v28, %v508_v36  ;;  %v3837_v37 = vld [vmem:[%s423_s11 + $0x38] sm:$0xff]   ;;  %p3849_p10 = scmp.lt.s32.totalorder %s2888_s12, 15  ;;  %p641_p11 = scmp.eq.s32.totalorder %s3595_s24, 0 }
  0x1c   : > { %v531_v48 = vadd.f32 %v3767_v28, %v509_v38  ;;  %v532_v49 = vadd.f32 %v3767_v28, %v510_v39  ;;  %v533_v50 = vadd.f32 %v3767_v28, %v511_v40  ;;  %v836_v56 = vshrl.u32 %v765_v47, 16  ;;  %p667_p12 = scmp.eq.s32.totalorder %s3595_s24, 1  ;;  %s4360_s23 = scalar_lea.vmem %s4453_s6, %s2882_s22 }
  0x1d   : > { %v543_v51 = vmax.f32 %v527_v42, 0.0  ;;  %v544_v52 = vmax.f32 %v528_v43, 0.0  ;;  %v545_v53 = vmax.f32 %v529_v44, 0.0  ;;  %v546_v54 = vmax.f32 %v530_v45, 0.0  ;;  %s4485_s12 = smov (!%p3849_p10, %s2888_s12), 15  ;;  %s2896_s21 = sshll.u32 %s3599_s25, 1 }
  0x1e   : > { %v547_v57 = vmax.f32 %v531_v48, 0.0  ;;  %v548_v58 = vmax.f32 %v532_v49, 0.0  ;;  %v3796_v3 = vrot.slane %v814_v46, 11  ;;  %v534_v7 = vadd.f32 %v3767_v28, %v512_v41  ;;  %s2889_s17 = sshll.u32 %s4485_s12, 1  ;;  %s457_s22 = sadd.s32 %s3595_s24, %s2896_s21 }
  0x1f   : > { %v3060_v61 = vpack.c.bf16 %v543_v51, %v543_v51  ;;  %v3061_v62 = vpack.c.bf16 %v544_v52, %v544_v52  ;;  %v3062_v63 = vpack.c.bf16 %v545_v53, %v545_v53  ;;  %v3063_v0 = vpack.c.bf16 %v546_v54, %v546_v54  ;;  %s3915_s15 = sadd.s32 %s2889_s17, %s3703_s14  ;;  %p458_p13 = scmp.lt.s32.totalorder %s457_s22, 3 }
  0x20   : > { %v3064_v4 = vpack.c.bf16 %v547_v57, %v547_v57  ;;  %v3065_v6 = vpack.c.bf16 %v548_v58, %v548_v58  ;;  %v549_v9 = vmax.f32 %v533_v50, 0.0  ;;  %v858_v10 = vshrl.u32 %v768_v55, 16  ;;  %s2891_s14 = sshll.u32 %s3915_s15, 2 }
  0x21   : > { %625 = vst.msk [vmem:[#allocation2 + $0x1c] sm:$0xf] %vm624_vm4, %v3060_v61  ;;  %626 = vst.msk [vmem:[#allocation2 + $0x20] sm:$0xf] %vm624_vm4, %v3061_v62  ;;  %v880_v11 = vshrl.u32 %v771_v59, 16  ;;  %v3114_v12 = vunpack.c.l.bf16 %v3139_v60  ;;  %v3806_v13 = vrot.slane %v836_v56, 11  ;;  %v3115_v17 = vunpack.c.h.bf16 %v3139_v60  ;;  %s440_s8 = scalar_lea.vmem %s4449_s2, %s2891_s14 }
  0x22   : > { %627 = vst.msk [vmem:[#allocation2 + $0x30] sm:$0xf] %vm624_vm4, %v3062_v63  ;;  %628 = vst.msk [vmem:[#allocation2 + $0x34] sm:$0xf] %vm624_vm4, %v3063_v0  ;;  %v550_v16 = vmax.f32 %v534_v7, 0.0  ;;  %v3118_v18 = vunpack.c.l.bf16 %v3140_v2  ;;  %v3066_v22 = vpack.c.bf16 %v549_v9, %v549_v9  ;;  %v3814_v23 = vrot.slane %v858_v10, 11 }
  0x23   : > { %629 = vst.msk [vmem:[#allocation2 + $0x44] sm:$0xf] %vm624_vm4, %v3064_v4  ;;  %630 = vst.msk [vmem:[#allocation2 + $0x48] sm:$0xf] %vm624_vm4, %v3065_v6  ;;  %v513_v24 = vmul.f32 %v3114_v12, %v3744_v14  ;;  %v902_v25 = vshrl.u32 %v3799_v8, 16  ;;  %v3824_v29 = vrot.slane %v880_v11, 11  ;;  %v514_v30 = vmul.f32 %v3115_v17, %v3744_v14 }
  0x24   : > { %v3067_v27 = vpack.c.bf16 %v550_v16, %v550_v16  ;;  %v3119_v31 = vunpack.c.h.bf16 %v3140_v2  ;;  %631 = vst.msk [vmem:[#allocation2 + $0x58] sm:$0xf] %vm624_vm4, %v3066_v22  ;;  %v515_v34 = vmul.f32 %v3118_v18, %v3744_v14  ;;  %v715_v35 = vsel %vm3705_vm3, 0, %v714_v19  ;;  %v3890_v16 = vld [vmem:[%s4452_s5 + $0x4] sm:$0x3]  ;;  %s4487_s22 = smov (!%p458_p13, %s457_s22), 3 }
  0x25   : > { %v3832_v33 = vadd.f32 %v3767_v28, %v513_v24  ;;  %v3122_v36 = vunpack.c.l.bf16 %v3141_v20  ;;  %v3842_v38 = vadd.f32 %v3767_v28, %v514_v30  ;;  %716 = vst [vmem:[#allocation2 + $0x7c] sm:$0x8] %v715_v35  ;;  %v3123_v40 = vunpack.c.h.bf16 %v3141_v20  ;;  %s3984_s9 = scalar_select %p641_p11, 0.0, 1.0 }
  0x26   : > { %632 = vst.msk [vmem:[#allocation2 + $0x5c] sm:$0xf] %vm624_vm4, %v3067_v27  ;;  %v516_v39 = vmul.f32 %v3119_v31, %v3744_v14  ;;  %v718_v41 = vsel %vm3705_vm3, 0, %v717_v26  ;;  %v3855_v43 = vadd.f32 %v3767_v28, %v515_v34  ;;  %v3126_v45 = vunpack.c.l.bf16 %v3828_v32  ;;  %s4074_s10 = scalar_select %p667_p12, 0.0, 1.0 }
  0x27   : > { %v551_v42 = vmax.f32 %v3832_v33, 0.0  ;;  %v3858_v44 = vmul.f32 %v3122_v36, %v3744_v14  ;;  %719 = vst [vmem:[#allocation2 + $0x90] sm:$0x8] %v718_v41  ;;  %v3865_v50 = vmul.f32 %v3123_v40, %v3744_v14  ;;  %v3127_v51 = vunpack.c.h.bf16 %v3828_v32  ;;  %s2897_s25 = sshll.u32 %s4487_s22, 3 }
  0x28   : > { %v763_v46 = vld [vmem:[#allocation2 + $0x1c] sm:$0xf]  ;;  %v764_v47 = vld [vmem:[#allocation2 + $0x20] sm:$0xf]  ;;  %v3862_v49 = vadd.f32 %v3767_v28, %v516_v39  ;;  %v3130_v52 = vunpack.c.l.bf16 %v3837_v37 }
  0x29   : > { %v766_v48 = vld [vmem:[#allocation2 + $0x30] sm:$0xf]  ;;  %v819_v53 = vshrl.u32 %v763_v46, 16  ;;  %v822_v54 = vshll.u32 %v763_v46, 16  ;;  %v828_v55 = vshrl.u32 %v764_v47, 16  ;;  %v831_v56 = vshll.u32 %v764_v47, 16 }
  0x2a   : > { %v767_v57 = vld [vmem:[#allocation2 + $0x34] sm:$0xf]  ;;  %v3869_v58 = vcombine.low %v763_v46, %v764_v47  ;;  %v841_v59 = vshrl.u32 %v766_v48, 16  ;;  %v844_v60 = vshll.u32 %v766_v48, 16  ;;  %v769_v62 = vld [vmem:[#allocation2 + $0x44] sm:$0xf]  ;;  %v648_v8 = vmul.f32 %v3130_v52, %v3744_v14 }
  0x2b   : > { %v850_v61 = vshrl.u32 %v767_v57, 16  ;;  %v821_v63 = vrot.slane %v819_v53, 7  ;;  %v830_v0 = vrot.slane %v828_v55, 7  ;;  %v853_v2 = vshll.u32 %v767_v57, 16  ;;  %v770_v6 = vld [vmem:[#allocation2 + $0x48] sm:$0xf] }
  0x2c   : > { %v3877_v4 = vcombine.low %v766_v48, %v767_v57  ;;  %3299 = vmatprep.mubr.msk.bf16.mxu0 %vm1016_vm5, %v3869_v58  ;;  %v843_v7 = vrot.slane %v841_v59, 7  ;;  %v863_v11 = vshrl.u32 %v769_v62, 16  ;;  %v866_v12 = vshll.u32 %v769_v62, 16  ;;  %v772_v22 = vld [vmem:[#allocation2 + $0x58] sm:$0xf] }
  0x2d   : > { %v852_v9 = vrot.slane %v850_v61, 7  ;;  %v824_v17 = vor.u32 %v822_v54, %v821_v63  ;;  %v826_v18 = vrot.slane %v821_v63, 4  ;;  %v833_v19 = vor.u32 %v831_v56, %v830_v0  ;;  %v773_v31 = vld [vmem:[#allocation2 + $0x5c] sm:$0xf]  ;;  %v3926_v57 = vld [vmem:[%s4452_s5 + $0xc] sm:$0x3] }
  0x2e   : > { %3300 = vmatmul.mubr.msk.bf16.vlgmr.msra.gmra.mrb[0].mxu0 %vm1016_vm5, %v3877_v4  ;;  %v872_v20 = vshrl.u32 %v770_v6, 16  ;;  %v846_v24 = vor.u32 %v844_v60, %v843_v7  ;;  %v848_v26 = vrot.slane %v843_v7, 4  ;;  %v865_v30 = vrot.slane %v863_v11, 7  ;;  %v777_v7 = vld [vmem:[#allocation2 + $0x7c] sm:$0x8] }
  0x2f   : > { %v855_v27 = vor.u32 %v853_v2, %v852_v9  ;;  %3316 = vmatpush3.bf16.msra.mxu0 %v3755_v21  ;;  %v825_v34 = vsel %vm3883_vm8, %v3796_v3, %v824_v17  ;;  %v834_v35 = vsel %vm3883_vm8, %v826_v18, %v833_v19  ;;  %v875_v39 = vshll.u32 %v770_v6, 16 }
  0x30   : > { %v874_v36 = vrot.slane %v872_v20, 7  ;;  %3524 = vmatprep.subr.msk.bf16.mxu0 %vm1041_vm0, %v3890_v16  ;;  %v3903_v40 = vcombine.low %v825_v34, %v834_v35  ;;  %v847_v21 = vsel %vm3883_vm8, %v3806_v13, %v846_v24  ;;  %v3910_v46 = vcombine.low %v769_v62, %v770_v6 }
  0x31   : > { %v856_v41 = vsel %vm3883_vm8, %v848_v26, %v855_v27  ;;  %v885_v47 = vshrl.u32 %v772_v22, 16  ;;  %v888_v48 = vshll.u32 %v772_v22, 16  ;;  %v894_v53 = vshrl.u32 %v773_v31, 16  ;;  %v696_v26 = vld [vmem:[#allocation2 + $0x4] sm:$0x8] }
  0x32   : > { %v3912_v3 = vcombine.low %v847_v21, %v856_v41  ;;  %3227 = vmatprep.mubr.msk.bf16.mxu1 %vm1016_vm5, %v3903_v40  ;;  %3303 = vmatprep.mubr.msk.bf16.mxu0 %vm1016_vm5, %v3910_v46  ;;  %v897_v54 = vshll.u32 %v773_v31, 16  ;;  %v3921_v13 = vcombine.low %v772_v22, %v773_v31  ;;  %v868_v55 = vor.u32 %v866_v12, %v865_v30  ;;  %v720_v12 = vld [vmem:[#allocation2 + $0xa4] sm:$0x8] }
  0x33   : > { %v870_v56 = vrot.slane %v865_v30, 4  ;;  %v887_v59 = vrot.slane %v885_v47, 7  ;;  %v896_v60 = vrot.slane %v894_v53, 7  ;;  %v877_v61 = vor.u32 %v875_v39, %v874_v36  ;;  %v3992_v36 = vld [vmem:[%s440_s8] sm:$0xff]  }
  0x34   : > { %3228 = vmatmul.mubr.msk.bf16.vlgmr.msra.gmra.mrb[0].mxu1 %vm1016_vm5, %v3912_v3  ;;  %v552_v62 = vmax.f32 %v3842_v38, 0.0  ;;  %v869_v63 = vsel %vm3883_vm8, %v3814_v23, %v868_v55  ;;  %v3068_v0 = vpack.c.bf16 %v551_v42, %v551_v42  ;;  %v553_v2 = vmax.f32 %v3855_v43, 0.0 }
  0x35   : > { %3244 = vmatpush3.bf16.msra.mxu1 %v3747_v15  ;;  %v554_v6 = vmax.f32 %v3862_v49, 0.0  ;;  %v878_v15 = vsel %vm3883_vm8, %v870_v56, %v877_v61  ;;  %v890_v38 = vor.u32 %v888_v48, %v887_v59  ;;  %v892_v9 = vrot.slane %v887_v59, 4  ;;  %v780_v49 = vld [vmem:[#allocation2 + $0x90] sm:$0x8]  ;;  %v4008_v48 = vld [vmem:[%s4452_s5 + $0xa] sm:$0x3] }
  0x36   : > { %3304 = vmatmul.mubr.msk.bf16.gmra.mrb[4].mxu0 %vm1016_vm5, %v3921_v13  ;;  %v899_v11 = vor.u32 %v897_v54, %v896_v60  ;;  %3519 = vmatprep.subr.msk.bf16.mxu1 %vm1041_vm0, %v3926_v57  ;;  %v3948_v23 = vcombine.low %v869_v63, %v878_v15  ;;  %v3069_v33 = vpack.c.bf16 %v552_v62, %v552_v62  ;;  %v924_v19 = vshrl.u32 %v777_v7, 16 }
  0x37   : > { %3317 = vmatprep.mubr.msk.bf16.mxu0 %vm1016_vm5, %v3877_v4  ;;  %633 = vst.msk [vmem:[#allocation2 + $0x6c] sm:$0xf] %vm624_vm4, %v3068_v0  ;;  %v3070_v42 = vpack.c.bf16 %v553_v2, %v553_v2  ;;  %v3071_v43 = vpack.c.bf16 %v554_v6, %v554_v6  ;;  %v891_v17 = vsel %vm3883_vm8, %v3824_v29, %v890_v38  ;;  %v2104_v29 = vsel %vm1041_vm0, %v3890_v16, 0 }
  0x38   : > { %v900_v18 = vsel %vm3883_vm8, %v892_v9, %v899_v11  ;;  %v539_v20 = vadd.f32 %v3767_v28, %v3858_v44  ;;  %3231 = vmatprep.mubr.msk.bf16.mxu1 %vm1016_vm5, %v3948_v23  ;;  %634 = vst.msk [vmem:[#allocation2 + $0x70] sm:$0xf] %vm624_vm4, %v3069_v33  ;;  %v540_v44 = vadd.f32 %v3767_v28, %v3865_v50  ;;  %v946_v30 = vshrl.u32 %v780_v49, 16 }
  0x39   : > { %v3965_v22 = vcombine.low %v891_v17, %v900_v18  ;;  %635 = vst.msk [vmem:[#allocation2 + $0x80] sm:$0xf] %vm624_vm4, %v3070_v42  ;;  %636 = vst.msk [vmem:[#allocation2 + $0x84] sm:$0xf] %vm624_vm4, %v3071_v43  ;;  %v519_v24 = vmul.f32 %v3126_v45, %v3744_v14  ;;  %v520_v31 = vmul.f32 %v3127_v51, %v3744_v14  ;;  %v721_v34 = vsel %vm3705_vm3, 0, %v720_v12 }
  0x3a   : > { %v555_v27 = vmax.f32 %v539_v20, 0.0  ;;  %v3988_v50 = vrot.slane %v902_v25, 11  ;;  %v556_v16 = vmax.f32 %v540_v44, 0.0  ;;  %722 = vst [vmem:[#allocation2 + $0xa4] sm:$0x8] %v721_v34  ;;  %v3131_v35 = vunpack.c.h.bf16 %v3837_v37 }
  0x3b   : > { %v541_v45 = vadd.f32 %v3767_v28, %v519_v24  ;;  %v3996_v32 = vrot.slane %v924_v19, 11  ;;  %v542_v39 = vadd.f32 %v3767_v28, %v520_v31  ;;  %v697_v47 = vsel %vm3705_vm3, 0, %v696_v26 }
  0x3c   : > { %3232 = vmatmul.mubr.msk.bf16.gmra.mrb[4].mxu1 %vm1016_vm5, %v3965_v22  ;;  %v3072_v51 = vpack.c.bf16 %v555_v27, %v555_v27  ;;  %v3073_v25 = vpack.c.bf16 %v556_v16, %v556_v16  ;;  %v649_v41 = vmul.f32 %v3131_v35, %v3744_v14  ;;  %v4013_v37 = vrot.slane %v946_v30, 11  ;;  %698 = vst [vmem:[#allocation2 + $0x4] sm:$0x8] %v697_v47 }
  0x3d   : > { %v557_v21 = vmax.f32 %v541_v45, 0.0  ;;  %v558_v52 = vmax.f32 %v542_v39, 0.0  ;;  %v654_v54 = vstv %s3984_s9  ;;  %v3134_v55 = vunpack.c.l.bf16 %v3992_v36  ;;  %s461_s9 = scalar_lea.vmem %s4454_s7, %s2897_s25 }
  0x3e   : > { %3318 = vmatmul.mubr.msk.bf16.vlgmr.msra.gmra.mrb[0].mxu0 %vm1016_vm5, %v3910_v46  ;;  %v775_v53 = vld [vmem:[#allocation2 + $0x6c] sm:$0xf]  ;;  %637 = vst.msk [vmem:[#allocation2 + $0x94] sm:$0xf] %vm624_vm4, %v3072_v51  ;;  %638 = vst.msk [vmem:[#allocation2 + $0x98] sm:$0xf] %vm624_vm4, %v3073_v25  ;;  %v4021_v61 = vadd.f32 %v3767_v28, %v648_v8  ;;  %v4024_v6 = vadd.f32 %v3767_v28, %v649_v41  ;;  %v3135_v7 = vunpack.c.h.bf16 %v3992_v36 }
  0x3f   : > { %v907_v56 = vshrl.u32 %v775_v53, 16  ;;  %v910_v59 = vshll.u32 %v775_v53, 16  ;;  %3321 = vmatprep.mubr.msk.bf16.mxu0 %vm1016_vm5, %v3921_v13  ;;  %3334 = vmatpush3.bf16.msra.mxu0 %v2104_v29  ;;  %v3074_v60 = vpack.c.bf16 %v557_v21, %v557_v21  ;;  %v776_v62 = vld [vmem:[#allocation2 + $0x70] sm:$0xf]  ;;  %v3075_v2 = vpack.c.bf16 %v558_v52, %v558_v52  ;;  %v735_v36 = vld [vmem:[#allocation2 + $0x38] sm:$0x1] }
  0x40   : > { %v778_v63 = vld [vmem:[#allocation2 + $0x80] sm:$0xf]  ;;  %v779_v0 = vld [vmem:[#allocation2 + $0x84] sm:$0xf]  ;;  %v4028_v15 = vmul.f32 %v3134_v55, %v3744_v14  ;;  %3525 = vmatprep.subr.msk.bf16.mxu0 %vm1041_vm0, %v4008_v48  ;;  %v916_v9 = vshrl.u32 %v776_v62, 16  ;;  %v919_v11 = vshll.u32 %v776_v62, 16  ;;  %v4033_v12 = vcombine.low %v775_v53, %v776_v62 }
  0x41   : > { %v909_v38 = vrot.slane %v907_v56, 7  ;;  %v929_v33 = vshrl.u32 %v778_v63, 16  ;;  %639 = vst.msk [vmem:[#allocation2 + $0xa8] sm:$0xf] %vm624_vm4, %v3074_v60  ;;  %v932_v42 = vshll.u32 %v778_v63, 16  ;;  %v938_v43 = vshrl.u32 %v779_v0, 16 }
  0x42   : > { %v941_v49 = vshll.u32 %v779_v0, 16  ;;  %640 = vst.msk [vmem:[#allocation2 + $0xac] sm:$0xf] %vm624_vm4, %v3075_v2  ;;  %v783_v17 = vld [vmem:[#allocation2 + $0xa4] sm:$0x8]  ;;  %v918_v20 = vrot.slane %v916_v9, 7  ;;  %v4036_v26 = vcombine.low %v778_v63, %v779_v0 }
  0x43   : > { %v912_v18 = vor.u32 %v910_v59, %v909_v38  ;;  %v914_v19 = vrot.slane %v909_v38, 4  ;;  %v931_v29 = vrot.slane %v929_v33, 7  ;;  %v940_v44 = vrot.slane %v938_v43, 7 }
  0x44   : > { %v969_v24 = vshrl.u32 %v783_v17, 16  ;;  %v652_v27 = vmax.f32 %v4021_v61, 0.0  ;;  %v921_v31 = vor.u32 %v919_v11, %v918_v20 }
  0x45   : > { %v913_v30 = vsel %vm3883_vm8, %v3988_v50, %v912_v18  ;;  %v934_v34 = vor.u32 %v932_v42, %v931_v29  ;;  %v936_v16 = vrot.slane %v931_v29, 4  ;;  %v781_v45 = vld [vmem:[#allocation2 + $0x94] sm:$0xf]  ;;  %v943_v35 = vor.u32 %v941_v49, %v940_v44  ;;  %v782_v51 = vld [vmem:[#allocation2 + $0x98] sm:$0xf] }
  0x46   : > { %3322 = vmatmul.mubr.msk.bf16.gmra.mrb[4].mxu0 %vm1016_vm5, %v4033_v12  ;;  %v951_v39 = vshrl.u32 %v781_v45, 16  ;;  %v954_v8 = vshll.u32 %v781_v45, 16  ;;  %v2930_v25 = vrot.slane %v969_v24, 11  ;;  %v922_v21 = vsel %vm3883_vm8, %v914_v19, %v921_v31  ;;  %v3572_v24 = vld [vmem:[%s4452_s5 + $0x8] sm:$0x3] }
  0x47   : > { %v935_v50 = vsel %vm3883_vm8, %v3996_v32, %v934_v34  ;;  %v960_v41 = vshrl.u32 %v782_v51, 16  ;;  %v963_v47 = vshll.u32 %v782_v51, 16  ;;  %3325 = vmatprep.mubr.msk.bf16.mxu0 %vm1016_vm5, %v4036_v26  ;;  %v4051_v53 = vcombine.low %v913_v30, %v922_v21  ;;  %v732_v34 = vld [vmem:[#allocation2 + $0x24] sm:$0x1] }
  0x48   : > { %v944_v52 = vsel %vm3883_vm8, %v936_v16, %v943_v35  ;;  %v953_v55 = vrot.slane %v951_v39, 7  ;;  %v784_v56 = vld [vmem:[#allocation2 + $0xa8] sm:$0xf]  ;;  %v4055_v59 = vcombine.low %v781_v45, %v782_v51  ;;  %v653_v42 = vmax.f32 %v4024_v6, 0.0  ;;  %v759_v6 = vld [vmem:[#allocation2 + $0x4] sm:$0x8] }
  0x49   : > { %v4058_v60 = vcombine.low %v935_v50, %v944_v52  ;;  %v962_v61 = vrot.slane %v960_v41, 7  ;;  %v785_v32 = vld [vmem:[#allocation2 + $0xac] sm:$0xf]  ;;  %v974_v62 = vshrl.u32 %v784_v56, 16  ;;  %v977_v63 = vshll.u32 %v784_v56, 16  ;;  %3235 = vmatprep.mubr.msk.bf16.mxu1 %vm1016_vm5, %v4051_v53 }
  0x4a   : > { %v956_v0 = vor.u32 %v954_v8, %v953_v55  ;;  %v958_v2 = vrot.slane %v953_v55, 4  ;;  %v983_v38 = vshrl.u32 %v785_v32, 16  ;;  %v986_v9 = vshll.u32 %v785_v32, 16  ;;  %v1831_v51 = vld [vmem:[#allocation2 + $0x1c] sm:$0xf] }
  0x4b   : > { %3236 = vmatmul.mubr.msk.bf16.gmra.mrb[8].mxu1 %vm1016_vm5, %v4058_v60  ;;  %v965_v11 = vor.u32 %v963_v47, %v962_v61  ;;  %v976_v33 = vrot.slane %v974_v62, 7  ;;  %v655_v43 = vmul.f32 %v654_v54, %v652_v27  ;;  %v4070_v18 = vcombine.low %v784_v56, %v785_v32  ;;  %v1832_v39 = vld [vmem:[#allocation2 + $0x20] sm:$0xf] }
  0x4c   : > { %v957_v49 = vsel %vm3883_vm8, %v4013_v37, %v956_v0  ;;  %v985_v17 = vrot.slane %v983_v38, 7  ;;  %v656_v44 = vmul.f32 %v654_v54, %v653_v42  ;;  %v729_v37 = vld [vmem:[#allocation2 + $0x10] sm:$0x1]  ;;  %v674_v45 = vmul.f32 %v3135_v7, %v3744_v14 }
  0x4d   : > { %v966_v19 = vsel %vm3883_vm8, %v958_v2, %v965_v11  ;;  %v979_v20 = vor.u32 %v977_v63, %v976_v33  ;;  %v981_v29 = vrot.slane %v976_v33, 4  ;;  %v3076_v31 = vpack.c.bf16 %v655_v43, %v655_v43  ;;  %v1834_v14 = vld [vmem:[#allocation2 + $0x30] sm:$0xf] }
  0x4e   : > { %v4086_v27 = vcombine.low %v957_v49, %v966_v19  ;;  %v988_v30 = vor.u32 %v986_v9, %v985_v17  ;;  %3326 = vmatmul.mubr.msk.bf16.gmra.mrb[8].mxu0 %vm1016_vm5, %v4055_v59  ;;  %v3077_v16 = vpack.c.bf16 %v656_v44, %v656_v44  ;;  %v675_v35 = vadd.f32 %v3767_v28, %v4028_v15 }
  0x4f   : > { %v980_v54 = vsel %vm3883_vm8, %v2930_v25, %v979_v20  ;;  %3329 = vmatprep.mubr.msk.bf16.mxu0 %vm1016_vm5, %v4070_v18  ;;  %665 = vst.msk [vmem:[#allocation2 + $0x8] sm:$0xf] %vm624_vm4, %v3076_v31  ;;  %v792_v25 = vshrl.u32 %v759_v6, 16  ;;  %v679_v21 = vstv %s4074_s10  ;;  %v730_v50 = vsel %vm4082_vm10, 0, %v729_v37 }
  0x50   : > { %3239 = vmatprep.mubr.msk.bf16.mxu1 %vm1016_vm5, %v4086_v27  ;;  %v989_v8 = vsel %vm3883_vm8, %v981_v29, %v988_v30  ;;  %666 = vst.msk [vmem:[#allocation2 + $0xc] sm:$0xf] %vm624_vm4, %v3077_v16  ;;  %v676_v15 = vadd.f32 %v3767_v28, %v674_v45  ;;  %v677_v41 = vmax.f32 %v675_v35, 0.0  ;;  %731 = vst [vmem:[#allocation2 + $0x10] sm:$0x1] %v730_v50  ;;  %v733_v47 = vsel %vm4082_vm10, 0, %v732_v34 }
  0x51   : > { %v4107_v7 = vcombine.low %v980_v54, %v989_v8  ;;  %734 = vst [vmem:[#allocation2 + $0x24] sm:$0x1] %v733_v47  ;;  %v1886_v52 = vshrl.u32 %v1831_v51, 16  ;;  %v1889_v55 = vshll.u32 %v1831_v51, 16  ;;  %v1895_v56 = vshll.u32 %v1832_v39, 16 }
  0x52   : > { %v1899_v61 = vshrl.u32 %v1832_v39, 16  ;;  %v678_v32 = vmax.f32 %v676_v15, 0.0  ;;  %v680_v62 = vmul.f32 %v679_v21, %v677_v41  ;;  %v736_v63 = vsel %vm4082_vm10, 0, %v735_v36  ;;  %v1835_v50 = vld [vmem:[#allocation2 + $0x34] sm:$0xf] }
  0x53   : > { %3240 = vmatmul.mubr.msk.bf16.gmra.mrb[12].mxu1 %vm1016_vm5, %v4107_v7  ;;  %v1910_v0 = vshrl.u32 %v1834_v14, 16  ;;  %v1888_v28 = vrot.slane %v1886_v52, 4  ;;  %v1891_v2 = vrot.slane %v1889_v55, 5  ;;  %v4117_v38 = vrot.slane %v1895_v56, 5  ;;  %737 = vst [vmem:[#allocation2 + $0x38] sm:$0x1] %v736_v63 }
  0x54   : > { %v1901_v9 = vrot.slane %v1899_v61, 4  ;;  %v681_v11 = vmul.f32 %v679_v21, %v678_v32  ;;  %v3078_v33 = vpack.c.bf16 %v680_v62, %v680_v62  ;;  %v1913_v42 = vshll.u32 %v1834_v14, 16 }
  0x55   : > { %v2922_v43 = vrot.slane %v792_v25, 11  ;;  %v1892_v20 = vor.u32 %v1891_v2, %v1888_v28  ;;  %v1912_v29 = vrot.slane %v1910_v0, 4  ;;  %v1919_v28 = vshll.u32 %v1835_v50, 16 }
  0x56   : > { %v4119_v49 = vld [vmem:[#allocation2 + $0x8] sm:$0xf]  ;;  %v3079_v17 = vpack.c.bf16 %v681_v11, %v681_v11  ;;  %691 = vst.msk [vmem:[#allocation2 + $0xbc] sm:$0xf] %vm624_vm4, %v3078_v33  ;;  %v1915_v44 = vrot.slane %v1913_v42, 5  ;;  %v1902_v34 = vor.u32 %v1901_v9, %v4117_v38 }
  0x57   : > { %v1828_v19 = vld [vmem:[#allocation2 + $0x8] sm:$0xf]  ;;  %v4122_v6 = vld [vmem:[#allocation2 + $0xc] sm:$0xf]  ;;  %v797_v37 = vshrl.u32 %v4119_v49, 16  ;;  %v800_v30 = vshll.u32 %v4119_v49, 16 }
  0x58   : > { %v1829_v31 = vld [vmem:[#allocation2 + $0xc] sm:$0xf]  ;;  %v806_v54 = vshrl.u32 %v4122_v6, 16  ;;  %v809_v16 = vshll.u32 %v4122_v6, 16  ;;  %692 = vst.msk [vmem:[#allocation2 + $0xc0] sm:$0xf] %vm624_vm4, %v3079_v17 }
  0x59   : > { %v1830_v45 = vld [vmem:[#allocation2 + $0x10] sm:$0x1]  ;;  %v1862_v35 = vshrl.u32 %v1828_v19, 16  ;;  %v1865_v51 = vshll.u32 %v1828_v19, 16  ;;  %v799_v39 = vrot.slane %v797_v37, 7  ;;  %v1871_v8 = vshll.u32 %v1829_v31, 16 }
  0x5a   : > { %v1875_v25 = vshrl.u32 %v1829_v31, 16  ;;  %v1881_v21 = vshll.u32 %v1830_v45, 16  ;;  %v808_v36 = vrot.slane %v806_v54, 7  ;;  %v1833_v41 = vld [vmem:[#allocation2 + $0x24] sm:$0x1]  ;;  %v1893_v47 = vrot.slane %v1892_v20, 4 }
  0x5b   : > { %v1864_v14 = vrot.slane %v1862_v35, 4  ;;  %v1867_v15 = vrot.slane %v1865_v51, 5  ;;  %v802_v52 = vor.u32 %v800_v30, %v799_v39  ;;  %v804_v55 = vrot.slane %v799_v39, 4  ;;  %v738_v45 = vld [vmem:[#allocation2 + $0x4c] sm:$0x1] }
  0x5c   : > { %v1873_v61 = vrot.slane %v1871_v8, 5  ;;  %v1877_v32 = vrot.slane %v1875_v25, 4  ;;  %v811_v62 = vor.u32 %v809_v16, %v808_v36  ;;  %v1883_v0 = vrot.slane %v1881_v21, 5  ;;  %v1836_v51 = vld [vmem:[#allocation2 + $0x38] sm:$0x1] }
  0x5d   : > { %v1868_v63 = vor.u32 %v1867_v15, %v1864_v14  ;;  %v803_v2 = vsel %vm3883_vm8, %v2922_v43, %v802_v52  ;;  %v4138_v9 = vld [vmem:[#allocation2 + $0xbc] sm:$0xf]  ;;  %v1903_v33 = vrot.slane %v1902_v34, 4  ;;  %v1905_v42 = vshll.u32 %v1833_v41, 16  ;;  %v1837_v39 = vld [vmem:[#allocation2 + $0x44] sm:$0xf] }
  0x5e   : > { %v1878_v11 = vor.u32 %v1877_v32, %v1873_v61  ;;  %v812_v17 = vsel %vm3883_vm8, %v804_v55, %v811_v62  ;;  %v1898_v20 = vsel %vm4132_vm13, %v1893_v47, %v4117_v38  ;;  %v1923_v37 = vshrl.u32 %v1835_v50, 16  ;;  %v1838_v25 = vld [vmem:[#allocation2 + $0x48] sm:$0xf]  ;;  %v741_v15 = vld [vmem:[#allocation2 + $0x60] sm:$0x1] }
  0x5f   : > { %v1869_v19 = vrot.slane %v1868_v63, 4  ;;  %v2948_v30 = vcombine.low %v803_v2, %v812_v17  ;;  %v4145_v31 = vld [vmem:[#allocation2 + $0xc0] sm:$0xf]  ;;  %v1907_v16 = vrot.slane %v1905_v42, 5  ;;  %v1916_v43 = vor.u32 %v1915_v44, %v1912_v29  ;;  %v1840_v55 = vld [vmem:[#allocation2 + $0x58] sm:$0xf] }
  0x60   : > { %v1879_v54 = vrot.slane %v1878_v11, 4  ;;  %v1279_v34 = vsel %vm1041_vm0, %v3926_v57, 0  ;;  %v2996_v35 = vcombine.low %v4138_v9, %v4145_v31  ;;  %v4161_v57 = vld [vmem:[%s4452_s5 + $0x2] sm:$0x3]  ;;  %v1921_v36 = vrot.slane %v1919_v28, 5 }
  0x61   : > { %3245 = vmatprep.mubr.msk.bf16.mxu1 %vm1016_vm5, %v2948_v30  ;;  %v1874_v38 = vsel %vm4132_vm13, %v1869_v19, %v1873_v61  ;;  %v1908_v29 = vsel %vm4132_vm13, %v1903_v33, %v1907_v16  ;;  %v1917_v44 = vrot.slane %v1916_v43, 4  ;;  %v2252_v14 = vsel %vm1041_vm0, %v4008_v48, 0  ;;  %v1841_v63 = vld [vmem:[#allocation2 + $0x5c] sm:$0xf]  ;;  %v744_v33 = vld [vmem:[#allocation2 + $0x74] sm:$0x1] }
  0x62   : > { %v1884_v8 = vsel %vm4132_vm13, %v1879_v54, %v1883_v0  ;;  %3246 = vmatmul.mubr.msk.bf16.vlgmr.msra.gmra.mrb[0].mxu1 %vm1016_vm5, %v3903_v40  ;;  %3330 = vmatmul.mubr.msk.bf16.gmra.mrb[12].mxu0 %vm1016_vm5, %v2996_v35  ;;  %v4166_v50 = vcombine.low %v1898_v20, %v1908_v29  ;;  %v1925_v41 = vrot.slane %v1923_v37, 4  ;;  %v1929_v47 = vshll.u32 %v1836_v51, 16  ;;  %v1843_v43 = vld [vmem:[#allocation2 + $0x6c] sm:$0xf] }
  0x63   : > { %v3006_v21 = vcombine.low %v1874_v38, %v1884_v8  ;;  %3262 = vmatpush3.bf16.msra.mxu1 %v1279_v34  ;;  %3249 = vmatprep.mubr.msk.bf16.mxu1 %vm1016_vm5, %v3912_v3  ;;  %v739_v52 = vsel %vm4082_vm10, 0, %v738_v45  ;;  %v1934_v40 = vshrl.u32 %v1837_v39, 16  ;;  %v1922_v61 = vsel %vm4132_vm13, %v1917_v44, %v1921_v36 }
  0x64   : > { %740 = vst [vmem:[#allocation2 + $0x4c] sm:$0x1] %v739_v52  ;;  %v1937_v32 = vshll.u32 %v1837_v39, 16  ;;  %v1943_v48 = vshll.u32 %v1838_v25, 16  ;;  %v1947_v62 = vshrl.u32 %v1838_v25, 16  ;;  %3520 = vmatprep.subr.msk.bf16.mxu1 %vm1041_vm0, %v4161_v57  ;;  %v1926_v0 = vor.u32 %v1925_v41, %v1921_v36 }
  0x65   : > { %3335 = vmatprep.mubr.msk.bf16.mxu0 %vm1016_vm5, %v3006_v21  ;;  %v1931_v28 = vrot.slane %v1929_v47, 5  ;;  %v1936_v2 = vrot.slane %v1934_v40, 4  ;;  %v742_v11 = vsel %vm4082_vm10, 0, %v741_v15  ;;  %v1958_v20 = vshrl.u32 %v1840_v55, 16  ;;  %v1844_v39 = vld [vmem:[#allocation2 + $0x70] sm:$0xf] }
  0x66   : > { %v1939_v42 = vrot.slane %v1937_v32, 5  ;;  %v1945_v17 = vrot.slane %v1943_v48, 5  ;;  %v1949_v19 = vrot.slane %v1947_v62, 4  ;;  %743 = vst [vmem:[#allocation2 + $0x60] sm:$0x1] %v742_v11  ;;  %v1927_v37 = vrot.slane %v1926_v0, 4 }
  0x67   : > { %v1961_v30 = vshll.u32 %v1840_v55, 16  ;;  %v1967_v54 = vshll.u32 %v1841_v63, 16  ;;  %v1971_v16 = vshrl.u32 %v1841_v63, 16  ;;  %v1960_v35 = vrot.slane %v1958_v20, 4  ;;  %v4188_v25 = vld [vmem:[%s4452_s5 + $0x10] sm:$0x3] }
  0x68   : > { %v1940_v45 = vor.u32 %v1939_v42, %v1936_v2  ;;  %v1950_v34 = vor.u32 %v1949_v19, %v1945_v17  ;;  %v745_v51 = vsel %vm4082_vm10, 0, %v744_v33  ;;  %v1932_v38 = vsel %vm4132_vm13, %v1927_v37, %v1931_v28  ;;  %v747_v32 = vld [vmem:[#allocation2 + $0x88] sm:$0x1]  ;;  %v1846_v0 = vld [vmem:[#allocation2 + $0x80] sm:$0xf] }
  0x69   : > { %v1963_v8 = vrot.slane %v1961_v30, 5  ;;  %v1969_v29 = vrot.slane %v1967_v54, 5  ;;  %v1973_v44 = vrot.slane %v1971_v16, 4  ;;  %746 = vst [vmem:[#allocation2 + $0x74] sm:$0x1] %v745_v51  ;;  %v4194_v21 = vcombine.low %v1922_v61, %v1932_v38 }
  0x6a   : > { %3250 = vmatmul.mubr.msk.bf16.gmra.mrb[4].mxu1 %vm1016_vm5, %v3948_v23  ;;  %3336 = vmatmul.mubr.msk.bf16.vlgmr.msra.gmra.mrb[0].mxu0 %vm1016_vm5, %v4166_v50  ;;  %v1941_v36 = vrot.slane %v1940_v45, 4  ;;  %v1982_v15 = vshrl.u32 %v1843_v43, 16  ;;  %v1985_v40 = vshll.u32 %v1843_v43, 16  ;;  %v1991_v55 = vshll.u32 %v1844_v39, 16  ;;  %v1847_v43 = vld [vmem:[#allocation2 + $0x84] sm:$0xf] }
  0x6b   : > { %3253 = vmatprep.mubr.msk.bf16.mxu1 %vm1016_vm5, %v3965_v22  ;;  %3352 = vmatpush3.bf16.msra.mxu0 %v2252_v14  ;;  %v1839_v41 = vld [vmem:[#allocation2 + $0x4c] sm:$0x1]  ;;  %v1964_v47 = vor.u32 %v1963_v8, %v1960_v35  ;;  %v1974_v52 = vor.u32 %v1973_v44, %v1969_v29  ;;  %v1951_v48 = vrot.slane %v1950_v34, 4  ;;  %v1995_v61 = vshrl.u32 %v1844_v39, 16  ;;  %v750_v38 = vld [vmem:[#allocation2 + $0x9c] sm:$0x1] }
  0x6c   : > { %3339 = vmatprep.mubr.msk.bf16.mxu0 %vm1016_vm5, %v4194_v21  ;;  %v1953_v62 = vshll.u32 %v1839_v41, 16  ;;  %v1984_v63 = vrot.slane %v1982_v15, 4  ;;  %3526 = vmatprep.subr.msk.bf16.mxu0 %vm1041_vm0, %v4188_v25  ;;  %v1946_v14 = vsel %vm4132_vm13, %v1941_v36, %v1945_v17  ;;  %v1987_v11 = vrot.slane %v1985_v40, 5  ;;  %v1849_v15 = vld [vmem:[#allocation2 + $0x94] sm:$0xf] }
  0x6d   : > { %v1842_v28 = vld [vmem:[#allocation2 + $0x60] sm:$0x1]  ;;  %v1965_v2 = vrot.slane %v1964_v47, 4  ;;  %v1993_v33 = vrot.slane %v1991_v55, 5  ;;  %v1975_v19 = vrot.slane %v1974_v52, 4  ;;  %v1997_v37 = vrot.slane %v1995_v61, 4 }
  0x6e   : > { %v1955_v42 = vrot.slane %v1953_v62, 5  ;;  %v1977_v20 = vshll.u32 %v1842_v28, 16  ;;  %v1988_v54 = vor.u32 %v1987_v11, %v1984_v63  ;;  %v748_v16 = vsel %vm4082_vm10, 0, %v747_v32  ;;  %v1850_v55 = vld [vmem:[#allocation2 + $0x98] sm:$0xf] }
  0x6f   : > { %v1970_v30 = vsel %vm4132_vm13, %v1965_v2, %v1969_v29  ;;  %v2006_v45 = vshrl.u32 %v1846_v0, 16  ;;  %v1998_v51 = vor.u32 %v1997_v37, %v1993_v33  ;;  %749 = vst [vmem:[#allocation2 + $0x88] sm:$0x1] %v748_v16  ;;  %v2009_v39 = vshll.u32 %v1846_v0, 16 }
  0x70   : > { %v1956_v17 = vsel %vm4132_vm13, %v1951_v48, %v1955_v42  ;;  %v1979_v34 = vrot.slane %v1977_v20, 5  ;;  %v1845_v35 = vld [vmem:[#allocation2 + $0x74] sm:$0x1]  ;;  %v1989_v44 = vrot.slane %v1988_v54, 4  ;;  %v2015_v40 = vshll.u32 %v1847_v43, 16 }
  0x71   : > { %v4210_v8 = vcombine.low %v1946_v14, %v1956_v17  ;;  %v2001_v36 = vshll.u32 %v1845_v35, 16  ;;  %v2008_v29 = vrot.slane %v2006_v45, 4  ;;  %v1999_v47 = vrot.slane %v1998_v51, 4  ;;  %v723_v20 = vld [vmem:[#allocation2 + $0xb8] sm:$0x8] }
  0x72   : > { %3254 = vmatmul.mubr.msk.bf16.gmra.mrb[8].mxu1 %vm1016_vm5, %v4051_v53  ;;  %v1980_v41 = vsel %vm4132_vm13, %v1975_v19, %v1979_v34  ;;  %v2011_v52 = vrot.slane %v2009_v39, 5  ;;  %v1994_v48 = vsel %vm4132_vm13, %v1989_v44, %v1993_v33  ;;  %v2019_v63 = vshrl.u32 %v1847_v43, 16  ;;  %v753_v39 = vld [vmem:[#allocation2 + $0xb0] sm:$0x1] }
  0x73   : > { %3340 = vmatmul.mubr.msk.bf16.gmra.mrb[4].mxu0 %vm1016_vm5, %v4210_v8  ;;  %3257 = vmatprep.mubr.msk.bf16.mxu1 %vm1016_vm5, %v4058_v60  ;;  %v4220_v32 = vcombine.low %v1970_v30, %v1980_v41  ;;  %v2003_v62 = vrot.slane %v2001_v36, 5  ;;  %v2017_v0 = vrot.slane %v2015_v40, 5  ;;  %v751_v14 = vsel %vm4082_vm10, 0, %v750_v38 }
  0x74   : > { %v2012_v61 = vor.u32 %v2011_v52, %v2008_v29  ;;  %v2030_v28 = vshrl.u32 %v1849_v15, 16  ;;  %v2021_v11 = vrot.slane %v2019_v63, 4  ;;  %752 = vst [vmem:[#allocation2 + $0x9c] sm:$0x1] %v751_v14  ;;  %v2033_v42 = vshll.u32 %v1849_v15, 16 }
  0x75   : > { %3343 = vmatprep.mubr.msk.bf16.mxu0 %vm1016_vm5, %v4220_v32  ;;  %v2004_v2 = vsel %vm4132_vm13, %v1999_v47, %v2003_v62  ;;  %v2039_v19 = vshll.u32 %v1850_v55, 16  ;;  %v2043_v30 = vshrl.u32 %v1850_v55, 16  ;;  %v724_v51 = vsel %vm3705_vm3, 0, %v723_v20  ;;  %v756_v52 = vld [vmem:[#allocation2 + $0xc4] sm:$0x1] }
  0x76   : > { %v2013_v33 = vrot.slane %v2012_v61, 4  ;;  %v2032_v37 = vrot.slane %v2030_v28, 4  ;;  %v4230_v54 = vcombine.low %v1994_v48, %v2004_v2  ;;  %v1848_v16 = vld [vmem:[#allocation2 + $0x88] sm:$0x1]  ;;  %v2022_v43 = vor.u32 %v2021_v11, %v2017_v0  ;;  %725 = vst [vmem:[#allocation2 + $0xb8] sm:$0x8] %v724_v51 }
  0x77   : > { %v2035_v45 = vrot.slane %v2033_v42, 5  ;;  %v2041_v17 = vrot.slane %v2039_v19, 5  ;;  %v2025_v34 = vshll.u32 %v1848_v16, 16  ;;  %v2045_v35 = vrot.slane %v2043_v30, 4  ;;  %v1852_v19 = vld [vmem:[#allocation2 + $0xa8] sm:$0xf] }
  0x78   : > { %v2023_v38 = vrot.slane %v2022_v43, 4  ;;  %v2018_v36 = vsel %vm4132_vm13, %v2013_v33, %v2017_v0  ;;  %v2969_v41 = vcombine.low %v4119_v49, %v4122_v6  ;;  %v754_v47 = vsel %vm4082_vm10, 0, %v753_v39  ;;  %v1853_v20 = vld [vmem:[#allocation2 + $0xac] sm:$0xf]  ;;  %v1855_v49 = vld [vmem:[#allocation2 + $0xbc] sm:$0xf] }
  0x79   : > { %v2036_v44 = vor.u32 %v2035_v45, %v2032_v37  ;;  %v2027_v29 = vrot.slane %v2025_v34, 5  ;;  %v2046_v15 = vor.u32 %v2045_v35, %v2041_v17  ;;  %755 = vst [vmem:[#allocation2 + $0xb0] sm:$0x1] %v754_v47  ;;  %v757_v61 = vsel %vm4082_vm10, 0, %v756_v52  ;;  %v1856_v6 = vld [vmem:[#allocation2 + $0xc0] sm:$0xf] }
  0x7a   : > { %3258 = vmatmul.mubr.msk.bf16.gmra.mrb[12].mxu1 %vm1016_vm5, %v4086_v27  ;;  %758 = vst [vmem:[#allocation2 + $0xc4] sm:$0x1] %v757_v61  ;;  %v1461_v14 = vsel %vm1041_vm0, %v4161_v57, 0  ;;  %v1263_v57 = vshrl.u32 %v4145_v31, 16  ;;  %v1257_v42 = vshll.u32 %v4138_v9, 16  ;;  %v1266_v30 = vshll.u32 %v4145_v31, 16 }
  0x7b   : > { %3344 = vmatmul.mubr.msk.bf16.gmra.mrb[8].mxu0 %vm1016_vm5, %v4230_v54  ;;  %3263 = vmatprep.mubr.msk.bf16.mxu1 %vm1016_vm5, %v3912_v3  ;;  %v2037_v5 = vrot.slane %v2036_v44, 4  ;;  %v2028_v40 = vsel %vm4132_vm13, %v2023_v38, %v2027_v29  ;;  %v1851_v55 = vld [vmem:[#allocation2 + $0x9c] sm:$0x1]  ;;  %v2047_v62 = vrot.slane %v2046_v15, 4  ;;  %v2233_v16 = vshrl.u32 %v1853_v20, 16 }
  0x7c   : > { %v4248_v48 = vcombine.low %v2018_v36, %v2028_v40  ;;  %v2049_v63 = vshll.u32 %v1851_v55, 16  ;;  %v1265_v37 = vrot.slane %v1263_v57, 7 }
  0x7d   : > { %v2042_v3 = vsel %vm4132_vm13, %v2037_v5, %v2041_v17  ;;  %v786_v11 = vld [vmem:[#allocation2 + $0xb8] sm:$0x8] }
  0x7e   : > { %3347 = vmatprep.mubr.msk.bf16.mxu0 %vm1016_vm5, %v4248_v48  ;;  %v2051_v0 = vrot.slane %v2049_v63, 5  ;;  %v1268_v34 = vor.u32 %v1266_v30, %v1265_v37 }
  0x80   : > { %v2052_v28 = vsel %vm4132_vm13, %v2047_v62, %v2051_v0  ;;  %v1854_v39 = vld [vmem:[#allocation2 + $0xb0] sm:$0x1] }
  0x81   : > { %v4262_v2 = vcombine.low %v2042_v3, %v2052_v28  ;;  %v2239_v15 = vshll.u32 %v1854_v39, 16 }
  0x82   : > { %3264 = vmatmul.mubr.msk.bf16.vlgmr.msra.gmra.mrb[0].mxu1 %vm1016_vm5, %v3948_v23  ;;  %v1254_v23 = vshrl.u32 %v4138_v9, 16  ;;  %v2223_v9 = vshll.u32 %v1852_v19, 16 }
  0x83   : > { %3280 = vmatpush3.bf16.msra.mxu1 %v1461_v14  ;;  %3267 = vmatprep.mubr.msk.bf16.mxu1 %vm1016_vm5, %v3965_v22  ;;  %v2400_v22 = vsel %vm1041_vm0, %v4188_v25, 0  ;;  %v2229_v25 = vshll.u32 %v1853_v20, 16  ;;  %v2241_v52 = vrot.slane %v2239_v15, 5 }
  0x84   : > { %3348 = vmatmul.mubr.msk.bf16.gmra.mrb[12].mxu0 %vm1016_vm5, %v4262_v2  ;;  %3522 = vmatprep.subr.msk.bf16.mxu1 %vm1041_vm0, %v3572_v24  ;;  %v1256_v33 = vrot.slane %v1254_v23, 7  ;;  %v2225_v35 = vrot.slane %v2223_v9, 5 }
  0x85   : > { %3353 = vmatprep.mubr.msk.bf16.mxu0 %vm1016_vm5, %v4166_v50  ;;  %v1249_v50 = vshrl.u32 %v786_v11, 16  ;;  %v2231_v51 = vrot.slane %v2229_v25, 5 }
  0x86   : > { %v1259_v45 = vor.u32 %v1257_v42, %v1256_v33  ;;  %v1261_v17 = vrot.slane %v1256_v33, 4 }
  0x87   : > { %v2957_v43 = vrot.slane %v1249_v50, 11 }
  0x88   : > { %v1269_v44 = vsel %vm3883_vm8, %v1261_v17, %v1268_v34 }
  0x89   : > { %v1260_v38 = vsel %vm3883_vm8, %v2957_v43, %v1259_v45 }
  0x8a   : > { %3268 = vmatmul.mubr.msk.bf16.gmra.mrb[4].mxu1 %vm1016_vm5, %v4051_v53  ;;  %v2220_v53 = vshrl.u32 %v1852_v19, 16 }
  0x8b   : > { %3271 = vmatprep.mubr.msk.bf16.mxu1 %vm1016_vm5, %v4058_v60  ;;  %v2235_v60 = vrot.slane %v2233_v16, 4 }
  0x8c   : > { %3354 = vmatmul.mubr.msk.bf16.vlgmr.msra.gmra.mrb[0].mxu0 %vm1016_vm5, %v4194_v21  ;;  %v2222_v31 = vrot.slane %v2220_v53, 4 }
  0x8d   : > { %3357 = vmatprep.mubr.msk.bf16.mxu0 %vm1016_vm5, %v4210_v8  ;;  %3370 = vmatpush3.bf16.msra.mxu0 %v2400_v22  ;;  %v2236_v29 = vor.u32 %v2235_v60, %v2231_v51 }
  0x8e   : > { %v2226_v36 = vor.u32 %v2225_v35, %v2222_v31 }
  0x8f   : > { %v2237_v47 = vrot.slane %v2236_v29, 4 }
  0x90   : > { %v2227_v5 = vrot.slane %v2226_v36, 4 }
  0x92   : > { %3272 = vmatmul.mubr.msk.bf16.gmra.mrb[8].mxu1 %vm1016_vm5, %v4086_v27  ;;  %v2959_v27 = vcombine.low %v1260_v38, %v1269_v44  ;;  %v2232_v10 = vsel %vm4132_vm13, %v2227_v5, %v2231_v51 }
  0x93   : > { %3275 = vmatprep.mubr.msk.bf16.mxu1 %vm1016_vm5, %v4107_v7  ;;  %v2242_v7 = vsel %vm4132_vm13, %v2237_v47, %v2241_v52 }
  0x94   : > { %3358 = vmatmul.mubr.msk.bf16.gmra.mrb[4].mxu0 %vm1016_vm5, %v4220_v32  ;;  %v3023_v40 = vcombine.low %v2232_v10, %v2242_v7 }
  0x95   : > { %3361 = vmatprep.mubr.msk.bf16.mxu0 %vm1016_vm5, %v4230_v54 }
  0x9a   : > { %3276 = vmatmul.mubr.msk.bf16.gmra.mrb[12].mxu1 %vm1016_vm5, %v2959_v27 }
  0x9b   : > { %3281 = vmatprep.mubr.msk.bf16.mxu1 %vm1016_vm5, %v2969_v41  ;;  %v2381_v41 = vshrl.u32 %v1856_v6, 16 }
  0x9c   : > { %3362 = vmatmul.mubr.msk.bf16.gmra.mrb[8].mxu0 %vm1016_vm5, %v4248_v48 }
  0x9d   : > { %3365 = vmatprep.mubr.msk.bf16.mxu0 %vm1016_vm5, %v4262_v2  ;;  %v2383_v63 = vrot.slane %v2381_v41, 4 }
  0xa2   : > { %3282 = vmatmul.mubr.msk.bf16.vlgmr.msra.gmra.mrb[0].mxu1 %vm1016_vm5, %v3869_v58  ;;  %v2371_v58 = vshll.u32 %v1855_v49, 16 }
  0xa3   : > { %3388 = vmatpush3.bf16.msra.mxu1 %v3694_v1  ;;  %3285 = vmatprep.mubr.msk.bf16.mxu1 %vm1016_vm5, %v3877_v4  ;;  %v2368_v1 = vshrl.u32 %v1855_v49, 16  ;;  %v2377_v4 = vshll.u32 %v1856_v6, 16 }
  0xa4   : > { %3366 = vmatmul.mubr.msk.bf16.gmra.mrb[12].mxu0 %vm1016_vm5, %v3023_v40 }
  0xa5   : > { %3371 = vmatprep.mubr.msk.bf16.mxu0 %vm1016_vm5, %v4194_v21  ;;  %v2370_v55 = vrot.slane %v2368_v1, 4  ;;  %v2373_v21 = vrot.slane %v2371_v58, 5  ;;  %v2379_v62 = vrot.slane %v2377_v4, 5 }
  0xaa   : > { %3286 = vmatmul.mubr.msk.bf16.gmra.mrb[4].mxu1 %vm1016_vm5, %v3910_v46  ;;  %v1857_v46 = vld [vmem:[#allocation2 + $0xc4] sm:$0x1] }
  0xab   : > { %3289 = vmatprep.mubr.msk.bf16.mxu1 %vm1016_vm5, %v3921_v13  ;;  %v2374_v13 = vor.u32 %v2373_v21, %v2370_v55 }
  0xac   : > { %3372 = vmatmul.mubr.msk.bf16.vlgmr.msra.gmra.mrb[0].mxu0 %vm1016_vm5, %v4210_v8  ;;  %v2384_v8 = vor.u32 %v2383_v63, %v2379_v62 }
  0xad   : > { %3375 = vmatprep.mubr.msk.bf16.mxu0 %vm1016_vm5, %v4220_v32  ;;  %v2387_v32 = vshll.u32 %v1857_v46, 16  ;;  %v2375_v61 = vrot.slane %v2374_v13, 4 }
  0xae   : > { %v2385_v3 = vrot.slane %v2384_v8, 4 }
  0xaf   : > { %v2389_v0 = vrot.slane %v2387_v32, 5 }
  0xb2   : > { %3290 = vmatmul.mubr.msk.bf16.gmra.mrb[8].mxu1 %vm1016_vm5, %v4033_v12 }
  0xb3   : > { %3293 = vmatprep.mubr.msk.bf16.mxu1 %vm1016_vm5, %v4036_v26 }
  0xb4   : > { %3376 = vmatmul.mubr.msk.bf16.gmra.mrb[4].mxu0 %vm1016_vm5, %v4230_v54  ;;  %v2380_v54 = vsel %vm4132_vm13, %v2375_v61, %v2379_v62 }
  0xb5   : > { %3379 = vmatprep.mubr.msk.bf16.mxu0 %vm1016_vm5, %v4248_v48  ;;  %v2390_v48 = vsel %vm4132_vm13, %v2385_v3, %v2389_v0 }
  0xb6   : > { %v3033_v14 = vcombine.low %v2380_v54, %v2390_v48 }
  0xba   : > { %3294 = vmatmul.mubr.msk.bf16.gmra.mrb[12].mxu1 %vm1016_vm5, %v4055_v59 }
  0xbb   : > { %3307 = vmatprep.mubr.msk.bf16.mxu1 %vm1016_vm5, %v4033_v12 }
  0xbc   : > { %3380 = vmatmul.mubr.msk.bf16.gmra.mrb[8].mxu0 %vm1016_vm5, %v4262_v2 }
  0xbd   : > { %3383 = vmatprep.mubr.msk.bf16.mxu0 %vm1016_vm5, %v3023_v40 }
  0xc2   : > { %3308 = vmatmul.mubr.msk.bf16.vlgmr.msra.gmra.mrb[8].mxu1 %vm1016_vm5, %v4036_v26 }
  0xc3   : > { %3311 = vmatprep.mubr.msk.bf16.mxu1 %vm1016_vm5, %v4055_v59 }
  0xc4   : > { %3384 = vmatmul.mubr.msk.bf16.gmra.mrb[12].mxu0 %vm1016_vm5, %v3033_v14 }
  0xca   : > { %3312 = vmatmul.mubr.msk.bf16.gmra.mrb[12].mxu1 %vm1016_vm5, %v4070_v18 }
 0x175   : > { %v3283_v12 = vpop.f32.mrb[0].mxu1 }
 0x176   : > { %v1497_v28 = vpop.f32.mrb[1].mxu1 }
 0x177   : > { %v3284_v2 = vpop.f32.mrb[2].mxu1 }
 0x178   : > { %v1500_v24 = vpop.f32.mrb[3].mxu1 }
 0x17d   : > { %v3287_v23 = vpop.f32.mrb[4].mxu1 }
 0x17e   : > { %v1513_v56 = vpop.f32.mrb[5].mxu1 }
 0x17f   : > { %v3373_v57 = vpop.f32.mrb[0].mxu0  ;;  %v3288_v11 = vpop.f32.mrb[6].mxu1 }
 0x180   : > { %v3389_v42 = vadd.f32 %v3373_v57, %v3283_v12  ;;  %v2436_v22 = vpop.f32.mrb[1].mxu0  ;;  %v1516_v19 = vpop.f32.mrb[7].mxu1 }
 0x181   : > { %v3390_v26 = vadd.f32 %v2436_v22, %v1497_v28  ;;  %v3374_v59 = vpop.f32.mrb[2].mxu0 }
 0x182   : > { %v3082_v18 = vpack.c.bf16 %v3389_v42, %v3389_v42  ;;  %v3391_v20 = vadd.f32 %v3374_v59, %v3284_v2  ;;  %v2439_v33 = vpop.f32.mrb[3].mxu0  ;;  %v2634_v53 = vmul.f32 %v3389_v42, %v3389_v42  ;;  %v2598_v31 = vsel %vm1016_vm5, %v3389_v42, 0.0 }
 0x183   : > { %v3080_v37 = vpack.c.bf16 %v3390_v26, %v3390_v26  ;;  %v2632_v30 = vmul.f32 %v3390_v26, %v3390_v26  ;;  %v3392_v50 = vadd.f32 %v2439_v33, %v1500_v24  ;;  %v2595_v25 = vsel %vm1016_vm5, %v3390_v26, 0.0 }
 0x184   : > { %2581 = vst.msk [vmem:[%s4360_s23 + $0x8] sm:$0xf] %vm624_vm4, %v3082_v18  ;;  %v3083_v9 = vpack.c.bf16 %v3391_v20, %v3391_v20  ;;  %v2635_v17 = vmul.f32 %v3391_v20, %v3391_v20  ;;  %v2651_v29 = vsel %vm1016_vm5, %v2634_v53, 0.0  ;;  %v2600_v5 = vsel %vm1016_vm5, %v3391_v20, 0.0 }
 0x185   : > { %2579 = vst.msk [vmem:[%s4360_s23] sm:$0xf] %vm624_vm4, %v3080_v37  ;;  %v3081_v16 = vpack.c.bf16 %v3392_v50, %v3392_v50  ;;  %v2596_v43 = vsel %vm1016_vm5, %v3392_v50, 0.0  ;;  %v2633_v45 = vmul.f32 %v3392_v50, %v3392_v50  ;;  %v2648_v35 = vsel %vm1016_vm5, %v2632_v30, 0.0 }
 0x186   : > { %2582 = vst.msk [vmem:[%s4360_s23 + $0xc] sm:$0xf] %vm624_vm4, %v3083_v9  ;;  %v2597_v34 = vadd.f32 %v2596_v43, %v2595_v25  ;;  %v2653_v47 = vsel %vm1016_vm5, %v2635_v17, 0.0 }
 0x187   : > { %2580 = vst.msk [vmem:[%s4360_s23 + $0x4] sm:$0xf] %vm624_vm4, %v3081_v16  ;;  %v2649_v51 = vsel %vm1016_vm5, %v2633_v45, 0.0  ;;  %v3377_v60 = vpop.f32.mrb[4].mxu0 }
 0x188   : > { %v2599_v39 = vadd.f32 %v2598_v31, %v2597_v34  ;;  %v2650_v38 = vadd.f32 %v2649_v51, %v2648_v35  ;;  %v3393_v44 = vadd.f32 %v3377_v60, %v3287_v23  ;;  %v2452_v36 = vpop.f32.mrb[5].mxu0 }
 0x189   : > { %v3394_v15 = vadd.f32 %v2452_v36, %v1513_v56  ;;  %v3378_v27 = vpop.f32.mrb[6].mxu0 }
 0x18a   : > { %v2652_v52 = vadd.f32 %v2651_v29, %v2650_v38  ;;  %v3086_v10 = vpack.c.bf16 %v3393_v44, %v3393_v44  ;;  %v2455_v7 = vpop.f32.mrb[7].mxu0  ;;  %v2601_v49 = vadd.f32 %v2600_v5, %v2599_v39  ;;  %v3395_v4 = vadd.f32 %v3378_v27, %v3288_v11 }
 0x18b   : > { %v3084_v40 = vpack.c.bf16 %v3394_v15, %v3394_v15  ;;  %v2602_v6 = vsel %vm1016_vm5, %v3394_v15, 0.0  ;;  %v2636_v1 = vmul.f32 %v3394_v15, %v3394_v15  ;;  %v3396_v41 = vadd.f32 %v2455_v7, %v1516_v19 }
 0x18c   : > { %2585 = vst.msk [vmem:[%s4360_s23 + $0x18] sm:$0xf] %vm624_vm4, %v3086_v10  ;;  %v2654_v58 = vadd.f32 %v2653_v47, %v2652_v52  ;;  %v2603_v55 = vadd.f32 %v2602_v6, %v2601_v49  ;;  %v3087_v63 = vpack.c.bf16 %v3395_v4, %v3395_v4  ;;  %v2638_v46 = vmul.f32 %v3393_v44, %v3393_v44 }
 0x18d   : > { %2583 = vst.msk [vmem:[%s4360_s23 + $0x10] sm:$0xf] %vm624_vm4, %v3084_v40  ;;  %v2655_v21 = vsel %vm1016_vm5, %v2636_v1, 0.0  ;;  %v3085_v13 = vpack.c.bf16 %v3396_v41, %v3396_v41  ;;  %v2604_v8 = vsel %vm1016_vm5, %v3396_v41, 0.0  ;;  %v2637_v32 = vmul.f32 %v3396_v41, %v3396_v41 }
 0x18e   : > { %v2656_v62 = vadd.f32 %v2655_v21, %v2654_v58  ;;  %2586 = vst.msk [vmem:[%s4360_s23 + $0x1c] sm:$0xf] %vm624_vm4, %v3087_v63  ;;  %v2605_v3 = vadd.f32 %v2604_v8, %v2603_v55  ;;  %v2606_v54 = vsel %vm1016_vm5, %v3393_v44, 0.0  ;;  %v2639_v48 = vmul.f32 %v3395_v4, %v3395_v4 }
 0x18f   : > { %v3381_v61 = vpop.f32.mrb[8].mxu0  ;;  %2584 = vst.msk [vmem:[%s4360_s23 + $0x14] sm:$0xf] %vm624_vm4, %v3085_v13  ;;  %v2657_v14 = vsel %vm1016_vm5, %v2637_v32, 0.0  ;;  %v2659_v23 = vsel %vm1016_vm5, %v2638_v46, 0.0  ;;  %v2608_v56 = vsel %vm1016_vm5, %v3395_v4, 0.0 }
 0x190   : > { %v2468_v0 = vpop.f32.mrb[9].mxu0  ;;  %v2607_v28 = vadd.f32 %v2606_v54, %v2605_v3  ;;  %v2658_v2 = vadd.f32 %v2657_v14, %v2656_v62  ;;  %v2661_v42 = vsel %vm1016_vm5, %v2639_v48, 0.0 }
 0x191   : > { %v3382_v12 = vpop.f32.mrb[10].mxu0 }
 0x192   : > { %v2471_v24 = vpop.f32.mrb[11].mxu0  ;;  %v2660_v57 = vadd.f32 %v2659_v23, %v2658_v2  ;;  %v2609_v11 = vadd.f32 %v2608_v56, %v2607_v28 }
 0x194   : > { %v2662_v59 = vadd.f32 %v2661_v42, %v2660_v57 }
 0x195   : > { %v3309_v22 = vpop.f32.mrb[8].mxu1 }
 0x196   : > { %v3397_v19 = vadd.f32 %v3381_v61, %v3309_v22  ;;  %v1655_v26 = vpop.f32.mrb[9].mxu1 }
 0x197   : > { %v3398_v18 = vadd.f32 %v2468_v0, %v1655_v26  ;;  %v3385_v20 = vpop.f32.mrb[12].mxu0  ;;  %v3310_v33 = vpop.f32.mrb[10].mxu1 }
 0x198   : > { %v3090_v37 = vpack.c.bf16 %v3397_v19, %v3397_v19  ;;  %v3399_v30 = vadd.f32 %v3382_v12, %v3310_v33  ;;  %v2484_v50 = vpop.f32.mrb[13].mxu0  ;;  %v1658_v53 = vpop.f32.mrb[11].mxu1  ;;  %v2642_v39 = vmul.f32 %v3397_v19, %v3397_v19  ;;  %v2614_v29 = vsel %vm1016_vm5, %v3397_v19, 0.0 }
 0x199   : > { %v3088_v9 = vpack.c.bf16 %v3398_v18, %v3398_v18  ;;  %v2610_v25 = vsel %vm1016_vm5, %v3398_v18, 0.0  ;;  %v2640_v16 = vmul.f32 %v3398_v18, %v3398_v18  ;;  %v3400_v43 = vadd.f32 %v2471_v24, %v1658_v53  ;;  %v3386_v45 = vpop.f32.mrb[14].mxu0 }
 0x19a   : > { %2589 = vst.msk [vmem:[%s4360_s23 + $0x28] sm:$0xf] %vm624_vm4, %v3090_v37  ;;  %v2611_v17 = vadd.f32 %v2610_v25, %v2609_v11  ;;  %v3091_v34 = vpack.c.bf16 %v3399_v30, %v3399_v30  ;;  %v2487_v31 = vpop.f32.mrb[15].mxu0  ;;  %v2643_v27 = vmul.f32 %v3399_v30, %v3399_v30  ;;  %v2616_v7 = vsel %vm1016_vm5, %v3399_v30, 0.0 }
 0x19b   : > { %2587 = vst.msk [vmem:[%s4360_s23 + $0x20] sm:$0xf] %vm624_vm4, %v3088_v9  ;;  %v2663_v35 = vsel %vm1016_vm5, %v2640_v16, 0.0  ;;  %v3089_v51 = vpack.c.bf16 %v3400_v43, %v3400_v43  ;;  %v2612_v60 = vsel %vm1016_vm5, %v3400_v43, 0.0  ;;  %v2641_v36 = vmul.f32 %v3400_v43, %v3400_v43 }
 0x19c   : > { %v2664_v38 = vadd.f32 %v2663_v35, %v2662_v59  ;;  %2590 = vst.msk [vmem:[%s4360_s23 + $0x2c] sm:$0xf] %vm624_vm4, %v3091_v34  ;;  %v2613_v44 = vadd.f32 %v2612_v60, %v2611_v17  ;;  %v2667_v1 = vsel %vm1016_vm5, %v2642_v39, 0.0  ;;  %v2669_v46 = vsel %vm1016_vm5, %v2643_v27, 0.0 }
 0x19d   : > { %2588 = vst.msk [vmem:[%s4360_s23 + $0x24] sm:$0xf] %vm624_vm4, %v3089_v51  ;;  %v3313_v15 = vpop.f32.mrb[12].mxu1  ;;  %v2665_v47 = vsel %vm1016_vm5, %v2641_v36, 0.0  ;;  %v2685_v30 = vlaneseq }
 0x19e   : > { %v2615_v5 = vadd.f32 %v2614_v29, %v2613_v44  ;;  %v3401_v52 = vadd.f32 %v3385_v20, %v3313_v15  ;;  %v1671_v10 = vpop.f32.mrb[13].mxu1  ;;  %v2666_v40 = vadd.f32 %v2665_v47, %v2664_v38 }
 0x19f   : > { %v3402_v49 = vadd.f32 %v2484_v50, %v1671_v10  ;;  %v3314_v6 = vpop.f32.mrb[14].mxu1  ;;  %v2686_v16 = vshrl.u32 %v2685_v30, 7 }
 0x1a0   : > { %v3094_v58 = vpack.c.bf16 %v3401_v52, %v3401_v52  ;;  %v2617_v4 = vadd.f32 %v2616_v7, %v2615_v5  ;;  %v1674_v41 = vpop.f32.mrb[15].mxu1  ;;  %v2668_v55 = vadd.f32 %v2667_v1, %v2666_v40  ;;  %v3403_v8 = vadd.f32 %v3386_v45, %v3314_v6 }
 0x1a1   : > { %v3092_v21 = vpack.c.bf16 %v3402_v49, %v3402_v49  ;;  %v2618_v62 = vsel %vm1016_vm5, %v3402_v49, 0.0  ;;  %v2644_v63 = vmul.f32 %v3402_v49, %v3402_v49  ;;  %v3404_v32 = vadd.f32 %v2487_v31, %v1674_v41 }
 0x1a2   : > { %2593 = vst.msk [vmem:[%s4360_s23 + $0x38] sm:$0xf] %vm624_vm4, %v3094_v58  ;;  %v2619_v13 = vadd.f32 %v2618_v62, %v2617_v4  ;;  %v2670_v61 = vadd.f32 %v2669_v46, %v2668_v55  ;;  %v3095_v0 = vpack.c.bf16 %v3403_v8, %v3403_v8  ;;  %v2646_v48 = vmul.f32 %v3401_v52, %v3401_v52 }
 0x1a3   : > { %2591 = vst.msk [vmem:[%s4360_s23 + $0x30] sm:$0xf] %vm624_vm4, %v3092_v21  ;;  %v2671_v3 = vsel %vm1016_vm5, %v2644_v63, 0.0  ;;  %v3093_v54 = vpack.c.bf16 %v3404_v32, %v3404_v32  ;;  %v2620_v12 = vsel %vm1016_vm5, %v3404_v32, 0.0  ;;  %v2645_v28 = vmul.f32 %v3404_v32, %v3404_v32 }
 0x1a4   : > { %v2672_v14 = vadd.f32 %v2671_v3, %v2670_v61  ;;  %2594 = vst.msk [vmem:[%s4360_s23 + $0x3c] sm:$0xf] %vm624_vm4, %v3095_v0  ;;  %v2621_v2 = vadd.f32 %v2620_v12, %v2619_v13  ;;  %v2622_v24 = vsel %vm1016_vm5, %v3401_v52, 0.0  ;;  %v2647_v23 = vmul.f32 %v3403_v8, %v3403_v8 }
 0x1a5   : > { %2592 = vst.msk [vmem:[%s4360_s23 + $0x34] sm:$0xf] %vm624_vm4, %v3093_v54  ;;  %v2673_v56 = vsel %vm1016_vm5, %v2645_v28, 0.0  ;;  %v2675_v42 = vsel %vm1016_vm5, %v2646_v48, 0.0  ;;  %v2624_v22 = vsel %vm1016_vm5, %v3403_v8, 0.0  ;;  %vm2688_vm14 = vcmp.eq.s32.totalorder %v2686_v16, 1 }
 0x1a6   : > { %v2623_v57 = vadd.f32 %v2622_v24, %v2621_v2  ;;  %v2674_v11 = vadd.f32 %v2673_v56, %v2672_v14  ;;  %v2677_v59 = vsel %vm1016_vm5, %v2647_v23, 0.0  ;;  %vm2687_vm15 = vcmp.eq.s32.totalorder %v2686_v16, 0 }
 0x1a8   : > { %v2625_v19 = vadd.f32 %v2624_v22, %v2623_v57  ;;  %v2676_v26 = vadd.f32 %v2675_v42, %v2674_v11 }
 0x1aa   : > { %v2626_v18 = vrot.slane %v2625_v19, 4  ;;  %v2678_v20 = vadd.f32 %v2677_v59, %v2676_v26 }
 0x1ac   : > { %v2627_v33 = vadd.f32 %v2626_v18, %v2625_v19  ;;  %v2679_v37 = vrot.slane %v2678_v20, 4 }
 0x1ae   : > { %v2628_v50 = vrot.slane %v2627_v33, 2  ;;  %v2680_v53 = vadd.f32 %v2679_v37, %v2678_v20 }
 0x1b0   : > { %v2629_v9 = vadd.f32 %v2628_v50, %v2627_v33  ;;  %v2681_v25 = vrot.slane %v2680_v53, 2 }
 0x1b2   : > { %v2682_v43 = vadd.f32 %v2681_v25, %v2680_v53  ;;  %v2630_v45 = vrot.slane %v2629_v9, 1 }
 0x1b4   : > { %v2683_v17 = vrot.slane %v2682_v43, 1  ;;  %v2631_v31 = vadd.f32 %v2630_v45, %v2629_v9 }
 0x1b6   : > { %v2684_v34 = vadd.f32 %v2683_v17, %v2682_v43 }
 0x1b8   : > { %v2689_v35 = vsel %vm2688_vm14, %v2684_v34, 0.0 }
 0x1b9   : > { %v2690_v51 = vsel %vm2687_vm15, %v2631_v31, %v2689_v35 }
 0x1ba   : > { %2691 = vst.msk [vmem:[%s461_s9] sm:$0xff] %vm1016_vm5, %v2690_v51 }
 0x1bb PF: > { %s18_s28 = sadd.s32 1, %s3611_s28   ;;  %s4466_s24 = smov %s3603_s26 }
 0x1bc   : > { %p15_p0 = scmp.ge.s32.totalorder %s18_s28, 6   ;;  %s4467_s25 = smov %s3607_s27 }
 0x1bd   : > { %s4468_s26 = smov %s4471_s29  ;;  %s4469_s27 = smov %s4475_s30 }
 0x1be   :  { %17 = sbr.rel (!%p15_p0) target bundleno = 3 (0x3), region = 103 }

</bundles_post_ra>
